<compile_context>
chip_gen: v6e
topology: v6e:2x2x1
jax: 0.10.0
libtpu: 0.0.40
codegen_flags: <defaults>
</compile_context>

<pallas_src>
import functools

import jax
import jax.numpy as jnp
from jax.experimental import pallas as pl
from jax.experimental.pallas import tpu as pltpu

LANE = 128


def make_divisible(value, divisor, min_value=None, round_down_protect=True):
    if min_value is None:
        min_value = divisor
    new_value = max(min_value, int(value + divisor / 2) // divisor * divisor)
    if round_down_protect and new_value < 0.9 * value:
        new_value += divisor
    return new_value


def _round_up(v, m):
    return (v + m - 1) // m * m


def _pad_last(a, target):
    pad = target - a.shape[-1]
    if pad == 0:
        return a
    widths = [(0, 0)] * (a.ndim - 1) + [(0, pad)]
    return jnp.pad(a, widths)


def _pad2d(a, t0, t1):
    return jnp.pad(a, ((0, t0 - a.shape[0]), (0, t1 - a.shape[1])))


def fold_bn(gamma, beta, mean, var, eps=1e-5):
    scale = gamma / jnp.sqrt(var + eps)
    bias = beta - mean * scale
    return scale, bias


# ----------------------------------------------------------------------------
# Fused UIB kernel factory
# ----------------------------------------------------------------------------
def _make_uib_kernel(*, K1, s1, K2, s2, H, W, identity):
    has_start = K1 > 0
    has_mid = K2 > 0
    p1 = (K1 - 1) // 2 if has_start else 0
    p2 = (K2 - 1) // 2 if has_mid else 0
    H1 = (H + 2 * p1 - K1) // s1 + 1 if has_start else H
    W1 = (W + 2 * p1 - K1) // s1 + 1 if has_start else W
    H2 = (H1 + 2 * p2 - K2) // s2 + 1 if has_mid else H1
    W2 = (W1 + 2 * p2 - K2) // s2 + 1 if has_mid else W1

    def _dw_taps(xpad, w2d, K, s, Ho, Wo):
        # xpad: (Hp, Wp, C) value in its native dtype; w2d: (K*K, C) f32 value.
        # Per-tap cast fused into the MAC; f32 accumulator (no full-tile upcast).
        C = xpad.shape[-1]
        acc = jnp.zeros((Ho, Wo, C), jnp.float32)
        for kh in range(K):
            for kw in range(K):
                win = xpad[kh:kh + s * (Ho - 1) + 1, kw:kw + s * (Wo - 1) + 1, :]
                if s > 1:
                    # TODO(synk): stride>1 strided-window path is coded but not
                    # exercised by the demo config (stride=1).
                    win = win[::s, ::s, :]
                tap = kh * K + kw
                acc = acc + win.astype(jnp.float32) * w2d[tap:tap + 1, :]
        return acc

    def kernel(*refs):
        it = iter(refs)
        x_ref = next(it)
        if has_start:
            w1_ref, sc1_ref, b1_ref = next(it), next(it), next(it)
        we_ref, sce_ref, be_ref = next(it), next(it), next(it)
        if has_mid:
            w2_ref, sc2_ref, b2_ref = next(it), next(it), next(it)
        wp_ref, scp_ref, bp_ref = next(it), next(it), next(it)
        o_ref = next(it)
        xpad_scr = next(it) if has_start else None
        mid_scr = next(it) if has_mid else None

        x = x_ref[0]                                        # (H, W, Cin_p)

        # ---- start depthwise conv + folded BN (no activation) -------------
        if has_start:
            xpad_scr[...] = jnp.zeros(xpad_scr.shape, xpad_scr.dtype)
            xpad_scr[p1:p1 + H, p1:p1 + W, :] = x
            acc = _dw_taps(xpad_scr[...], w1_ref[...], K1, s1, H1, W1)
            y = acc * sc1_ref[...] + b1_ref[...]            # f32
            a_mat = y.reshape(H1 * W1, y.shape[-1]).astype(jnp.bfloat16)
        else:
            a_mat = x.reshape(H1 * W1, x.shape[-1]).astype(jnp.bfloat16)

        # ---- expand 1x1 conv (MXU, bf16 x bf16 -> f32) + BN + ReLU ---------
        y2 = jnp.dot(a_mat, we_ref[...], preferred_element_type=jnp.float32)
        y2 = jnp.maximum(y2 * sce_ref[...] + be_ref[...], 0.0)   # (H1*W1, Cexp_p)
        cexp_p = y2.shape[-1]

        # ---- middle depthwise conv + BN + ReLU (expanded act stays in VMEM)
        if has_mid:
            mid_scr[...] = jnp.zeros(mid_scr.shape, mid_scr.dtype)
            mid_scr[p2:p2 + H1, p2:p2 + W1, :] = (
                y2.reshape(H1, W1, cexp_p).astype(mid_scr.dtype))
            acc = _dw_taps(mid_scr[...], w2_ref[...], K2, s2, H2, W2)
            y3 = jnp.maximum(acc * sc2_ref[...] + b2_ref[...], 0.0)
            b_mat = y3.reshape(H2 * W2, cexp_p).astype(jnp.bfloat16)
        else:
            b_mat = y2.astype(jnp.bfloat16)

        # ---- proj 1x1 conv (MXU) + BN + layer-scale (+ residual) -----------
        y4 = jnp.dot(b_mat, wp_ref[...], preferred_element_type=jnp.float32)
        y4 = y4 * scp_ref[...] + bp_ref[...]
        y4 = y4.reshape(H2, W2, y4.shape[-1])
        if identity:
            y4 = y4 + x.astype(jnp.float32)                 # shortcut already in VMEM
        o_ref[0] = y4.astype(o_ref.dtype)

    return kernel, dict(p1=p1, p2=p2, H1=H1, W1=W1, H2=H2, W2=W2)


# ----------------------------------------------------------------------------
# Forward wrapper: parameter folding / lane-dense padding / pallas_call
# ----------------------------------------------------------------------------
def uib_forward(x_nchw, p, cfg):
    stride = cfg["stride"]
    mdd = cfg["middle_dw_downsample"]
    cin = cfg["in_channels"]
    cout = cfg["out_channels"]
    K1 = cfg["start_dw_kernel_size"]
    K2 = cfg["middle_dw_kernel_size"]
    s1 = (stride if not mdd else 1) if K1 else 1
    s2 = (stride if mdd else 1) if K2 else 1
    cexp = p["expand_w"].shape[1]
    identity = (stride == 1) and (cin == cout)

    N, _, H, W = x_nchw.shape
    cin_p = _round_up(cin, LANE)
    cexp_p = _round_up(cexp, LANE)
    cout_p = _round_up(cout, LANE)

    # NCHW -> NHWC; zero-pad channels to a lane-dense multiple of 128.
    x = jnp.transpose(x_nchw, (0, 2, 3, 1))
    x = _pad_last(x, cin_p)

    kernel, sh = _make_uib_kernel(K1=K1, s1=s1, K2=K2, s2=s2, H=H, W=W,
                                  identity=identity)
    H1, W1, H2, W2 = sh["H1"], sh["W1"], sh["H2"], sh["W2"]
    p1, p2 = sh["p1"], sh["p2"]

    f32 = jnp.float32
    in_specs = [pl.BlockSpec((1, H, W, cin_p), lambda n: (n, 0, 0, 0))]
    args = [x]
    flops = 0

    if K1:
        in_specs += [pl.BlockSpec((K1 * K1, cin_p), lambda n: (0, 0)),
                     pl.BlockSpec((1, cin_p), lambda n: (0, 0)),
                     pl.BlockSpec((1, cin_p), lambda n: (0, 0))]
        args += [_pad_last(p["start_dw_w"].reshape(K1 * K1, cin), cin_p).astype(f32),
                 _pad_last(p["start_scale"].reshape(1, cin), cin_p).astype(f32),
                 _pad_last(p["start_bias"].reshape(1, cin), cin_p).astype(f32)]
        flops += 2 * K1 * K1 * N * H1 * W1 * cin_p

    in_specs += [pl.BlockSpec((cin_p, cexp_p), lambda n: (0, 0)),
                 pl.BlockSpec((1, cexp_p), lambda n: (0, 0)),
                 pl.BlockSpec((1, cexp_p), lambda n: (0, 0))]
    args += [_pad2d(p["expand_w"], cin_p, cexp_p).astype(jnp.bfloat16),
             _pad_last(p["expand_scale"].reshape(1, cexp), cexp_p).astype(f32),
             _pad_last(p["expand_bias"].reshape(1, cexp), cexp_p).astype(f32)]
    flops += 2 * N * H1 * W1 * cin_p * cexp_p

    if K2:
        in_specs += [pl.BlockSpec((K2 * K2, cexp_p), lambda n: (0, 0)),
                     pl.BlockSpec((1, cexp_p), lambda n: (0, 0)),
                     pl.BlockSpec((1, cexp_p), lambda n: (0, 0))]
        args += [_pad_last(p["middle_dw_w"].reshape(K2 * K2, cexp), cexp_p).astype(f32),
                 _pad_last(p["middle_scale"].reshape(1, cexp), cexp_p).astype(f32),
                 _pad_last(p["middle_bias"].reshape(1, cexp), cexp_p).astype(f32)]
        flops += 2 * K2 * K2 * N * H2 * W2 * cexp_p

    proj_scale, proj_bias = p["proj_scale"], p["proj_bias"]
    if cfg["use_layer_scale"]:
        proj_scale = proj_scale * p["gamma"]
        proj_bias = proj_bias * p["gamma"]
    in_specs += [pl.BlockSpec((cexp_p, cout_p), lambda n: (0, 0)),
                 pl.BlockSpec((1, cout_p), lambda n: (0, 0)),
                 pl.BlockSpec((1, cout_p), lambda n: (0, 0))]
    args += [_pad2d(p["proj_w"], cexp_p, cout_p).astype(jnp.bfloat16),
             _pad_last(proj_scale.reshape(1, cout), cout_p).astype(f32),
             _pad_last(proj_bias.reshape(1, cout), cout_p).astype(f32)]
    flops += 2 * N * H2 * W2 * cexp_p * cout_p

    scratch_shapes = []
    if K1:
        scratch_shapes.append(pltpu.VMEM((H + 2 * p1, W + 2 * p1, cin_p), x.dtype))
    if K2:
        scratch_shapes.append(pltpu.VMEM((H1 + 2 * p2, W1 + 2 * p2, cexp_p), jnp.float32))
    # TODO(synk): for very large H*W*Cexp the per-image VMEM scratch should be
    # further tiled over H rows with a halo; not needed at these shapes.

    bytes_accessed = x.size * x.dtype.itemsize + N * H2 * W2 * cout_p * x.dtype.itemsize
    for a in args[1:]:
        bytes_accessed += a.size * a.dtype.itemsize

    out = pl.pallas_call(
        kernel,
        out_shape=jax.ShapeDtypeStruct((N, H2, W2, cout_p), x.dtype),
        grid_spec=pltpu.PrefetchScalarGridSpec(
            num_scalar_prefetch=0,
            grid=(N,),
            in_specs=in_specs,
            out_specs=pl.BlockSpec((1, H2, W2, cout_p), lambda n: (n, 0, 0, 0)),
            scratch_shapes=scratch_shapes,
        ),
        compiler_params=pltpu.CompilerParams(
            dimension_semantics=("parallel",),          # batch axis -> v7x megacore
            vmem_limit_bytes=48 * 1024 * 1024,
        ),
        cost_estimate=pl.CostEstimate(flops=int(flops), transcendentals=0,
                                      bytes_accessed=int(bytes_accessed)),
    )(*args)

    out = out[..., :cout]                               # drop lane padding
    return jnp.transpose(out, (0, 3, 1, 2))             # NHWC -> NCHW


# ----------------------------------------------------------------------------
# Parameters (inference-mode BN folded) and pure-JAX reference
# ----------------------------------------------------------------------------
def init_params(key, cfg):
    cin, cout = cfg["in_channels"], cfg["out_channels"]
    cexp = make_divisible(cin * cfg["expand_ratio"], 8)
    k1, k2 = cfg["start_dw_kernel_size"], cfg["middle_dw_kernel_size"]
    ks = jax.random.split(key, 8)
    p = {}

    def bn_params(k, c):
        ka, kb, kc, kd = jax.random.split(k, 4)
        g = jax.random.uniform(ka, (c,), minval=0.5, maxval=1.5)
        b = 0.1 * jax.random.normal(kb, (c,))
        m = 0.1 * jax.random.normal(kc, (c,))
        v = jax.random.uniform(kd, (c,), minval=0.5, maxval=1.5)
        return fold_bn(g, b, m, v)

    if k1:
        p["start_dw_w"] = 0.2 * jax.random.normal(ks[0], (k1, k1, cin))
        p["start_scale"], p["start_bias"] = bn_params(ks[1], cin)
    p["expand_w"] = 0.2 * jax.random.normal(ks[2], (cin, cexp))
    p["expand_scale"], p["expand_bias"] = bn_params(ks[3], cexp)
    if k2:
        p["middle_dw_w"] = 0.2 * jax.random.normal(ks[4], (k2, k2, cexp))
        p["middle_scale"], p["middle_bias"] = bn_params(ks[5], cexp)
    p["proj_w"] = 0.2 * jax.random.normal(ks[6], (cexp, cout))
    p["proj_scale"], p["proj_bias"] = bn_params(ks[7], cout)
    if cfg["use_layer_scale"]:
        p["gamma"] = cfg["layer_scale_init_value"] * jnp.ones((cout,))
    return jax.tree.map(lambda a: a.astype(jnp.float32), p)


def ref_forward(x_nchw, p, cfg):
    def dw_ref(x, w, scale, bias, stride, relu):
        K, _, C = w.shape
        pad = (K - 1) // 2
        y = jax.lax.conv_general_dilated(
            x, w.reshape(K, K, 1, C), window_strides=(stride, stride),
            padding=((pad, pad), (pad, pad)),
            dimension_numbers=("NHWC", "HWIO", "NHWC"), feature_group_count=C)
        y = y * scale.reshape(1, 1, 1, -1) + bias.reshape(1, 1, 1, -1)
        return jnp.maximum(y, 0.0) if relu else y

    stride, mdd = cfg["stride"], cfg["middle_dw_downsample"]
    x = jnp.transpose(x_nchw, (0, 2, 3, 1))
    shortcut = x
    if cfg["start_dw_kernel_size"]:
        x = dw_ref(x, p["start_dw_w"], p["start_scale"], p["start_bias"],
                   stride if not mdd else 1, False)
    x = jnp.einsum("nhwc,cd->nhwd", x, p["expand_w"])
    x = jnp.maximum(x * p["expand_scale"] + p["expand_bias"], 0.0)
    if cfg["middle_dw_kernel_size"]:
        x = dw_ref(x, p["middle_dw_w"], p["middle_scale"], p["middle_bias"],
                   stride if mdd else 1, True)
    x = jnp.einsum("nhwc,cd->nhwd", x, p["proj_w"])
    x = x * p["proj_scale"] + p["proj_bias"]
    if cfg["use_layer_scale"]:
        x = x * p["gamma"]
    if stride == 1 and cfg["in_channels"] == cfg["out_channels"]:
        x = x + shortcut
    return jnp.transpose(x, (0, 3, 1, 2))


if __name__ == "__main__":
    cfg = dict(
        in_channels=4, out_channels=4, expand_ratio=4.0,
        start_dw_kernel_size=3, middle_dw_kernel_size=3, stride=1,
        middle_dw_downsample=True, use_layer_scale=True,
        layer_scale_init_value=1e-5,
    )
    key = jax.random.PRNGKey(0)
    kx, kp = jax.random.split(key)
    x = jax.random.normal(kx, (2, 4, 16, 16), dtype=jnp.float32)  # NCHW
    params = init_params(kp, cfg)

    fwd = jax.jit(functools.partial(uib_forward, cfg=cfg))
    out = jax.block_until_ready(fwd(x, params))

    ref = jax.block_until_ready(ref_forward(x, params, cfg))
    assert out.shape == (2, 4, 16, 16), out.shape
    # Tolerance accounts for bf16 MXU operands (f32 accumulation) vs f32 reference.
    err = float(jnp.max(jnp.abs(out - ref)))
    assert err < 2e-2, f"max err {err}"
    print("KERNEL_OK")
</pallas_src>

<mosaic_0001>
module attributes {stable_mosaic.version = 11 : i64} {
  func.func @kernel(%arg0: i32, %arg1: memref<1x16x16x128xf32, #tpu.memory_space<vmem>>, %arg2: memref<9x128xf32, #tpu.memory_space<vmem>>, %arg3: memref<1x128xf32, #tpu.memory_space<vmem>>, %arg4: memref<1x128xf32, #tpu.memory_space<vmem>>, %arg5: memref<128x128xbf16, #tpu.memory_space<vmem>>, %arg6: memref<1x128xf32, #tpu.memory_space<vmem>>, %arg7: memref<1x128xf32, #tpu.memory_space<vmem>>, %arg8: memref<9x128xf32, #tpu.memory_space<vmem>>, %arg9: memref<1x128xf32, #tpu.memory_space<vmem>>, %arg10: memref<1x128xf32, #tpu.memory_space<vmem>>, %arg11: memref<128x128xbf16, #tpu.memory_space<vmem>>, %arg12: memref<1x128xf32, #tpu.memory_space<vmem>>, %arg13: memref<1x128xf32, #tpu.memory_space<vmem>>, %arg14: memref<1x16x16x128xf32, #tpu.memory_space<vmem>>, %arg15: memref<18x18x128xf32, #tpu.memory_space<vmem>>, %arg16: memref<18x18x128xf32, #tpu.memory_space<vmem>>) attributes {dimension_semantics = [#tpu.dimension_semantics<parallel>], iteration_bounds = array<i64: 2>, scalar_prefetch = 0 : i64, scratch_operands = 2 : i64, tpu.core_type = #tpu.core_type<tc>, window_params = [{transform_indices = @transform_0, window_bounds = array<i64: 1, 16, 16, 128>}, {pipeline_mode = #tpu.pipeline_mode<synchronous>, transform_indices = @transform_1, window_bounds = array<i64: 9, 128>}, {pipeline_mode = #tpu.pipeline_mode<synchronous>, transform_indices = @transform_2, window_bounds = array<i64: 1, 128>}, {pipeline_mode = #tpu.pipeline_mode<synchronous>, transform_indices = @transform_3, window_bounds = array<i64: 1, 128>}, {pipeline_mode = #tpu.pipeline_mode<synchronous>, transform_indices = @transform_4, window_bounds = array<i64: 128, 128>}, {pipeline_mode = #tpu.pipeline_mode<synchronous>, transform_indices = @transform_5, window_bounds = array<i64: 1, 128>}, {pipeline_mode = #tpu.pipeline_mode<synchronous>, transform_indices = @transform_6, window_bounds = array<i64: 1, 128>}, {pipeline_mode = #tpu.pipeline_mode<synchronous>, transform_indices = @transform_7, window_bounds = array<i64: 9, 128>}, {pipeline_mode = #tpu.pipeline_mode<synchronous>, transform_indices = @transform_8, window_bounds = array<i64: 1, 128>}, {pipeline_mode = #tpu.pipeline_mode<synchronous>, transform_indices = @transform_9, window_bounds = array<i64: 1, 128>}, {pipeline_mode = #tpu.pipeline_mode<synchronous>, transform_indices = @transform_10, window_bounds = array<i64: 128, 128>}, {pipeline_mode = #tpu.pipeline_mode<synchronous>, transform_indices = @transform_11, window_bounds = array<i64: 1, 128>}, {pipeline_mode = #tpu.pipeline_mode<synchronous>, transform_indices = @transform_12, window_bounds = array<i64: 1, 128>}, {transform_indices = @transform_13, window_bounds = array<i64: 1, 16, 16, 128>}]} {
    %c0 = arith.constant 0 : index
    %c0_0 = arith.constant 0 : index
    %c0_1 = arith.constant 0 : index
    %c0_2 = arith.constant 0 : index
    %0 = vector.load %arg1[%c0, %c0_0, %c0_1, %c0_2] : memref<1x16x16x128xf32, #tpu.memory_space<vmem>>, vector<1x16x16x128xf32>
    %1 = vector.shape_cast %0 : vector<1x16x16x128xf32> to vector<16x16x128xf32>
    %cst = arith.constant 0.000000e+00 : f32
    %2 = vector.broadcast %cst : f32 to vector<18x18x128xf32>
    %c0_3 = arith.constant 0 : index
    %c0_4 = arith.constant 0 : index
    %c0_5 = arith.constant 0 : index
    %3 = vector.load %arg15[%c0_3, %c0_4, %c0_5] : memref<18x18x128xf32, #tpu.memory_space<vmem>>, vector<18x18x128xf32>
    tpu.vector_store %arg15[%c0_3, %c0_4, %c0_5], %2 {strides = array<i32>} : memref<18x18x128xf32, #tpu.memory_space<vmem>>, vector<18x18x128xf32>,
    %c1 = arith.constant 1 : index
    %c1_6 = arith.constant 1 : index
    %c0_7 = arith.constant 0 : index
    %4 = vector.load %arg15[%c1, %c1_6, %c0_7] : memref<18x18x128xf32, #tpu.memory_space<vmem>>, vector<16x16x128xf32>
    tpu.vector_store %arg15[%c1, %c1_6, %c0_7], %1 {strides = array<i32>} : memref<18x18x128xf32, #tpu.memory_space<vmem>>, vector<16x16x128xf32>,
    %c0_8 = arith.constant 0 : index
    %c0_9 = arith.constant 0 : index
    %c0_10 = arith.constant 0 : index
    %5 = vector.load %arg15[%c0_8, %c0_9, %c0_10] : memref<18x18x128xf32, #tpu.memory_space<vmem>>, vector<18x18x128xf32>
    %c0_11 = arith.constant 0 : index
    %c0_12 = arith.constant 0 : index
    %6 = vector.load %arg2[%c0_11, %c0_12] : memref<9x128xf32, #tpu.memory_space<vmem>>, vector<9x128xf32>
    %cst_13 = arith.constant 0.000000e+00 : f32
    %7 = vector.broadcast %cst_13 : f32 to vector<16x16x128xf32>
    %8 = vector.extract_strided_slice %5 {offsets = [0, 0, 0], sizes = [16, 16, 128], strides = [1, 1, 1]} : vector<18x18x128xf32> to vector<16x16x128xf32>
    %9 = vector.extract_strided_slice %6 {offsets = [0, 0], sizes = [1, 128], strides = [1, 1]} : vector<9x128xf32> to vector<1x128xf32>
    %10 = vector.shape_cast %9 : vector<1x128xf32> to vector<1x1x128xf32>
    %11 = vector.broadcast %10 : vector<1x1x128xf32> to vector<16x16x128xf32>
    %12 = arith.mulf %8, %11 : vector<16x16x128xf32>
    %13 = arith.addf %7, %12 : vector<16x16x128xf32>
    %14 = vector.extract_strided_slice %5 {offsets = [0, 1, 0], sizes = [16, 16, 128], strides = [1, 1, 1]} : vector<18x18x128xf32> to vector<16x16x128xf32>
    %15 = vector.extract_strided_slice %6 {offsets = [1, 0], sizes = [1, 128], strides = [1, 1]} : vector<9x128xf32> to vector<1x128xf32>
    %16 = vector.shape_cast %15 : vector<1x128xf32> to vector<1x1x128xf32>
    %17 = vector.broadcast %16 : vector<1x1x128xf32> to vector<16x16x128xf32>
    %18 = arith.mulf %14, %17 : vector<16x16x128xf32>
    %19 = arith.addf %13, %18 : vector<16x16x128xf32>
    %20 = vector.extract_strided_slice %5 {offsets = [0, 2, 0], sizes = [16, 16, 128], strides = [1, 1, 1]} : vector<18x18x128xf32> to vector<16x16x128xf32>
    %21 = vector.extract_strided_slice %6 {offsets = [2, 0], sizes = [1, 128], strides = [1, 1]} : vector<9x128xf32> to vector<1x128xf32>
    %22 = vector.shape_cast %21 : vector<1x128xf32> to vector<1x1x128xf32>
    %23 = vector.broadcast %22 : vector<1x1x128xf32> to vector<16x16x128xf32>
    %24 = arith.mulf %20, %23 : vector<16x16x128xf32>
    %25 = arith.addf %19, %24 : vector<16x16x128xf32>
    %26 = vector.extract_strided_slice %5 {offsets = [1, 0, 0], sizes = [16, 16, 128], strides = [1, 1, 1]} : vector<18x18x128xf32> to vector<16x16x128xf32>
    %27 = vector.extract_strided_slice %6 {offsets = [3, 0], sizes = [1, 128], strides = [1, 1]} : vector<9x128xf32> to vector<1x128xf32>
    %28 = vector.shape_cast %27 : vector<1x128xf32> to vector<1x1x128xf32>
    %29 = vector.broadcast %28 : vector<1x1x128xf32> to vector<16x16x128xf32>
    %30 = arith.mulf %26, %29 : vector<16x16x128xf32>
    %31 = arith.addf %25, %30 : vector<16x16x128xf32>
    %32 = vector.extract_strided_slice %5 {offsets = [1, 1, 0], sizes = [16, 16, 128], strides = [1, 1, 1]} : vector<18x18x128xf32> to vector<16x16x128xf32>
    %33 = vector.extract_strided_slice %6 {offsets = [4, 0], sizes = [1, 128], strides = [1, 1]} : vector<9x128xf32> to vector<1x128xf32>
    %34 = vector.shape_cast %33 : vector<1x128xf32> to vector<1x1x128xf32>
    %35 = vector.broadcast %34 : vector<1x1x128xf32> to vector<16x16x128xf32>
    %36 = arith.mulf %32, %35 : vector<16x16x128xf32>
    %37 = arith.addf %31, %36 : vector<16x16x128xf32>
    %38 = vector.extract_strided_slice %5 {offsets = [1, 2, 0], sizes = [16, 16, 128], strides = [1, 1, 1]} : vector<18x18x128xf32> to vector<16x16x128xf32>
    %39 = vector.extract_strided_slice %6 {offsets = [5, 0], sizes = [1, 128], strides = [1, 1]} : vector<9x128xf32> to vector<1x128xf32>
    %40 = vector.shape_cast %39 : vector<1x128xf32> to vector<1x1x128xf32>
    %41 = vector.broadcast %40 : vector<1x1x128xf32> to vector<16x16x128xf32>
    %42 = arith.mulf %38, %41 : vector<16x16x128xf32>
    %43 = arith.addf %37, %42 : vector<16x16x128xf32>
    %44 = vector.extract_strided_slice %5 {offsets = [2, 0, 0], sizes = [16, 16, 128], strides = [1, 1, 1]} : vector<18x18x128xf32> to vector<16x16x128xf32>
    %45 = vector.extract_strided_slice %6 {offsets = [6, 0], sizes = [1, 128], strides = [1, 1]} : vector<9x128xf32> to vector<1x128xf32>
    %46 = vector.shape_cast %45 : vector<1x128xf32> to vector<1x1x128xf32>
    %47 = vector.broadcast %46 : vector<1x1x128xf32> to vector<16x16x128xf32>
    %48 = arith.mulf %44, %47 : vector<16x16x128xf32>
    %49 = arith.addf %43, %48 : vector<16x16x128xf32>
    %50 = vector.extract_strided_slice %5 {offsets = [2, 1, 0], sizes = [16, 16, 128], strides = [1, 1, 1]} : vector<18x18x128xf32> to vector<16x16x128xf32>
    %51 = vector.extract_strided_slice %6 {offsets = [7, 0], sizes = [1, 128], strides = [1, 1]} : vector<9x128xf32> to vector<1x128xf32>
    %52 = vector.shape_cast %51 : vector<1x128xf32> to vector<1x1x128xf32>
    %53 = vector.broadcast %52 : vector<1x1x128xf32> to vector<16x16x128xf32>
    %54 = arith.mulf %50, %53 : vector<16x16x128xf32>
    %55 = arith.addf %49, %54 : vector<16x16x128xf32>
    %56 = vector.extract_strided_slice %5 {offsets = [2, 2, 0], sizes = [16, 16, 128], strides = [1, 1, 1]} : vector<18x18x128xf32> to vector<16x16x128xf32>
    %57 = vector.extract_strided_slice %6 {offsets = [8, 0], sizes = [1, 128], strides = [1, 1]} : vector<9x128xf32> to vector<1x128xf32>
    %58 = vector.shape_cast %57 : vector<1x128xf32> to vector<1x1x128xf32>
    %59 = vector.broadcast %58 : vector<1x1x128xf32> to vector<16x16x128xf32>
    %60 = arith.mulf %56, %59 : vector<16x16x128xf32>
    %61 = arith.addf %55, %60 : vector<16x16x128xf32>
    %c0_14 = arith.constant 0 : index
    %c0_15 = arith.constant 0 : index
    %62 = vector.load %arg3[%c0_14, %c0_15] : memref<1x128xf32, #tpu.memory_space<vmem>>, vector<1x128xf32>
    %63 = vector.shape_cast %62 : vector<1x128xf32> to vector<1x1x128xf32>
    %64 = vector.broadcast %63 : vector<1x1x128xf32> to vector<16x16x128xf32>
    %65 = arith.mulf %61, %64 : vector<16x16x128xf32>
    %c0_16 = arith.constant 0 : index
    %c0_17 = arith.constant 0 : index
    %66 = vector.load %arg4[%c0_16, %c0_17] : memref<1x128xf32, #tpu.memory_space<vmem>>, vector<1x128xf32>
    %67 = vector.shape_cast %66 : vector<1x128xf32> to vector<1x1x128xf32>
    %68 = vector.broadcast %67 : vector<1x1x128xf32> to vector<16x16x128xf32>
    %69 = arith.addf %65, %68 : vector<16x16x128xf32>
    %70 = vector.shape_cast %69 : vector<16x16x128xf32> to vector<256x128xf32>
    %71 = arith.truncf %70 : vector<256x128xf32> to vector<256x128xbf16>
    %c0_18 = arith.constant 0 : index
    %c0_19 = arith.constant 0 : index
    %72 = vector.load %arg5[%c0_18, %c0_19] : memref<128x128xbf16, #tpu.memory_space<vmem>>, vector<128x128xbf16>
    %cst_20 = arith.constant dense<0.000000e+00> : vector<256x128xf32>
    %73 = tpu.matmul %71, %72, %cst_20 {dimension_numbers = #tpu.dot_dimension_numbers<[1], [0], [0], [1], [0, 0, 1, 1], [], []>} : vector<256x128xbf16>, vector<128x128xbf16>, vector<256x128xf32> -> vector<256x128xf32>
    %c0_21 = arith.constant 0 : index
    %c0_22 = arith.constant 0 : index
    %74 = vector.load %arg6[%c0_21, %c0_22] : memref<1x128xf32, #tpu.memory_space<vmem>>, vector<1x128xf32>
    %75 = vector.broadcast %74 : vector<1x128xf32> to vector<256x128xf32>
    %76 = arith.mulf %73, %75 : vector<256x128xf32>
    %c0_23 = arith.constant 0 : index
    %c0_24 = arith.constant 0 : index
    %77 = vector.load %arg7[%c0_23, %c0_24] : memref<1x128xf32, #tpu.memory_space<vmem>>, vector<1x128xf32>
    %78 = vector.broadcast %77 : vector<1x128xf32> to vector<256x128xf32>
    %79 = arith.addf %76, %78 : vector<256x128xf32>
    %cst_25 = arith.constant 0.000000e+00 : f32
    %80 = vector.broadcast %cst_25 : f32 to vector<256x128xf32>
    %81 = arith.maximumf %79, %80 : vector<256x128xf32>
    %cst_26 = arith.constant 0.000000e+00 : f32
    %82 = vector.broadcast %cst_26 : f32 to vector<18x18x128xf32>
    %c0_27 = arith.constant 0 : index
    %c0_28 = arith.constant 0 : index
    %c0_29 = arith.constant 0 : index
    %83 = vector.load %arg16[%c0_27, %c0_28, %c0_29] : memref<18x18x128xf32, #tpu.memory_space<vmem>>, vector<18x18x128xf32>
    tpu.vector_store %arg16[%c0_27, %c0_28, %c0_29], %82 {strides = array<i32>} : memref<18x18x128xf32, #tpu.memory_space<vmem>>, vector<18x18x128xf32>,
    %84 = vector.shape_cast %81 : vector<256x128xf32> to vector<16x16x128xf32>
    %c1_30 = arith.constant 1 : index
    %c1_31 = arith.constant 1 : index
    %c0_32 = arith.constant 0 : index
    %85 = vector.load %arg16[%c1_30, %c1_31, %c0_32] : memref<18x18x128xf32, #tpu.memory_space<vmem>>, vector<16x16x128xf32>
    tpu.vector_store %arg16[%c1_30, %c1_31, %c0_32], %84 {strides = array<i32>} : memref<18x18x128xf32, #tpu.memory_space<vmem>>, vector<16x16x128xf32>,
    %c0_33 = arith.constant 0 : index
    %c0_34 = arith.constant 0 : index
    %c0_35 = arith.constant 0 : index
    %86 = vector.load %arg16[%c0_33, %c0_34, %c0_35] : memref<18x18x128xf32, #tpu.memory_space<vmem>>, vector<18x18x128xf32>
    %c0_36 = arith.constant 0 : index
    %c0_37 = arith.constant 0 : index
    %87 = vector.load %arg8[%c0_36, %c0_37] : memref<9x128xf32, #tpu.memory_space<vmem>>, vector<9x128xf32>
    %cst_38 = arith.constant 0.000000e+00 : f32
    %88 = vector.broadcast %cst_38 : f32 to vector<16x16x128xf32>
    %89 = vector.extract_strided_slice %86 {offsets = [0, 0, 0], sizes = [16, 16, 128], strides = [1, 1, 1]} : vector<18x18x128xf32> to vector<16x16x128xf32>
    %90 = vector.extract_strided_slice %87 {offsets = [0, 0], sizes = [1, 128], strides = [1, 1]} : vector<9x128xf32> to vector<1x128xf32>
    %91 = vector.shape_cast %90 : vector<1x128xf32> to vector<1x1x128xf32>
    %92 = vector.broadcast %91 : vector<1x1x128xf32> to vector<16x16x128xf32>
    %93 = arith.mulf %89, %92 : vector<16x16x128xf32>
    %94 = arith.addf %88, %93 : vector<16x16x128xf32>
    %95 = vector.extract_strided_slice %86 {offsets = [0, 1, 0], sizes = [16, 16, 128], strides = [1, 1, 1]} : vector<18x18x128xf32> to vector<16x16x128xf32>
    %96 = vector.extract_strided_slice %87 {offsets = [1, 0], sizes = [1, 128], strides = [1, 1]} : vector<9x128xf32> to vector<1x128xf32>
    %97 = vector.shape_cast %96 : vector<1x128xf32> to vector<1x1x128xf32>
    %98 = vector.broadcast %97 : vector<1x1x128xf32> to vector<16x16x128xf32>
    %99 = arith.mulf %95, %98 : vector<16x16x128xf32>
    %100 = arith.addf %94, %99 : vector<16x16x128xf32>
    %101 = vector.extract_strided_slice %86 {offsets = [0, 2, 0], sizes = [16, 16, 128], strides = [1, 1, 1]} : vector<18x18x128xf32> to vector<16x16x128xf32>
    %102 = vector.extract_strided_slice %87 {offsets = [2, 0], sizes = [1, 128], strides = [1, 1]} : vector<9x128xf32> to vector<1x128xf32>
    %103 = vector.shape_cast %102 : vector<1x128xf32> to vector<1x1x128xf32>
    %104 = vector.broadcast %103 : vector<1x1x128xf32> to vector<16x16x128xf32>
    %105 = arith.mulf %101, %104 : vector<16x16x128xf32>
    %106 = arith.addf %100, %105 : vector<16x16x128xf32>
    %107 = vector.extract_strided_slice %86 {offsets = [1, 0, 0], sizes = [16, 16, 128], strides = [1, 1, 1]} : vector<18x18x128xf32> to vector<16x16x128xf32>
    %108 = vector.extract_strided_slice %87 {offsets = [3, 0], sizes = [1, 128], strides = [1, 1]} : vector<9x128xf32> to vector<1x128xf32>
    %109 = vector.shape_cast %108 : vector<1x128xf32> to vector<1x1x128xf32>
    %110 = vector.broadcast %109 : vector<1x1x128xf32> to vector<16x16x128xf32>
    %111 = arith.mulf %107, %110 : vector<16x16x128xf32>
    %112 = arith.addf %106, %111 : vector<16x16x128xf32>
    %113 = vector.extract_strided_slice %86 {offsets = [1, 1, 0], sizes = [16, 16, 128], strides = [1, 1, 1]} : vector<18x18x128xf32> to vector<16x16x128xf32>
    %114 = vector.extract_strided_slice %87 {offsets = [4, 0], sizes = [1, 128], strides = [1, 1]} : vector<9x128xf32> to vector<1x128xf32>
    %115 = vector.shape_cast %114 : vector<1x128xf32> to vector<1x1x128xf32>
    %116 = vector.broadcast %115 : vector<1x1x128xf32> to vector<16x16x128xf32>
    %117 = arith.mulf %113, %116 : vector<16x16x128xf32>
    %118 = arith.addf %112, %117 : vector<16x16x128xf32>
    %119 = vector.extract_strided_slice %86 {offsets = [1, 2, 0], sizes = [16, 16, 128], strides = [1, 1, 1]} : vector<18x18x128xf32> to vector<16x16x128xf32>
    %120 = vector.extract_strided_slice %87 {offsets = [5, 0], sizes = [1, 128], strides = [1, 1]} : vector<9x128xf32> to vector<1x128xf32>
    %121 = vector.shape_cast %120 : vector<1x128xf32> to vector<1x1x128xf32>
    %122 = vector.broadcast %121 : vector<1x1x128xf32> to vector<16x16x128xf32>
    %123 = arith.mulf %119, %122 : vector<16x16x128xf32>
    %124 = arith.addf %118, %123 : vector<16x16x128xf32>
    %125 = vector.extract_strided_slice %86 {offsets = [2, 0, 0], sizes = [16, 16, 128], strides = [1, 1, 1]} : vector<18x18x128xf32> to vector<16x16x128xf32>
    %126 = vector.extract_strided_slice %87 {offsets = [6, 0], sizes = [1, 128], strides = [1, 1]} : vector<9x128xf32> to vector<1x128xf32>
    %127 = vector.shape_cast %126 : vector<1x128xf32> to vector<1x1x128xf32>
    %128 = vector.broadcast %127 : vector<1x1x128xf32> to vector<16x16x128xf32>
    %129 = arith.mulf %125, %128 : vector<16x16x128xf32>
    %130 = arith.addf %124, %129 : vector<16x16x128xf32>
    %131 = vector.extract_strided_slice %86 {offsets = [2, 1, 0], sizes = [16, 16, 128], strides = [1, 1, 1]} : vector<18x18x128xf32> to vector<16x16x128xf32>
    %132 = vector.extract_strided_slice %87 {offsets = [7, 0], sizes = [1, 128], strides = [1, 1]} : vector<9x128xf32> to vector<1x128xf32>
    %133 = vector.shape_cast %132 : vector<1x128xf32> to vector<1x1x128xf32>
    %134 = vector.broadcast %133 : vector<1x1x128xf32> to vector<16x16x128xf32>
    %135 = arith.mulf %131, %134 : vector<16x16x128xf32>
    %136 = arith.addf %130, %135 : vector<16x16x128xf32>
    %137 = vector.extract_strided_slice %86 {offsets = [2, 2, 0], sizes = [16, 16, 128], strides = [1, 1, 1]} : vector<18x18x128xf32> to vector<16x16x128xf32>
    %138 = vector.extract_strided_slice %87 {offsets = [8, 0], sizes = [1, 128], strides = [1, 1]} : vector<9x128xf32> to vector<1x128xf32>
    %139 = vector.shape_cast %138 : vector<1x128xf32> to vector<1x1x128xf32>
    %140 = vector.broadcast %139 : vector<1x1x128xf32> to vector<16x16x128xf32>
    %141 = arith.mulf %137, %140 : vector<16x16x128xf32>
    %142 = arith.addf %136, %141 : vector<16x16x128xf32>
    %c0_39 = arith.constant 0 : index
    %c0_40 = arith.constant 0 : index
    %143 = vector.load %arg9[%c0_39, %c0_40] : memref<1x128xf32, #tpu.memory_space<vmem>>, vector<1x128xf32>
    %144 = vector.shape_cast %143 : vector<1x128xf32> to vector<1x1x128xf32>
    %145 = vector.broadcast %144 : vector<1x1x128xf32> to vector<16x16x128xf32>
    %146 = arith.mulf %142, %145 : vector<16x16x128xf32>
    %c0_41 = arith.constant 0 : index
    %c0_42 = arith.constant 0 : index
    %147 = vector.load %arg10[%c0_41, %c0_42] : memref<1x128xf32, #tpu.memory_space<vmem>>, vector<1x128xf32>
    %148 = vector.shape_cast %147 : vector<1x128xf32> to vector<1x1x128xf32>
    %149 = vector.broadcast %148 : vector<1x1x128xf32> to vector<16x16x128xf32>
    %150 = arith.addf %146, %149 : vector<16x16x128xf32>
    %cst_43 = arith.constant 0.000000e+00 : f32
    %151 = vector.broadcast %cst_43 : f32 to vector<16x16x128xf32>
    %152 = arith.maximumf %150, %151 : vector<16x16x128xf32>
    %153 = vector.shape_cast %152 : vector<16x16x128xf32> to vector<256x128xf32>
    %154 = arith.truncf %153 : vector<256x128xf32> to vector<256x128xbf16>
    %c0_44 = arith.constant 0 : index
    %c0_45 = arith.constant 0 : index
    %155 = vector.load %arg11[%c0_44, %c0_45] : memref<128x128xbf16, #tpu.memory_space<vmem>>, vector<128x128xbf16>
    %cst_46 = arith.constant dense<0.000000e+00> : vector<256x128xf32>
    %156 = tpu.matmul %154, %155, %cst_46 {dimension_numbers = #tpu.dot_dimension_numbers<[1], [0], [0], [1], [0, 0, 1, 1], [], []>} : vector<256x128xbf16>, vector<128x128xbf16>, vector<256x128xf32> -> vector<256x128xf32>
    %c0_47 = arith.constant 0 : index
    %c0_48 = arith.constant 0 : index
    %157 = vector.load %arg12[%c0_47, %c0_48] : memref<1x128xf32, #tpu.memory_space<vmem>>, vector<1x128xf32>
    %158 = vector.broadcast %157 : vector<1x128xf32> to vector<256x128xf32>
    %159 = arith.mulf %156, %158 : vector<256x128xf32>
    %c0_49 = arith.constant 0 : index
    %c0_50 = arith.constant 0 : index
    %160 = vector.load %arg13[%c0_49, %c0_50] : memref<1x128xf32, #tpu.memory_space<vmem>>, vector<1x128xf32>
    %161 = vector.broadcast %160 : vector<1x128xf32> to vector<256x128xf32>
    %162 = arith.addf %159, %161 : vector<256x128xf32>
    %163 = vector.shape_cast %162 : vector<256x128xf32> to vector<16x16x128xf32>
    %164 = arith.addf %163, %1 : vector<16x16x128xf32>
    %c0_51 = arith.constant 0 : index
    %c0_52 = arith.constant 0 : index
    %c0_53 = arith.constant 0 : index
    %c0_54 = arith.constant 0 : index
    %165 = vector.load %arg14[%c0_51, %c0_52, %c0_53, %c0_54] : memref<1x16x16x128xf32, #tpu.memory_space<vmem>>, vector<1x16x16x128xf32>
    %166 = vector.shape_cast %165 : vector<1x16x16x128xf32> to vector<16x16x128xf32>
    %167 = vector.shape_cast %164 : vector<16x16x128xf32> to vector<1x16x16x128xf32>
    tpu.vector_store %arg14[%c0_51, %c0_52, %c0_53, %c0_54], %167 {strides = array<i32>} : memref<1x16x16x128xf32, #tpu.memory_space<vmem>>, vector<1x16x16x128xf32>,
    return
  }
  func.func @transform_0(%arg0: i32) -> (i32, i32, i32, i32) {
    %c0_i32 = arith.constant 0 : i32
    %c0_i32_0 = arith.constant 0 : i32
    %c0_i32_1 = arith.constant 0 : i32
    %c0_i32_2 = arith.constant 0 : i32
    return %arg0, %c0_i32, %c0_i32_0, %c0_i32_1 : i32, i32, i32, i32
  }
  func.func @transform_1(%arg0: i32) -> (i32, i32) {
    %c0_i32 = arith.constant 0 : i32
    %c0_i32_0 = arith.constant 0 : i32
    %c0_i32_1 = arith.constant 0 : i32
    return %c0_i32, %c0_i32_0 : i32, i32
  }
  func.func @transform_2(%arg0: i32) -> (i32, i32) {
    %c0_i32 = arith.constant 0 : i32
    %c0_i32_0 = arith.constant 0 : i32
    %c0_i32_1 = arith.constant 0 : i32
    return %c0_i32, %c0_i32_0 : i32, i32
  }
  func.func @transform_3(%arg0: i32) -> (i32, i32) {
    %c0_i32 = arith.constant 0 : i32
    %c0_i32_0 = arith.constant 0 : i32
    %c0_i32_1 = arith.constant 0 : i32
    return %c0_i32, %c0_i32_0 : i32, i32
  }
  func.func @transform_4(%arg0: i32) -> (i32, i32) {
    %c0_i32 = arith.constant 0 : i32
    %c0_i32_0 = arith.constant 0 : i32
    %c0_i32_1 = arith.constant 0 : i32
    return %c0_i32, %c0_i32_0 : i32, i32
  }
  func.func @transform_5(%arg0: i32) -> (i32, i32) {
    %c0_i32 = arith.constant 0 : i32
    %c0_i32_0 = arith.constant 0 : i32
    %c0_i32_1 = arith.constant 0 : i32
    return %c0_i32, %c0_i32_0 : i32, i32
  }
  func.func @transform_6(%arg0: i32) -> (i32, i32) {
    %c0_i32 = arith.constant 0 : i32
    %c0_i32_0 = arith.constant 0 : i32
    %c0_i32_1 = arith.constant 0 : i32
    return %c0_i32, %c0_i32_0 : i32, i32
  }
  func.func @transform_7(%arg0: i32) -> (i32, i32) {
    %c0_i32 = arith.constant 0 : i32
    %c0_i32_0 = arith.constant 0 : i32
    %c0_i32_1 = arith.constant 0 : i32
    return %c0_i32, %c0_i32_0 : i32, i32
  }
  func.func @transform_8(%arg0: i32) -> (i32, i32) {
    %c0_i32 = arith.constant 0 : i32
    %c0_i32_0 = arith.constant 0 : i32
    %c0_i32_1 = arith.constant 0 : i32
    return %c0_i32, %c0_i32_0 : i32, i32
  }
  func.func @transform_9(%arg0: i32) -> (i32, i32) {
    %c0_i32 = arith.constant 0 : i32
    %c0_i32_0 = arith.constant 0 : i32
    %c0_i32_1 = arith.constant 0 : i32
    return %c0_i32, %c0_i32_0 : i32, i32
  }
  func.func @transform_10(%arg0: i32) -> (i32, i32) {
    %c0_i32 = arith.constant 0 : i32
    %c0_i32_0 = arith.constant 0 : i32
    %c0_i32_1 = arith.constant 0 : i32
    return %c0_i32, %c0_i32_0 : i32, i32
  }
  func.func @transform_11(%arg0: i32) -> (i32, i32) {
    %c0_i32 = arith.constant 0 : i32
    %c0_i32_0 = arith.constant 0 : i32
    %c0_i32_1 = arith.constant 0 : i32
    return %c0_i32, %c0_i32_0 : i32, i32
  }
  func.func @transform_12(%arg0: i32) -> (i32, i32) {
    %c0_i32 = arith.constant 0 : i32
    %c0_i32_0 = arith.constant 0 : i32
    %c0_i32_1 = arith.constant 0 : i32
    return %c0_i32, %c0_i32_0 : i32, i32
  }
  func.func @transform_13(%arg0: i32) -> (i32, i32, i32, i32) {
    %c0_i32 = arith.constant 0 : i32
    %c0_i32_0 = arith.constant 0 : i32
    %c0_i32_1 = arith.constant 0 : i32
    %c0_i32_2 = arith.constant 0 : i32
    return %arg0, %c0_i32, %c0_i32_0, %c0_i32_1 : i32, i32, i32, i32
  }
}

</mosaic_0001>

<bundles_post_ra>
// kernel: uib_forward.1
= control target key start
LH: loop header
LB: loop body
LE: loop exit
PB: predicated region body
PF: predicated region fallthrough
CT: control target
= control target key end

     0   :  { %s5410_s25 = smov 0   ;;  %s8233_s0 = inlined_call_operand.vmem [shape: f32[2,16,16,128], index: 0, kind: input, shape index: {}]   ;;  %s8234_s1 = inlined_call_operand.vmem [shape: f32[9,128], index: 1, kind: input, shape index: {}]   ;;  %s8235_s2 = inlined_call_operand.vmem [shape: f32[1,128], index: 2, kind: input, shape index: {}]   ;;  %s8236_s3 = inlined_call_operand.vmem [shape: f32[1,128], index: 3, kind: input, shape index: {}]   ;;  %s8237_s4 = inlined_call_operand.vmem [shape: bf16[128,128], index: 4, kind: input, shape index: {}]   ;;  %s8238_s5 = inlined_call_operand.vmem [shape: f32[1,128], index: 5, kind: input, shape index: {}]   ;;  %s8239_s6 = inlined_call_operand.vmem [shape: f32[1,128], index: 6, kind: input, shape index: {}]   ;;  %s8240_s7 = inlined_call_operand.vmem [shape: f32[9,128], index: 7, kind: input, shape index: {}]   ;;  %s8241_s8 = inlined_call_operand.vmem [shape: f32[1,128], index: 8, kind: input, shape index: {}]   ;;  %s8242_s9 = inlined_call_operand.vmem [shape: f32[1,128], index: 9, kind: input, shape index: {}]   ;;  %s8243_s10 = inlined_call_operand.vmem [shape: bf16[128,128], index: 10, kind: input, shape index: {}]   ;;  %s8244_s11 = inlined_call_operand.vmem [shape: f32[1,128], index: 11, kind: input, shape index: {}]   ;;  %s8245_s12 = inlined_call_operand.vmem [shape: f32[1,128], index: 12, kind: input, shape index: {}]   ;;  %s8246_s13 = inlined_call_operand.vmem [shape: f32[2,16,16,128], index: 13, kind: output, shape index: {}]  }
   0x1 LB: > { %s5075_s26 = sadd.s32 4294967295, %s5337_s25   ;;  %p5079_p0 = scmp.ge.s32.totalorder %s5337_s25, 1  ;;  %s5337_s25 = sphi %s5410_s25, %s23_s25  }
   0x2   : > { %p387_p1 = scmp.lt.s32.totalorder %s5337_s25, 3 }
   0x4   : > { %p388_p2 = pnand %p5079_p0, %p387_p1 }
   0x5   : > { %p431_p3 = scmp.lt.s32.totalorder (!%p388_p2), %s5075_s26, 1 }
   0x6   : > { %391 = sbr.rel (%p388_p2) target bundleno = 912 (0x390), region = 72 }
   0xb   : > { %v5421_v0 = vld [vmem:[%s8237_s4 + $0x38] sm:$0xff]   ;;  %v617_v1 = vlaneseq  ;;  %v5426_v2 = vld [vmem:[%s8237_s4 + $0x30] sm:$0xff]   ;;  %s8248_s26 = smov (!%p431_p3, %s5075_s26), 1  ;;  %v5339_v3 = vmov 0.0   ;;  %v5269_v5 = vld [vmem:[%s8237_s4 + $0x28] sm:$0xff]   ;;  %vm785_vm0 = vcmask 1046528  }
   0xc   : > { %5162 = vmatprep.subr.bf16.mxu0 %v5421_v0  ;;  %474 = vst [vmem:[#allocation2] sm:$0xff] %v5339_v3  ;;  %476 = vst [vmem:[#allocation2 + $0x10] sm:$0x3] %v5339_v3  ;;  %s5112_s16 = sshll.u32 %s8248_s26, 8  ;;  %v5270_v8 = vld [vmem:[%s8237_s4 + $0x20] sm:$0xff]   ;;  %v5566_v17 = vld [vmem:[%s8237_s4 + $0x18] sm:$0xff]  }
   0xd   : > { %477 = vst [vmem:[#allocation2 + $0x18] sm:$0xff] %v5339_v3  ;;  %478 = vst [vmem:[#allocation2 + $0x20] sm:$0xff] %v5339_v3  ;;  %5163 = vmatpush3.bf16.msra.mxu0 %v5421_v0  ;;  %v5534_v4 = vshrl.u32 %v617_v1, 7  ;;  %s5546_s19 = scalar_lea.vmem %s8233_s0, %s5112_s16  ;;  %v615_v15 = vld [vmem:[%s8234_s1] sm:$0xff]  ;;  %vm1030_vm1 = vcmask 1045504   ;;  %v5272_v52 = vld [vmem:[%s8237_s4 + $0x10] sm:$0xff]   ;;  %s8126_s15 = scalar_lea.vmem %s8246_s13, %s5112_s16 }
   0xe   : > { %479 = vst [vmem:[#allocation2 + $0x28] sm:$0x3] %v5339_v3  ;;  %480 = vst [vmem:[#allocation2 + $0x30] sm:$0xff] %v5339_v3  ;;  %5164 = vmatprep.subr.bf16.mxu0 %v5426_v2  ;;  %v442_v9 = vld [vmem:[%s5546_s19] sm:$0xff]  ;;  %v443_v10 = vld [vmem:[%s5546_s19 + $0x8] sm:$0xff] }
   0xf   : > { %481 = vst [vmem:[#allocation2 + $0x38] sm:$0xff] %v5339_v3  ;;  %482 = vst [vmem:[#allocation2 + $0x40] sm:$0x3] %v5339_v3  ;;  %v619_v6 = vsub.s32 0, %v5534_v4  ;;  %v687_v7 = vsub.s32 1, %v5534_v4  ;;  %v444_v11 = vld [vmem:[%s5546_s19 + $0x10] sm:$0xff] }
  0x10   : > { %483 = vst [vmem:[#allocation2 + $0x48] sm:$0xff] %v5339_v3  ;;  %484 = vst [vmem:[#allocation2 + $0x50] sm:$0xff] %v5339_v3  ;;  %v932_v12 = vsub.s32 2, %v5534_v4  ;;  %v445_v13 = vld [vmem:[%s5546_s19 + $0x18] sm:$0xff]  ;;  %v1177_v16 = vsub.s32 3, %v5534_v4  ;;  %v1245_v21 = vsub.s32 4, %v5534_v4 }
  0x11   : > { %485 = vst [vmem:[#allocation2 + $0x58] sm:$0x3] %v5339_v3  ;;  %486 = vst [vmem:[#allocation2 + $0x60] sm:$0xff] %v5339_v3  ;;  %5165 = vmatpush3.bf16.msra.mxu0 %v5426_v2  ;;  %v5570_v18 = vrot.slane %v615_v15, %v619_v6  ;;  %v5574_v19 = vrot.slane %v615_v15, %v687_v7  ;;  %v1489_v22 = vsub.s32 5, %v5534_v4  ;;  %v1733_v23 = vsub.s32 6, %v5534_v4  ;;  %v446_v24 = vld [vmem:[%s5546_s19 + $0x20] sm:$0xff] }
  0x12   : > { %487 = vst [vmem:[#allocation2 + $0x68] sm:$0xff] %v5339_v3  ;;  %488 = vst [vmem:[#allocation2 + $0x70] sm:$0x3] %v5339_v3  ;;  %5166 = vmatprep.subr.bf16.mxu0 %v5269_v5  ;;  %v5578_v20 = vrot.slane %v615_v15, %v932_v12  ;;  %v447_v25 = vld [vmem:[%s5546_s19 + $0x28] sm:$0xff]  ;;  %v448_v26 = vld [vmem:[%s5546_s19 + $0x30] sm:$0xff]  ;;  %v1801_v30 = vsub.s32 7, %v5534_v4  ;;  %v5597_v36 = vrot.slane %v615_v15, %v1177_v16 }
  0x13   : > { %489 = vst [vmem:[#allocation2 + $0x78] sm:$0xff] %v5339_v3  ;;  %490 = vst [vmem:[#allocation2 + $0x80] sm:$0xff] %v5339_v3  ;;  %v563_v14 = vld [vmem:[#allocation2 + $0x10] sm:$0x3]  ;;  %v689_v27 = vmul.f32 0.0, %v5574_v19  ;;  %v449_v31 = vld [vmem:[%s5546_s19 + $0x38] sm:$0xff]  ;;  %v5604_v43 = vrot.slane %v615_v15, %v1245_v21  ;;  %v5611_v48 = vrot.slane %v615_v15, %v1489_v22  ;;  %v5615_v49 = vrot.slane %v615_v15, %v1733_v23 }
  0x14   : > { %491 = vst [vmem:[#allocation2 + $0x88] sm:$0x3] %v5339_v3  ;;  %492 = vst [vmem:[#allocation2 + $0x90] sm:$0xff] %v5339_v3  ;;  %v691_v28 = vmul.f32 %v5574_v19, %v563_v14  ;;  %v934_v29 = vmul.f32 0.0, %v5578_v20  ;;  %v450_v32 = vld [vmem:[%s5546_s19 + $0x40] sm:$0xff]  ;;  %v451_v33 = vld [vmem:[%s5546_s19 + $0x48] sm:$0xff]  ;;  %v936_v35 = vmul.f32 %v5578_v20, %v563_v14  ;;  %v5626_v55 = vrot.slane %v615_v15, %v1801_v30 }
  0x15   : > { %493 = vst [vmem:[#allocation2 + $0x98] sm:$0xff] %v5339_v3  ;;  %494 = vst [vmem:[#allocation2 + $0xa0] sm:$0x3] %v5339_v3  ;;  %5167 = vmatpush3.bf16.msra.mxu0 %v5269_v5  ;;  %v621_v34 = vmul.f32 0.0, %v5570_v18  ;;  %v452_v37 = vld [vmem:[%s5546_s19 + $0x50] sm:$0xff]  ;;  %v453_v38 = vld [vmem:[%s5546_s19 + $0x58] sm:$0xff] }
  0x16   : > { %495 = vst [vmem:[#allocation2 + $0xa8] sm:$0xff] %v5339_v3  ;;  %496 = vst [vmem:[#allocation2 + $0xb0] sm:$0xff] %v5339_v3  ;;  %5168 = vmatprep.subr.bf16.mxu0 %v5270_v8  ;;  %v454_v39 = vld [vmem:[%s5546_s19 + $0x60] sm:$0xff]  ;;  %v786_v40 = vrot.slane %v689_v27, 1  ;;  %v789_v41 = vrot.slane %v691_v28, 1  ;;  %v1031_v42 = vrot.slane %v934_v29, 2 }
  0x17   : > { %497 = vst [vmem:[#allocation2 + $0xb8] sm:$0x3] %v5339_v3  ;;  %498 = vst [vmem:[#allocation2 + $0xc0] sm:$0xff] %v5339_v3  ;;  %v455_v44 = vld [vmem:[%s5546_s19 + $0x68] sm:$0xff]  ;;  %v456_v45 = vld [vmem:[%s5546_s19 + $0x70] sm:$0xff]  ;;  %v1034_v47 = vrot.slane %v936_v35, 2 }
  0x18   : > { %499 = vst [vmem:[#allocation2 + $0xc8] sm:$0xff] %v5339_v3  ;;  %500 = vst [vmem:[#allocation2 + $0xd0] sm:$0x3] %v5339_v3  ;;  %v457_v46 = vld [vmem:[%s5546_s19 + $0x78] sm:$0xff]  ;;  %v458_v50 = vld [vmem:[%s5546_s19 + $0x80] sm:$0xff]  ;;  %v790_v54 = vsel %vm785_vm0, %v786_v40, %v789_v41  ;;  %v898_v59 = vadd.f32 %v786_v40, %v621_v34 }
  0x19   : > { %501 = vst [vmem:[#allocation2 + $0xd8] sm:$0xff] %v5339_v3  ;;  %502 = vst [vmem:[#allocation2 + $0xe0] sm:$0xff] %v5339_v3  ;;  %5169 = vmatpush3.bf16.msra.mxu0 %v5270_v8  ;;  %v459_v51 = vld [vmem:[%s5546_s19 + $0x88] sm:$0xff]  ;;  %v899_v60 = vadd.f32 %v790_v54, %v621_v34  ;;  %v1035_v62 = vsel %vm1030_vm1, %v1031_v42, %v1034_v47  ;;  %v5274_v40 = vld [vmem:[%s8237_s4] sm:$0xff]  }
  0x1a   : > { %503 = vst [vmem:[#allocation2 + $0xe8] sm:$0x3] %v5339_v3  ;;  %504 = vst [vmem:[#allocation2 + $0xf0] sm:$0xff] %v5339_v3  ;;  %5170 = vmatprep.subr.bf16.mxu0 %v5566_v17  ;;  %v1143_v5 = vadd.f32 %v1031_v42, %v898_v59  ;;  %v5670_v34 = vld [vmem:[%s8234_s1 + $0x8] ss:$0 sm:$0xff] }
  0x1b   : > { %505 = vst [vmem:[#allocation2 + $0xf8] sm:$0xff] %v5339_v3  ;;  %506 = vst [vmem:[#allocation2 + $0x100] sm:$0x3] %v5339_v3  ;;  %v1144_v8 = vadd.f32 %v1035_v62, %v899_v60  ;;  %v460_v60 = vld [vmem:[%s5546_s19 + $0x90] sm:$0xff]  ;;  %v461_v62 = vld [vmem:[%s5546_s19 + $0x98] sm:$0xff] }
  0x1c   : > { %507 = vst [vmem:[#allocation2 + $0x108] sm:$0xff] %v5339_v3  ;;  %508 = vst [vmem:[#allocation2 + $0x110] sm:$0xff] %v5339_v3 }
  0x1d   : > { %509 = vst [vmem:[#allocation2 + $0x118] sm:$0x3] %v5339_v3  ;;  %510 = vst [vmem:[#allocation2 + $0x120] sm:$0xff] %v5339_v3  ;;  %5171 = vmatpush3.bf16.msra.mxu0 %v5566_v17 }
  0x1e   : > { %511 = vst [vmem:[#allocation2 + $0x128] sm:$0xff] %v5339_v3  ;;  %512 = vst [vmem:[#allocation2 + $0x130] sm:$0x3] %v5339_v3  ;;  %5172 = vmatprep.subr.bf16.mxu0 %v5272_v52 }
  0x1f   : > { %513 = vst [vmem:[#allocation2 + $0x138] sm:$0xff] %v5339_v3  ;;  %514 = vst [vmem:[#allocation2 + $0x140] sm:$0xff] %v5339_v3 }
  0x20   : > { %515 = vst [vmem:[#allocation2 + $0x148] sm:$0x3] %v5339_v3  ;;  %516 = vst [vmem:[#allocation2 + $0x150] sm:$0xff] %v5339_v3 }
  0x21   : > { %517 = vst [vmem:[#allocation2 + $0x158] sm:$0xff] %v5339_v3  ;;  %518 = vst [vmem:[#allocation2 + $0x160] sm:$0x3] %v5339_v3  ;;  %5173 = vmatpush3.bf16.msra.mxu0 %v5272_v52 }
  0x22   : > { %519 = vst [vmem:[#allocation2 + $0x168] sm:$0xff] %v5339_v3  ;;  %520 = vst [vmem:[#allocation2 + $0x170] sm:$0xff] %v5339_v3 }
  0x23   : > { %521 = vst [vmem:[#allocation2 + $0x178] sm:$0x3] %v5339_v3  ;;  %522 = vst [vmem:[#allocation2 + $0x180] sm:$0xff] %v5339_v3 }
  0x24   : > { %523 = vst [vmem:[#allocation2 + $0x188] sm:$0xff] %v5339_v3  ;;  %524 = vst [vmem:[#allocation2 + $0x190] sm:$0x3] %v5339_v3 }
  0x25   : > { %527 = vst [vmem:[#allocation2 + $0x1a8] sm:$0x3] %v5339_v3  ;;  %2718 = vst [vmem:[#allocation3 + $0x10] sm:$0x3] %v5339_v3 }
  0x26   : > { %2719 = vst [vmem:[#allocation3 + $0x18] sm:$0xff] %v5339_v3  ;;  %2720 = vst [vmem:[#allocation3 + $0x20] sm:$0xff] %v5339_v3 }
  0x27   : > { %2721 = vst [vmem:[#allocation3 + $0x28] sm:$0x3] %v5339_v3  ;;  %2722 = vst [vmem:[#allocation3 + $0x30] sm:$0xff] %v5339_v3 }
  0x28   : > { %2723 = vst [vmem:[#allocation3 + $0x38] sm:$0xff] %v5339_v3  ;;  %2724 = vst [vmem:[#allocation3 + $0x40] sm:$0x3] %v5339_v3 }
  0x29   : > { %2725 = vst [vmem:[#allocation3 + $0x48] sm:$0xff] %v5339_v3  ;;  %2726 = vst [vmem:[#allocation3 + $0x50] sm:$0xff] %v5339_v3 }
  0x2a   : > { %2727 = vst [vmem:[#allocation3 + $0x58] sm:$0x3] %v5339_v3  ;;  %2728 = vst [vmem:[#allocation3 + $0x60] sm:$0xff] %v5339_v3 }
  0x2b   : > { %2729 = vst [vmem:[#allocation3 + $0x68] sm:$0xff] %v5339_v3  ;;  %2730 = vst [vmem:[#allocation3 + $0x70] sm:$0x3] %v5339_v3 }
  0x2c   : > { %2731 = vst [vmem:[#allocation3 + $0x78] sm:$0xff] %v5339_v3  ;;  %2732 = vst [vmem:[#allocation3 + $0x80] sm:$0xff] %v5339_v3 }
  0x2d   : > { %2733 = vst [vmem:[#allocation3 + $0x88] sm:$0x3] %v5339_v3  ;;  %2734 = vst [vmem:[#allocation3 + $0x90] sm:$0xff] %v5339_v3 }
  0x2e   : > { %2735 = vst [vmem:[#allocation3 + $0x98] sm:$0xff] %v5339_v3  ;;  %2736 = vst [vmem:[#allocation3 + $0xa0] sm:$0x3] %v5339_v3 }
  0x2f   : > { %2737 = vst [vmem:[#allocation3 + $0xa8] sm:$0xff] %v5339_v3  ;;  %2738 = vst [vmem:[#allocation3 + $0xb0] sm:$0xff] %v5339_v3 }
  0x30   : > { %2739 = vst [vmem:[#allocation3 + $0xb8] sm:$0x3] %v5339_v3  ;;  %2740 = vst [vmem:[#allocation3 + $0xc0] sm:$0xff] %v5339_v3 }
  0x31   : > { %2741 = vst [vmem:[#allocation3 + $0xc8] sm:$0xff] %v5339_v3  ;;  %2742 = vst [vmem:[#allocation3 + $0xd0] sm:$0x3] %v5339_v3 }
  0x32   : > { %2743 = vst [vmem:[#allocation3 + $0xd8] sm:$0xff] %v5339_v3  ;;  %2744 = vst [vmem:[#allocation3 + $0xe0] sm:$0xff] %v5339_v3 }
  0x33   : > { %2745 = vst [vmem:[#allocation3 + $0xe8] sm:$0x3] %v5339_v3  ;;  %2746 = vst [vmem:[#allocation3 + $0xf0] sm:$0xff] %v5339_v3 }
  0x34   : > { %2747 = vst [vmem:[#allocation3 + $0xf8] sm:$0xff] %v5339_v3  ;;  %2748 = vst [vmem:[#allocation3 + $0x100] sm:$0x3] %v5339_v3 }
  0x35   : > { %2749 = vst [vmem:[#allocation3 + $0x108] sm:$0xff] %v5339_v3  ;;  %2750 = vst [vmem:[#allocation3 + $0x110] sm:$0xff] %v5339_v3 }
  0x36   : > { %2751 = vst [vmem:[#allocation3 + $0x118] sm:$0x3] %v5339_v3  ;;  %2752 = vst [vmem:[#allocation3 + $0x120] sm:$0xff] %v5339_v3 }
  0x37   : > { %2753 = vst [vmem:[#allocation3 + $0x128] sm:$0xff] %v5339_v3  ;;  %2754 = vst [vmem:[#allocation3 + $0x130] sm:$0x3] %v5339_v3 }
  0x38   : > { %2755 = vst [vmem:[#allocation3 + $0x138] sm:$0xff] %v5339_v3  ;;  %2756 = vst [vmem:[#allocation3 + $0x140] sm:$0xff] %v5339_v3 }
  0x39   : > { %2757 = vst [vmem:[#allocation3 + $0x148] sm:$0x3] %v5339_v3  ;;  %2758 = vst [vmem:[#allocation3 + $0x150] sm:$0xff] %v5339_v3 }
  0x3a   : > { %2759 = vst [vmem:[#allocation3 + $0x158] sm:$0xff] %v5339_v3  ;;  %2760 = vst [vmem:[#allocation3 + $0x160] sm:$0x3] %v5339_v3 }
  0x3b   : > { %2761 = vst [vmem:[#allocation3 + $0x168] sm:$0xff] %v5339_v3  ;;  %2762 = vst [vmem:[#allocation3 + $0x170] sm:$0xff] %v5339_v3 }
  0x3c   : > { %2763 = vst [vmem:[#allocation3 + $0x178] sm:$0x3] %v5339_v3  ;;  %2764 = vst [vmem:[#allocation3 + $0x180] sm:$0xff] %v5339_v3 }
  0x3d   : > { %2765 = vst [vmem:[#allocation3 + $0x188] sm:$0xff] %v5339_v3  ;;  %2766 = vst [vmem:[#allocation3 + $0x190] sm:$0x3] %v5339_v3 }
  0x3e   : > { %2769 = vst [vmem:[#allocation3 + $0x1a8] sm:$0x3] %v5339_v3  ;;  %529 = vst [vmem:[#allocation2 + $0x19] sm:$0xff] %v442_v9  ;;  %v5273_v9 = vld [vmem:[%s8237_s4 + $0x8] sm:$0xff]  }
  0x3f   : > { %530 = vst [vmem:[#allocation2 + $0x21] sm:$0xff] %v443_v10  ;;  %531 = vst [vmem:[#allocation2 + $0x31] sm:$0xff] %v444_v11  ;;  %5174 = vmatprep.subr.bf16.mxu0 %v5273_v9 }
  0x40   : > { %532 = vst [vmem:[#allocation2 + $0x39] sm:$0xff] %v445_v13  ;;  %533 = vst [vmem:[#allocation2 + $0x49] sm:$0xff] %v446_v24  ;;  %5175 = vmatpush3.bf16.msra.mxu0 %v5273_v9 }
  0x41   : > { %534 = vst [vmem:[#allocation2 + $0x51] sm:$0xff] %v447_v25  ;;  %535 = vst [vmem:[#allocation2 + $0x61] sm:$0xff] %v448_v26  ;;  %5176 = vmatprep.subr.bf16.mxu0 %v5274_v40 }
  0x42   : > { %536 = vst [vmem:[#allocation2 + $0x69] sm:$0xff] %v449_v31  ;;  %537 = vst [vmem:[#allocation2 + $0x79] sm:$0xff] %v450_v32 }
  0x43   : > { %538 = vst [vmem:[#allocation2 + $0x81] sm:$0xff] %v451_v33  ;;  %539 = vst [vmem:[#allocation2 + $0x91] sm:$0xff] %v452_v37 }
  0x44   : > { %540 = vst [vmem:[#allocation2 + $0x99] sm:$0xff] %v453_v38  ;;  %541 = vst [vmem:[#allocation2 + $0xa9] sm:$0xff] %v454_v39  ;;  %5177 = vmatpush3.bf16.msra.mxu0 %v5274_v40 }
  0x45   : > { %542 = vst [vmem:[#allocation2 + $0xb1] sm:$0xff] %v455_v44  ;;  %543 = vst [vmem:[#allocation2 + $0xc1] sm:$0xff] %v456_v45  ;;  %v5628_v56 = vld [vmem:[#allocation2 + $0x18] sm:$0xff] }
  0x46   : > { %544 = vst [vmem:[#allocation2 + $0xc9] sm:$0xff] %v457_v46  ;;  %v566_v53 = vld [vmem:[#allocation2 + $0x28] sm:$0x3]  ;;  %545 = vst [vmem:[#allocation2 + $0xd9] sm:$0xff] %v458_v50  ;;  %v5630_v57 = vld [vmem:[#allocation2 + $0x20] sm:$0xff]  ;;  %v1179_v63 = vmul.f32 %v5597_v36, %v5628_v56  ;;  %v1247_v1 = vmul.f32 %v5604_v43, %v5628_v56  ;;  %v1491_v14 = vmul.f32 %v5611_v48, %v5628_v56 }
  0x47   : > { %546 = vst [vmem:[#allocation2 + $0xe1] sm:$0xff] %v459_v51  ;;  %v5633_v58 = vmul.f32 %v5574_v19, %v566_v53  ;;  %v5636_v61 = vmul.f32 %v5578_v20, %v566_v53  ;;  %v1180_v0 = vmul.f32 %v5597_v36, %v5630_v57  ;;  %v1248_v10 = vmul.f32 %v5604_v43, %v5630_v57  ;;  %v5656_v15 = vld [vmem:[#allocation2 + $0x30] sm:$0xff]  ;;  %v5661_v27 = vld [vmem:[#allocation2 + $0x38] sm:$0xff]  ;;  %v5665_v33 = vld [vmem:[#allocation2 + $0x40] sm:$0x3] }
  0x48   : > { %v1249_v11 = vmul.f32 %v5604_v43, %v566_v53  ;;  %v1343_v13 = vrot.slane %v1247_v1, 1  ;;  %v1211_v17 = vadd.f32 %v1179_v63, %v1143_v5  ;;  %v1492_v25 = vmul.f32 %v5611_v48, %v5630_v57  ;;  %547 = vst [vmem:[#allocation2 + $0xf1] sm:$0xff] %v460_v60  ;;  %548 = vst [vmem:[#allocation2 + $0xf9] sm:$0xff] %v461_v62  ;;  %v462_v62 = vld [vmem:[%s5546_s19 + $0xa0] sm:$0xff] }
  0x49   : > { %v794_v2 = vrot.slane %v5633_v58, 1  ;;  %v1039_v3 = vrot.slane %v5636_v61, 2  ;;  %v1212_v24 = vadd.f32 %v1180_v0, %v1144_v8  ;;  %v1493_v26 = vmul.f32 %v5611_v48, %v566_v53  ;;  %549 = vst [vmem:[#allocation2 + $0x109] sm:$0xff] %v462_v62 }
  0x4a   : > { %v1344_v28 = vrot.slane %v1248_v10, 1  ;;  %v1346_v29 = vrot.slane %v1249_v11, 1  ;;  %v1587_v31 = vrot.slane %v1491_v14, 2  ;;  %v1735_v32 = vmul.f32 %v5615_v49, %v5656_v15 }
  0x4b   : > { %v1588_v35 = vrot.slane %v1492_v25, 2  ;;  %v1590_v37 = vrot.slane %v1493_v26, 2  ;;  %v1736_v38 = vmul.f32 %v5615_v49, %v5661_v27  ;;  %v1803_v39 = vmul.f32 %v5626_v55, %v5656_v15 }
  0x4c   : > { %v1345_v41 = vsel %vm785_vm0, %v1343_v13, %v1344_v28  ;;  %v1347_v42 = vsel %vm785_vm0, %v1344_v28, %v1346_v29  ;;  %v1804_v44 = vmul.f32 %v5626_v55, %v5661_v27  ;;  %v1805_v45 = vmul.f32 %v5626_v55, %v5665_v33 }
  0x4d   : > { %v1455_v46 = vadd.f32 %v1345_v41, %v1211_v17  ;;  %v1456_v47 = vadd.f32 %v1347_v42, %v1212_v24  ;;  %v1589_v50 = vsel %vm1030_vm1, %v1587_v31, %v1588_v35  ;;  %v1591_v51 = vsel %vm1030_vm1, %v1588_v35, %v1590_v37 }
  0x4e   : > { %v1899_v52 = vrot.slane %v1803_v39, 1  ;;  %v1900_v53 = vrot.slane %v1804_v44, 1  ;;  %v1902_v54 = vrot.slane %v1805_v45, 1  ;;  %v2047_v59 = vmul.f32 %v5670_v34, %v5656_v15 }
  0x4f   : > { %v1699_v63 = vadd.f32 %v1589_v50, %v1455_v46  ;;  %v1700_v0 = vadd.f32 %v1591_v51, %v1456_v47  ;;  %v2048_v1 = vmul.f32 %v5670_v34, %v5661_v27  ;;  %v2049_v5 = vmul.f32 %v5670_v34, %v5665_v33  ;;  %v5723_v47 = vld [vmem:[%s8236_s3] ss:$0 sm:$0xff] }
  0x50   : > { %v1901_v8 = vsel %vm785_vm0, %v1899_v52, %v1900_v53  ;;  %v1903_v10 = vsel %vm785_vm0, %v1900_v53, %v1902_v54  ;;  %v2143_v11 = vrot.slane %v2047_v59, 2  ;;  %v623_v13 = vmul.f32 %v5570_v18, %v5628_v56 }
  0x51   : > { %v1767_v9 = vadd.f32 %v1735_v32, %v1699_v63  ;;  %v1768_v14 = vadd.f32 %v1736_v38, %v1700_v0  ;;  %v2144_v17 = vrot.slane %v2048_v1, 2  ;;  %v2146_v24 = vrot.slane %v2049_v5, 2  ;;  %v5712_v38 = vld [vmem:[%s8235_s2] ss:$0 sm:$0xff]  ;;  %v463_v63 = vld [vmem:[%s5546_s19 + $0xa8] sm:$0xff] }
  0x52   : > { %v624_v25 = vmul.f32 %v5570_v18, %v5630_v57  ;;  %v692_v26 = vmul.f32 %v5574_v19, %v5628_v56  ;;  %v693_v28 = vmul.f32 %v5574_v19, %v5630_v57  ;;  %v937_v29 = vmul.f32 %v5578_v20, %v5628_v56  ;;  %550 = vst [vmem:[#allocation2 + $0x111] sm:$0xff] %v463_v63 }
  0x53   : > { %v2011_v31 = vadd.f32 %v1901_v8, %v1767_v9  ;;  %v2012_v35 = vadd.f32 %v1903_v10, %v1768_v14  ;;  %v2145_v32 = vsel %vm1030_vm1, %v2143_v11, %v2144_v17  ;;  %v2147_v37 = vsel %vm1030_vm1, %v2144_v17, %v2146_v24 }
  0x54   : > { %v791_v39 = vrot.slane %v692_v26, 1  ;;  %v792_v41 = vrot.slane %v693_v28, 1  ;;  %v938_v42 = vmul.f32 %v5578_v20, %v5630_v57  ;;  %v1036_v56 = vrot.slane %v937_v29, 2  ;;  %v5749_v26 = vld [vmem:[#allocation2 + $0x48] sm:$0xff] }
  0x55   : > { %v2255_v40 = vadd.f32 %v2145_v32, %v2011_v31  ;;  %v2256_v44 = vadd.f32 %v2147_v37, %v2012_v35  ;;  %v1181_v45 = vmul.f32 %v5597_v36, %v5656_v15  ;;  %v1182_v46 = vmul.f32 %v5597_v36, %v5661_v27  ;;  %v5755_v32 = vld [vmem:[#allocation2 + $0x50] sm:$0xff] }
  0x56   : > { %v793_v50 = vsel %vm785_vm0, %v791_v39, %v792_v41  ;;  %v795_v57 = vsel %vm785_vm0, %v792_v41, %v794_v2  ;;  %v1037_v51 = vrot.slane %v938_v42, 2  ;;  %v1250_v52 = vmul.f32 %v5604_v43, %v5656_v15 }
  0x57   : > { %v2294_v53 = vmul.f32 %v5712_v38, %v2255_v40  ;;  %v2295_v54 = vmul.f32 %v5712_v38, %v2256_v44  ;;  %v900_v59 = vadd.f32 %v793_v50, %v623_v13  ;;  %v901_v60 = vadd.f32 %v795_v57, %v624_v25 }
  0x58   : > { %v1038_v0 = vsel %vm1030_vm1, %v1036_v56, %v1037_v51  ;;  %v1040_v58 = vsel %vm1030_vm1, %v1037_v51, %v1039_v3  ;;  %v1251_v2 = vmul.f32 %v5604_v43, %v5661_v27  ;;  %v1252_v1 = vmul.f32 %v5604_v43, %v5665_v33  ;;  %v5759_v56 = vld [vmem:[#allocation2 + $0x58] sm:$0x3] }
  0x59   : > { %v2333_v5 = vadd.f32 %v5723_v47, %v2294_v53  ;;  %v2334_v8 = vadd.f32 %v5723_v47, %v2295_v54  ;;  %v1145_v10 = vadd.f32 %v1038_v0, %v900_v59  ;;  %v1146_v11 = vadd.f32 %v1040_v58, %v901_v60 }
  0x5a   : > { %v1348_v13 = vrot.slane %v1250_v52, 1  ;;  %v1349_v9 = vrot.slane %v1251_v2, 1  ;;  %v1351_v14 = vrot.slane %v1252_v1, 1  ;;  %v1494_v61 = vmul.f32 %v5611_v48, %v5656_v15 }
  0x5b   : > { %v2365_v3 = vpack.c.bf16 %v2334_v8, %v2333_v5  ;;  %v1213_v17 = vadd.f32 %v1181_v45, %v1145_v10  ;;  %v1214_v24 = vadd.f32 %v1182_v46, %v1146_v11  ;;  %v1495_v25 = vmul.f32 %v5611_v48, %v5661_v27 }
  0x5c   : > { %v1350_v28 = vsel %vm785_vm0, %v1348_v13, %v1349_v9  ;;  %v1352_v29 = vsel %vm785_vm0, %v1349_v9, %v1351_v14  ;;  %v1496_v31 = vmul.f32 %v5611_v48, %v5665_v33  ;;  %v1592_v35 = vrot.slane %v1494_v61, 2 }
  0x5d   : > { %5178 = vmatprep.mubr.bf16.mxu0 %v2365_v3  ;;  %v1457_v37 = vadd.f32 %v1350_v28, %v1213_v17  ;;  %v1458_v39 = vadd.f32 %v1352_v29, %v1214_v24  ;;  %v1593_v41 = vrot.slane %v1495_v25, 2  ;;  %v1737_v42 = vmul.f32 %v5615_v49, %v5749_v26 }
  0x5e   : > { %v1595_v40 = vrot.slane %v1496_v31, 2  ;;  %v1738_v44 = vmul.f32 %v5615_v49, %v5755_v32  ;;  %v1806_v45 = vmul.f32 %v5626_v55, %v5749_v26  ;;  %v1807_v46 = vmul.f32 %v5626_v55, %v5755_v32 }
  0x5f   : > { %v1594_v50 = vsel %vm1030_vm1, %v1592_v35, %v1593_v41  ;;  %v1808_v57 = vmul.f32 %v5626_v55, %v5759_v56  ;;  %v2050_v51 = vmul.f32 %v5670_v34, %v5749_v26  ;;  %v2051_v52 = vmul.f32 %v5670_v34, %v5755_v32 }
  0x60   : > { %v1596_v53 = vsel %vm1030_vm1, %v1593_v41, %v1595_v40  ;;  %v1701_v54 = vadd.f32 %v1594_v50, %v1457_v37  ;;  %v1904_v59 = vrot.slane %v1806_v45, 1  ;;  %v1905_v60 = vrot.slane %v1807_v46, 1 }
  0x61   : > { %v1702_v62 = vadd.f32 %v1596_v53, %v1458_v39  ;;  %v1907_v63 = vrot.slane %v1808_v57, 1  ;;  %v2052_v0 = vmul.f32 %v5670_v34, %v5759_v56  ;;  %v2148_v58 = vrot.slane %v2050_v51, 2 }
  0x62   : > { %v1769_v2 = vadd.f32 %v1737_v42, %v1701_v54  ;;  %v1906_v1 = vsel %vm785_vm0, %v1904_v59, %v1905_v60  ;;  %v2149_v5 = vrot.slane %v2051_v52, 2  ;;  %v625_v8 = vmul.f32 %v5570_v18, %v5656_v15 }
  0x63   : > { %v1770_v10 = vadd.f32 %v1738_v44, %v1702_v62  ;;  %v1908_v11 = vsel %vm785_vm0, %v1905_v60, %v1907_v63  ;;  %v2151_v13 = vrot.slane %v2052_v0, 2  ;;  %v626_v9 = vmul.f32 %v5570_v18, %v5661_v27 }
  0x64   : > { %v2013_v14 = vadd.f32 %v1906_v1, %v1769_v2  ;;  %v2150_v61 = vsel %vm1030_vm1, %v2148_v58, %v2149_v5  ;;  %v695_v3 = vmul.f32 %v5574_v19, %v5656_v15  ;;  %v696_v17 = vmul.f32 %v5574_v19, %v5661_v27 }
  0x65   : > { %v2014_v24 = vadd.f32 %v1908_v11, %v1770_v10  ;;  %v2152_v25 = vsel %vm1030_vm1, %v2149_v5, %v2151_v13  ;;  %v697_v28 = vmul.f32 %v5574_v19, %v5665_v33  ;;  %v940_v29 = vmul.f32 %v5578_v20, %v5656_v15 }
  0x66   : > { %v2257_v31 = vadd.f32 %v2150_v61, %v2013_v14  ;;  %v796_v35 = vrot.slane %v695_v3, 1  ;;  %v797_v37 = vrot.slane %v696_v17, 1  ;;  %v941_v39 = vmul.f32 %v5578_v20, %v5661_v27  ;;  %v5821_v14 = vld [vmem:[#allocation2 + $0x68] sm:$0xff] }
  0x67   : > { %v2258_v41 = vadd.f32 %v2152_v25, %v2014_v24  ;;  %v799_v42 = vrot.slane %v697_v28, 1  ;;  %v942_v40 = vmul.f32 %v5578_v20, %v5665_v33  ;;  %v1041_v44 = vrot.slane %v940_v29, 2 }
  0x68   : > { %v2296_v45 = vmul.f32 %v5712_v38, %v2257_v31  ;;  %v798_v46 = vsel %vm785_vm0, %v796_v35, %v797_v37  ;;  %v1042_v50 = vrot.slane %v941_v39, 2  ;;  %v1183_v15 = vmul.f32 %v5597_v36, %v5749_v26  ;;  %v464_v35 = vld [vmem:[%s5546_s19 + $0xb0] sm:$0xff] }
  0x69   : > { %v2297_v57 = vmul.f32 %v5712_v38, %v2258_v41  ;;  %v800_v51 = vsel %vm785_vm0, %v797_v37, %v799_v42  ;;  %v902_v52 = vadd.f32 %v798_v46, %v625_v8  ;;  %v1044_v27 = vrot.slane %v942_v40, 2  ;;  %v465_v37 = vld [vmem:[%s5546_s19 + $0xb8] sm:$0xff]  ;;  %551 = vst [vmem:[#allocation2 + $0x121] sm:$0xff] %v464_v35 }
  0x6a   : > { %v2335_v53 = vadd.f32 %v5723_v47, %v2296_v45  ;;  %v903_v54 = vadd.f32 %v800_v51, %v626_v9  ;;  %v1043_v33 = vsel %vm1030_vm1, %v1041_v44, %v1042_v50  ;;  %v1184_v59 = vmul.f32 %v5597_v36, %v5755_v32  ;;  %v5819_v9 = vld [vmem:[#allocation2 + $0x60] sm:$0xff]  ;;  %552 = vst [vmem:[#allocation2 + $0x129] sm:$0xff] %v465_v37  ;;  %v5835_v44 = vld [vmem:[#allocation2 + $0x70] sm:$0x3] }
  0x6b   : > { %v2336_v60 = vadd.f32 %v5723_v47, %v2297_v57  ;;  %v1045_v62 = vsel %vm1030_vm1, %v1042_v50, %v1044_v27  ;;  %v1147_v63 = vadd.f32 %v1043_v33, %v902_v52  ;;  %v1253_v0 = vmul.f32 %v5604_v43, %v5749_v26 }
  0x6c   : > { %v1148_v58 = vadd.f32 %v1045_v62, %v903_v54  ;;  %v1254_v2 = vmul.f32 %v5604_v43, %v5755_v32  ;;  %v1255_v1 = vmul.f32 %v5604_v43, %v5759_v56  ;;  %v1497_v5 = vmul.f32 %v5611_v48, %v5749_v26 }
  0x6d   : > { %v2366_v8 = vpack.c.bf16 %v2336_v60, %v2335_v53  ;;  %v1215_v10 = vadd.f32 %v1183_v15, %v1147_v63  ;;  %v1353_v11 = vrot.slane %v1253_v0, 1  ;;  %v1498_v13 = vmul.f32 %v5611_v48, %v5755_v32 }
  0x6e   : > { %v1216_v61 = vadd.f32 %v1184_v59, %v1148_v58  ;;  %v1354_v3 = vrot.slane %v1254_v2, 1  ;;  %v1356_v17 = vrot.slane %v1255_v1, 1  ;;  %v1499_v24 = vmul.f32 %v5611_v48, %v5759_v56 }
  0x6f   : > { %5179 = vmatmul.mubr.bf16.vlgmr.msra.gmra.mxu0 %v2366_v8  ;;  %v1597_v25 = vrot.slane %v1497_v5, 2  ;;  %v1598_v28 = vrot.slane %v1498_v13, 2  ;;  %v1739_v29 = vmul.f32 %v5615_v49, %v5819_v9  ;;  %v1740_v31 = vmul.f32 %v5615_v49, %v5821_v14 }
  0x70   : > { %v1355_v39 = vsel %vm785_vm0, %v1353_v11, %v1354_v3  ;;  %v1357_v41 = vsel %vm785_vm0, %v1354_v3, %v1356_v17  ;;  %v1600_v42 = vrot.slane %v1499_v24, 2  ;;  %v1809_v40 = vmul.f32 %v5626_v55, %v5819_v9 }
  0x71   : > { %v1459_v45 = vadd.f32 %v1355_v39, %v1215_v10  ;;  %v1460_v46 = vadd.f32 %v1357_v41, %v1216_v61  ;;  %v1599_v50 = vsel %vm1030_vm1, %v1597_v25, %v1598_v28  ;;  %v1810_v15 = vmul.f32 %v5626_v55, %v5821_v14 }
  0x72   : > { %v1601_v57 = vsel %vm1030_vm1, %v1598_v28, %v1600_v42  ;;  %v1811_v51 = vmul.f32 %v5626_v55, %v5835_v44  ;;  %v1909_v52 = vrot.slane %v1809_v40, 1  ;;  %v2053_v27 = vmul.f32 %v5670_v34, %v5819_v9 }
  0x73   : > { %v1703_v53 = vadd.f32 %v1599_v50, %v1459_v45  ;;  %v1704_v54 = vadd.f32 %v1601_v57, %v1460_v46  ;;  %v1910_v33 = vrot.slane %v1810_v15, 1  ;;  %v2054_v59 = vmul.f32 %v5670_v34, %v5821_v14 }
  0x74   : > { %v1912_v60 = vrot.slane %v1811_v51, 1  ;;  %v2055_v62 = vmul.f32 %v5670_v34, %v5835_v44  ;;  %v2153_v63 = vrot.slane %v2053_v27, 2  ;;  %v627_v0 = vmul.f32 %v5570_v18, %v5749_v26 }
  0x75   : > { %v1771_v58 = vadd.f32 %v1739_v29, %v1703_v53  ;;  %v1772_v2 = vadd.f32 %v1740_v31, %v1704_v54  ;;  %v1911_v1 = vsel %vm785_vm0, %v1909_v52, %v1910_v33  ;;  %v2154_v5 = vrot.slane %v2054_v59, 2  ;;  %v466_v53 = vld [vmem:[%s5546_s19 + $0xc0] sm:$0xff] }
  0x76   : > { %v1913_v8 = vsel %vm785_vm0, %v1910_v33, %v1912_v60  ;;  %v2156_v10 = vrot.slane %v2055_v62, 2  ;;  %v628_v11 = vmul.f32 %v5570_v18, %v5755_v32  ;;  %v698_v13 = vmul.f32 %v5574_v19, %v5749_v26  ;;  %553 = vst [vmem:[#allocation2 + $0x139] sm:$0xff] %v466_v53 }
  0x77   : > { %v2015_v61 = vadd.f32 %v1911_v1, %v1771_v58  ;;  %v2016_v3 = vadd.f32 %v1913_v8, %v1772_v2  ;;  %v2155_v17 = vsel %vm1030_vm1, %v2153_v63, %v2154_v5  ;;  %v699_v24 = vmul.f32 %v5574_v19, %v5755_v32 }
  0x78   : > { %v2157_v25 = vsel %vm1030_vm1, %v2154_v5, %v2156_v10  ;;  %v700_v28 = vmul.f32 %v5574_v19, %v5759_v56  ;;  %v801_v29 = vrot.slane %v698_v13, 1  ;;  %v943_v31 = vmul.f32 %v5578_v20, %v5749_v26 }
  0x79   : > { %v2259_v35 = vadd.f32 %v2155_v17, %v2015_v61  ;;  %v2260_v37 = vadd.f32 %v2157_v25, %v2016_v3  ;;  %v802_v39 = vrot.slane %v699_v24, 1  ;;  %v944_v41 = vmul.f32 %v5578_v20, %v5755_v32  ;;  %v5893_v3 = vld [vmem:[#allocation2 + $0x78] sm:$0xff]  ;;  %v5895_v17 = vld [vmem:[#allocation2 + $0x80] sm:$0xff] }
  0x7a   : > { %v804_v42 = vrot.slane %v700_v28, 1  ;;  %v945_v40 = vmul.f32 %v5578_v20, %v5759_v56  ;;  %v1046_v45 = vrot.slane %v943_v31, 2  ;;  %v1185_v46 = vmul.f32 %v5597_v36, %v5819_v9  ;;  %v467_v56 = vld [vmem:[%s5546_s19 + $0xc8] sm:$0xff] }
  0x7b   : > { %v2298_v50 = vmul.f32 %v5712_v38, %v2259_v35  ;;  %v2299_v26 = vmul.f32 %v5712_v38, %v2260_v37  ;;  %v803_v15 = vsel %vm785_vm0, %v801_v29, %v802_v39  ;;  %v1047_v57 = vrot.slane %v944_v41, 2  ;;  %554 = vst [vmem:[#allocation2 + $0x141] sm:$0xff] %v467_v56  ;;  %v5904_v41 = vld [vmem:[#allocation2 + $0x88] sm:$0x3] }
  0x7c   : > { %v805_v51 = vsel %vm785_vm0, %v802_v39, %v804_v42  ;;  %v904_v52 = vadd.f32 %v803_v15, %v627_v0  ;;  %v1049_v27 = vrot.slane %v945_v40, 2  ;;  %v1186_v32 = vmul.f32 %v5597_v36, %v5821_v14 }
  0x7d   : > { %v2337_v54 = vadd.f32 %v5723_v47, %v2298_v50  ;;  %v2338_v33 = vadd.f32 %v5723_v47, %v2299_v26  ;;  %v905_v59 = vadd.f32 %v805_v51, %v628_v11  ;;  %v1048_v60 = vsel %vm1030_vm1, %v1046_v45, %v1047_v57 }
  0x7e   : > { %v1050_v62 = vsel %vm1030_vm1, %v1047_v57, %v1049_v27  ;;  %v1149_v63 = vadd.f32 %v1048_v60, %v904_v52  ;;  %v1256_v0 = vmul.f32 %v5604_v43, %v5819_v9  ;;  %v1257_v58 = vmul.f32 %v5604_v43, %v5821_v14 }
  0x7f   : > { %v2367_v2 = vpack.c.bf16 %v2338_v33, %v2337_v54  ;;  %v1150_v1 = vadd.f32 %v1050_v62, %v905_v59  ;;  %v1258_v5 = vmul.f32 %v5604_v43, %v5835_v44  ;;  %v1500_v8 = vmul.f32 %v5611_v48, %v5819_v9 }
  0x80   : > { %v1217_v10 = vadd.f32 %v1185_v46, %v1149_v63  ;;  %v1358_v11 = vrot.slane %v1256_v0, 1  ;;  %v1359_v13 = vrot.slane %v1257_v58, 1  ;;  %v1501_v61 = vmul.f32 %v5611_v48, %v5821_v14 }
  0x81   : > { %5182 = vmatprep.mubr.bf16.mxu0 %v2367_v2  ;;  %v1218_v24 = vadd.f32 %v1186_v32, %v1150_v1  ;;  %v1361_v25 = vrot.slane %v1258_v5, 1  ;;  %v1502_v28 = vmul.f32 %v5611_v48, %v5835_v44  ;;  %v1602_v29 = vrot.slane %v1500_v8, 2 }
  0x82   : > { %v1360_v31 = vsel %vm785_vm0, %v1358_v11, %v1359_v13  ;;  %v1603_v35 = vrot.slane %v1501_v61, 2  ;;  %v1741_v37 = vmul.f32 %v5615_v49, %v5893_v3  ;;  %v1742_v39 = vmul.f32 %v5615_v49, %v5895_v17 }
  0x83   : > { %v1362_v42 = vsel %vm785_vm0, %v1359_v13, %v1361_v25  ;;  %v1461_v40 = vadd.f32 %v1360_v31, %v1217_v10  ;;  %v1605_v45 = vrot.slane %v1502_v28, 2  ;;  %v1812_v46 = vmul.f32 %v5626_v55, %v5893_v3 }
  0x84   : > { %v1462_v50 = vadd.f32 %v1362_v42, %v1218_v24  ;;  %v1604_v26 = vsel %vm1030_vm1, %v1602_v29, %v1603_v35  ;;  %v1813_v15 = vmul.f32 %v5626_v55, %v5895_v17  ;;  %v1814_v57 = vmul.f32 %v5626_v55, %v5904_v41 }
  0x85   : > { %v1606_v51 = vsel %vm1030_vm1, %v1603_v35, %v1605_v45  ;;  %v1705_v52 = vadd.f32 %v1604_v26, %v1461_v40  ;;  %v1914_v27 = vrot.slane %v1812_v46, 1  ;;  %v2056_v32 = vmul.f32 %v5670_v34, %v5893_v3 }
  0x86   : > { %v1706_v53 = vadd.f32 %v1606_v51, %v1462_v50  ;;  %v1915_v56 = vrot.slane %v1813_v15, 1  ;;  %v1917_v54 = vrot.slane %v1814_v57, 1  ;;  %v2057_v33 = vmul.f32 %v5670_v34, %v5895_v17 }
  0x87   : > { %v1773_v59 = vadd.f32 %v1741_v37, %v1705_v52  ;;  %v2058_v60 = vmul.f32 %v5670_v34, %v5904_v41  ;;  %v2158_v62 = vrot.slane %v2056_v32, 2  ;;  %v629_v63 = vmul.f32 %v5570_v18, %v5819_v9 }
  0x88   : > { %v1774_v0 = vadd.f32 %v1742_v39, %v1706_v53  ;;  %v1916_v58 = vsel %vm785_vm0, %v1914_v27, %v1915_v56  ;;  %v1918_v2 = vsel %vm785_vm0, %v1915_v56, %v1917_v54  ;;  %v2159_v1 = vrot.slane %v2057_v33, 2 }
  0x89   : > { %v2017_v5 = vadd.f32 %v1916_v58, %v1773_v59  ;;  %v2161_v8 = vrot.slane %v2058_v60, 2  ;;  %v630_v10 = vmul.f32 %v5570_v18, %v5821_v14  ;;  %v701_v11 = vmul.f32 %v5574_v19, %v5819_v9 }
  0x8a   : > { %v2018_v13 = vadd.f32 %v1918_v2, %v1774_v0  ;;  %v2160_v61 = vsel %vm1030_vm1, %v2158_v62, %v2159_v1  ;;  %v702_v24 = vmul.f32 %v5574_v19, %v5821_v14  ;;  %v703_v25 = vmul.f32 %v5574_v19, %v5835_v44 }
  0x8b   : > { %v2162_v28 = vsel %vm1030_vm1, %v2159_v1, %v2161_v8  ;;  %v2261_v29 = vadd.f32 %v2160_v61, %v2017_v5  ;;  %v806_v31 = vrot.slane %v701_v11, 1  ;;  %v946_v35 = vmul.f32 %v5578_v20, %v5819_v9  ;;  %v5961_v1 = vld [vmem:[#allocation2 + $0x90] sm:$0xff] }
  0x8c   : > { %v2262_v37 = vadd.f32 %v2162_v28, %v2018_v13  ;;  %v807_v39 = vrot.slane %v702_v24, 1  ;;  %v809_v42 = vrot.slane %v703_v25, 1  ;;  %v947_v40 = vmul.f32 %v5578_v20, %v5821_v14  ;;  %v5965_v13 = vld [vmem:[#allocation2 + $0x98] sm:$0xff] }
  0x8d   : > { %v2300_v45 = vmul.f32 %v5712_v38, %v2261_v29  ;;  %v948_v46 = vmul.f32 %v5578_v20, %v5835_v44  ;;  %v1051_v50 = vrot.slane %v946_v35, 2  ;;  %v1187_v26 = vmul.f32 %v5597_v36, %v5893_v3  ;;  %v468_v29 = vld [vmem:[%s5546_s19 + $0xd0] sm:$0xff] }
  0x8e   : > { %v2301_v15 = vmul.f32 %v5712_v38, %v2262_v37  ;;  %v808_v57 = vsel %vm785_vm0, %v806_v31, %v807_v39  ;;  %v810_v9 = vsel %vm785_vm0, %v807_v39, %v809_v42  ;;  %v1052_v51 = vrot.slane %v947_v40, 2  ;;  %v469_v31 = vld [vmem:[%s5546_s19 + $0xd8] sm:$0xff]  ;;  %555 = vst [vmem:[#allocation2 + $0x151] sm:$0xff] %v468_v29  ;;  %v5977_v40 = vld [vmem:[#allocation2 + $0xa0] sm:$0x3] }
  0x8f   : > { %v2339_v52 = vadd.f32 %v5723_v47, %v2300_v45  ;;  %v906_v27 = vadd.f32 %v808_v57, %v629_v63  ;;  %v907_v14 = vadd.f32 %v810_v9, %v630_v10  ;;  %v1054_v32 = vrot.slane %v948_v46, 2  ;;  %556 = vst [vmem:[#allocation2 + $0x159] sm:$0xff] %v469_v31 }
  0x90   : > { %v2340_v53 = vadd.f32 %v5723_v47, %v2301_v15  ;;  %v1053_v44 = vsel %vm1030_vm1, %v1051_v50, %v1052_v51  ;;  %v1188_v56 = vmul.f32 %v5597_v36, %v5895_v17  ;;  %v1259_v54 = vmul.f32 %v5604_v43, %v5893_v3 }
  0x91   : > { %v1055_v33 = vsel %vm1030_vm1, %v1052_v51, %v1054_v32  ;;  %v1151_v59 = vadd.f32 %v1053_v44, %v906_v27  ;;  %v1260_v60 = vmul.f32 %v5604_v43, %v5895_v17  ;;  %v1261_v62 = vmul.f32 %v5604_v43, %v5904_v41 }
  0x92   : > { %v2368_v63 = vpack.c.bf16 %v2340_v53, %v2339_v52  ;;  %v1152_v0 = vadd.f32 %v1055_v33, %v907_v14  ;;  %v1363_v58 = vrot.slane %v1259_v54, 1  ;;  %v1503_v2 = vmul.f32 %v5611_v48, %v5893_v3 }
  0x93   : > { %v1219_v5 = vadd.f32 %v1187_v26, %v1151_v59  ;;  %v1364_v8 = vrot.slane %v1260_v60, 1  ;;  %v1366_v10 = vrot.slane %v1261_v62, 1  ;;  %v1504_v11 = vmul.f32 %v5611_v48, %v5895_v17 }
  0x94   : > { %5183 = vmatmul.mubr.bf16.gmra.mxu0 %v2368_v63  ;;  %v1220_v61 = vadd.f32 %v1188_v56, %v1152_v0  ;;  %v1505_v24 = vmul.f32 %v5611_v48, %v5904_v41  ;;  %v1607_v25 = vrot.slane %v1503_v2, 2  ;;  %v1743_v28 = vmul.f32 %v5615_v49, %v5961_v1 }
  0x95   : > { %v1365_v35 = vsel %vm785_vm0, %v1363_v58, %v1364_v8  ;;  %v1367_v37 = vsel %vm785_vm0, %v1364_v8, %v1366_v10  ;;  %v1608_v39 = vrot.slane %v1504_v11, 2  ;;  %v1744_v42 = vmul.f32 %v5615_v49, %v5965_v13 }
  0x96   : > { %v1463_v45 = vadd.f32 %v1365_v35, %v1219_v5  ;;  %v1464_v46 = vadd.f32 %v1367_v37, %v1220_v61  ;;  %v1610_v50 = vrot.slane %v1505_v24, 2  ;;  %v1815_v26 = vmul.f32 %v5626_v55, %v5961_v1 }
  0x97   : > { %v1609_v15 = vsel %vm1030_vm1, %v1607_v25, %v1608_v39  ;;  %v1816_v57 = vmul.f32 %v5626_v55, %v5965_v13  ;;  %v1817_v9 = vmul.f32 %v5626_v55, %v5977_v40  ;;  %v2059_v51 = vmul.f32 %v5670_v34, %v5961_v1 }
  0x98   : > { %v1611_v52 = vsel %vm1030_vm1, %v1608_v39, %v1610_v50  ;;  %v1707_v27 = vadd.f32 %v1609_v15, %v1463_v45  ;;  %v1919_v14 = vrot.slane %v1815_v26, 1  ;;  %v2060_v32 = vmul.f32 %v5670_v34, %v5965_v13 }
  0x99   : > { %v1708_v53 = vadd.f32 %v1611_v52, %v1464_v46  ;;  %v1920_v44 = vrot.slane %v1816_v57, 1  ;;  %v1922_v56 = vrot.slane %v1817_v9, 1  ;;  %v2061_v54 = vmul.f32 %v5670_v34, %v5977_v40 }
  0x9a   : > { %v1775_v33 = vadd.f32 %v1743_v28, %v1707_v27  ;;  %v2163_v59 = vrot.slane %v2059_v51, 2  ;;  %v2164_v60 = vrot.slane %v2060_v32, 2  ;;  %v631_v62 = vmul.f32 %v5570_v18, %v5893_v3  ;;  %v470_v32 = vld [vmem:[%s5546_s19 + $0xe0] sm:$0xff] }
  0x9b   : > { %v1776_v63 = vadd.f32 %v1744_v42, %v1708_v53  ;;  %v1921_v0 = vsel %vm785_vm0, %v1919_v14, %v1920_v44  ;;  %v1923_v58 = vsel %vm785_vm0, %v1920_v44, %v1922_v56  ;;  %v2166_v2 = vrot.slane %v2061_v54, 2  ;;  %v471_v53 = vld [vmem:[%s5546_s19 + $0xe8] sm:$0xff]  ;;  %557 = vst [vmem:[#allocation2 + $0x169] sm:$0xff] %v470_v32 }
  0x9c   : > { %v2019_v5 = vadd.f32 %v1921_v0, %v1775_v33  ;;  %v2165_v8 = vsel %vm1030_vm1, %v2163_v59, %v2164_v60  ;;  %v632_v10 = vmul.f32 %v5570_v18, %v5895_v17  ;;  %v704_v11 = vmul.f32 %v5574_v19, %v5893_v3  ;;  %558 = vst [vmem:[#allocation2 + $0x171] sm:$0xff] %v471_v53 }
  0x9d   : > { %v2020_v61 = vadd.f32 %v1923_v58, %v1776_v63  ;;  %v2167_v24 = vsel %vm1030_vm1, %v2164_v60, %v2166_v2  ;;  %v705_v25 = vmul.f32 %v5574_v19, %v5895_v17  ;;  %v706_v28 = vmul.f32 %v5574_v19, %v5904_v41 }
  0x9e   : > { %v2263_v29 = vadd.f32 %v2165_v8, %v2019_v5  ;;  %v811_v31 = vrot.slane %v704_v11, 1  ;;  %v949_v35 = vmul.f32 %v5578_v20, %v5893_v3  ;;  %v950_v37 = vmul.f32 %v5578_v20, %v5895_v17  ;;  %v6037_v8 = vld [vmem:[#allocation2 + $0xa8] sm:$0xff] }
  0x9f   : > { %v2264_v39 = vadd.f32 %v2167_v24, %v2020_v61  ;;  %v812_v42 = vrot.slane %v705_v25, 1  ;;  %v814_v45 = vrot.slane %v706_v28, 1  ;;  %v951_v46 = vmul.f32 %v5578_v20, %v5904_v41  ;;  %v6039_v25 = vld [vmem:[#allocation2 + $0xb0] sm:$0xff] }
  0xa0   : > { %v2302_v50 = vmul.f32 %v5712_v38, %v2263_v29  ;;  %v1056_v26 = vrot.slane %v949_v35, 2  ;;  %v1057_v15 = vrot.slane %v950_v37, 2  ;;  %v1189_v57 = vmul.f32 %v5597_v36, %v5961_v1 }
  0xa1   : > { %v2303_v3 = vmul.f32 %v5712_v38, %v2264_v39  ;;  %v813_v9 = vsel %vm785_vm0, %v811_v31, %v812_v42  ;;  %v815_v17 = vsel %vm785_vm0, %v812_v42, %v814_v45  ;;  %v1059_v51 = vrot.slane %v951_v46, 2  ;;  %v6051_v46 = vld [vmem:[#allocation2 + $0xb8] sm:$0x3] }
  0xa2   : > { %v2341_v52 = vadd.f32 %v5723_v47, %v2302_v50  ;;  %v908_v27 = vadd.f32 %v813_v9, %v631_v62  ;;  %v909_v14 = vadd.f32 %v815_v17, %v632_v10  ;;  %v1058_v41 = vsel %vm1030_vm1, %v1056_v26, %v1057_v15 }
  0xa3   : > { %v2342_v44 = vadd.f32 %v5723_v47, %v2303_v3  ;;  %v1060_v56 = vsel %vm1030_vm1, %v1057_v15, %v1059_v51  ;;  %v1190_v54 = vmul.f32 %v5597_v36, %v5965_v13  ;;  %v1262_v33 = vmul.f32 %v5604_v43, %v5961_v1 }
  0xa4   : > { %v1153_v59 = vadd.f32 %v1058_v41, %v908_v27  ;;  %v1154_v60 = vadd.f32 %v1060_v56, %v909_v14  ;;  %v1263_v62 = vmul.f32 %v5604_v43, %v5965_v13  ;;  %v1264_v63 = vmul.f32 %v5604_v43, %v5977_v40 }
  0xa5   : > { %v2369_v0 = vpack.c.bf16 %v2342_v44, %v2341_v52  ;;  %v1368_v58 = vrot.slane %v1262_v33, 1  ;;  %v1506_v2 = vmul.f32 %v5611_v48, %v5961_v1  ;;  %v1507_v5 = vmul.f32 %v5611_v48, %v5965_v13 }
  0xa6   : > { %v1221_v10 = vadd.f32 %v1189_v57, %v1153_v59  ;;  %v1222_v11 = vadd.f32 %v1190_v54, %v1154_v60  ;;  %v1369_v61 = vrot.slane %v1263_v62, 1  ;;  %v1371_v24 = vrot.slane %v1264_v63, 1 }
  0xa7   : > { %5186 = vmatprep.mubr.bf16.mxu0 %v2369_v0  ;;  %v1508_v28 = vmul.f32 %v5611_v48, %v5977_v40  ;;  %v1612_v29 = vrot.slane %v1506_v2, 2  ;;  %v1613_v31 = vrot.slane %v1507_v5, 2  ;;  %v1745_v35 = vmul.f32 %v5615_v49, %v6037_v8 }
  0xa8   : > { %v1370_v37 = vsel %vm785_vm0, %v1368_v58, %v1369_v61  ;;  %v1372_v39 = vsel %vm785_vm0, %v1369_v61, %v1371_v24  ;;  %v1746_v42 = vmul.f32 %v5615_v49, %v6039_v25  ;;  %v1818_v45 = vmul.f32 %v5626_v55, %v6037_v8 }
  0xa9   : > { %v1465_v50 = vadd.f32 %v1370_v37, %v1221_v10  ;;  %v1466_v26 = vadd.f32 %v1372_v39, %v1222_v11  ;;  %v1614_v15 = vsel %vm1030_vm1, %v1612_v29, %v1613_v31  ;;  %v1615_v57 = vrot.slane %v1508_v28, 2 }
  0xaa   : > { %v1819_v3 = vmul.f32 %v5626_v55, %v6039_v25  ;;  %v1820_v9 = vmul.f32 %v5626_v55, %v6051_v46  ;;  %v1924_v17 = vrot.slane %v1818_v45, 1  ;;  %v2062_v51 = vmul.f32 %v5670_v34, %v6037_v8 }
  0xab   : > { %v1616_v52 = vsel %vm1030_vm1, %v1613_v31, %v1615_v57  ;;  %v1709_v27 = vadd.f32 %v1614_v15, %v1465_v50  ;;  %v2063_v14 = vmul.f32 %v5670_v34, %v6039_v25  ;;  %v2064_v41 = vmul.f32 %v5670_v34, %v6051_v46 }
  0xac   : > { %v1710_v32 = vadd.f32 %v1616_v52, %v1466_v26  ;;  %v1925_v53 = vrot.slane %v1819_v3, 1  ;;  %v1927_v44 = vrot.slane %v1820_v9, 1  ;;  %v2168_v56 = vrot.slane %v2062_v51, 2 }
  0xad   : > { %v1777_v54 = vadd.f32 %v1745_v35, %v1709_v27  ;;  %v2169_v33 = vrot.slane %v2063_v14, 2  ;;  %v2171_v59 = vrot.slane %v2064_v41, 2  ;;  %v633_v60 = vmul.f32 %v5570_v18, %v5961_v1 }
  0xae   : > { %v1778_v62 = vadd.f32 %v1746_v42, %v1710_v32  ;;  %v1926_v63 = vsel %vm785_vm0, %v1924_v17, %v1925_v53  ;;  %v1928_v0 = vsel %vm785_vm0, %v1925_v53, %v1927_v44  ;;  %v634_v58 = vmul.f32 %v5570_v18, %v5965_v13 }
  0xaf   : > { %v2021_v2 = vadd.f32 %v1926_v63, %v1777_v54  ;;  %v2170_v34 = vsel %vm1030_vm1, %v2168_v56, %v2169_v33  ;;  %v2172_v5 = vsel %vm1030_vm1, %v2169_v33, %v2171_v59  ;;  %v707_v10 = vmul.f32 %v5574_v19, %v5961_v1 }
  0xb0   : > { %v2022_v11 = vadd.f32 %v1928_v0, %v1778_v62  ;;  %v708_v61 = vmul.f32 %v5574_v19, %v5965_v13  ;;  %v709_v24 = vmul.f32 %v5574_v19, %v5977_v40  ;;  %v952_v28 = vmul.f32 %v5578_v20, %v5961_v1  ;;  %v6107_v0 = vld [vmem:[#allocation2 + $0xc0] sm:$0xff] }
  0xb1   : > { %v2265_v29 = vadd.f32 %v2170_v34, %v2021_v2  ;;  %v816_v31 = vrot.slane %v707_v10, 1  ;;  %v953_v35 = vmul.f32 %v5578_v20, %v5965_v13  ;;  %v954_v37 = vmul.f32 %v5578_v20, %v5977_v40  ;;  %v6111_v10 = vld [vmem:[#allocation2 + $0xc8] sm:$0xff] }
  0xb2   : > { %v2266_v39 = vadd.f32 %v2172_v5, %v2022_v11  ;;  %v817_v42 = vrot.slane %v708_v61, 1  ;;  %v819_v45 = vrot.slane %v709_v24, 1  ;;  %v1061_v50 = vrot.slane %v952_v28, 2 }
  0xb3   : > { %v2304_v26 = vmul.f32 %v5712_v38, %v2265_v29  ;;  %v1062_v15 = vrot.slane %v953_v35, 2  ;;  %v1064_v57 = vrot.slane %v954_v37, 2  ;;  %v1191_v3 = vmul.f32 %v5597_v36, %v6037_v8  ;;  %v472_v29 = vld [vmem:[%s5546_s19 + $0xf0] sm:$0xff] }
  0xb4   : > { %v2305_v1 = vmul.f32 %v5712_v38, %v2266_v39  ;;  %v818_v9 = vsel %vm785_vm0, %v816_v31, %v817_v42  ;;  %v820_v13 = vsel %vm785_vm0, %v817_v42, %v819_v45  ;;  %v1192_v40 = vmul.f32 %v5597_v36, %v6039_v25  ;;  %v473_v31 = vld [vmem:[%s5546_s19 + $0xf8] sm:$0xff]  ;;  %559 = vst [vmem:[#allocation2 + $0x181] sm:$0xff] %v472_v29  ;;  %v6121_v45 = vld [vmem:[#allocation2 + $0xd0] sm:$0x3] }
  0xb5   : > { %v2343_v17 = vadd.f32 %v5723_v47, %v2304_v26  ;;  %v910_v51 = vadd.f32 %v818_v9, %v633_v60  ;;  %v911_v52 = vadd.f32 %v820_v13, %v634_v58  ;;  %v1063_v27 = vsel %vm1030_vm1, %v1061_v50, %v1062_v15  ;;  %560 = vst [vmem:[#allocation2 + $0x189] sm:$0xff] %v473_v31  ;;  %v6134_v13 = vld [vmem:[%s8234_s1 + $0x8] ss:$0 sm:$0xff] }
  0xb6   : > { %v2344_v14 = vadd.f32 %v5723_v47, %v2305_v1  ;;  %v1065_v41 = vsel %vm1030_vm1, %v1062_v15, %v1064_v57  ;;  %v1265_v32 = vmul.f32 %v5604_v43, %v6037_v8  ;;  %v1266_v53 = vmul.f32 %v5604_v43, %v6039_v25 }
  0xb7   : > { %v1155_v44 = vadd.f32 %v1063_v27, %v910_v51  ;;  %v1156_v56 = vadd.f32 %v1065_v41, %v911_v52  ;;  %v1267_v54 = vmul.f32 %v5604_v43, %v6051_v46  ;;  %v1509_v33 = vmul.f32 %v5611_v48, %v6037_v8 }
  0xb8   : > { %v2370_v59 = vpack.c.bf16 %v2344_v14, %v2343_v17  ;;  %v1373_v60 = vrot.slane %v1265_v32, 1  ;;  %v1374_v62 = vrot.slane %v1266_v53, 1  ;;  %v1510_v63 = vmul.f32 %v5611_v48, %v6039_v25 }
  0xb9   : > { %v1223_v58 = vadd.f32 %v1191_v3, %v1155_v44  ;;  %v1224_v2 = vadd.f32 %v1192_v40, %v1156_v56  ;;  %v1376_v34 = vrot.slane %v1267_v54, 1  ;;  %v1511_v5 = vmul.f32 %v5611_v48, %v6051_v46 }
  0xba   : > { %5187 = vmatmul.mubr.bf16.gmra.mxu0 %v2370_v59  ;;  %v1375_v11 = vsel %vm785_vm0, %v1373_v60, %v1374_v62  ;;  %v1617_v61 = vrot.slane %v1509_v33, 2  ;;  %v1618_v24 = vrot.slane %v1510_v63, 2  ;;  %v1747_v28 = vmul.f32 %v5615_v49, %v6107_v0 }
  0xbb   : > { %v1377_v35 = vsel %vm785_vm0, %v1374_v62, %v1376_v34  ;;  %v1467_v37 = vadd.f32 %v1375_v11, %v1223_v58  ;;  %v1620_v39 = vrot.slane %v1511_v5, 2  ;;  %v1748_v42 = vmul.f32 %v5615_v49, %v6111_v10 }
  0xbc   : > { %v1468_v50 = vadd.f32 %v1377_v35, %v1224_v2  ;;  %v1619_v26 = vsel %vm1030_vm1, %v1617_v61, %v1618_v24  ;;  %v1821_v15 = vmul.f32 %v5626_v55, %v6107_v0  ;;  %v1822_v57 = vmul.f32 %v5626_v55, %v6111_v10 }
  0xbd   : > { %v1621_v3 = vsel %vm1030_vm1, %v1618_v24, %v1620_v39  ;;  %v1711_v1 = vadd.f32 %v1619_v26, %v1467_v37  ;;  %v1823_v9 = vmul.f32 %v5626_v55, %v6121_v45  ;;  %v2065_v40 = vmul.f32 %v6134_v13, %v6107_v0 }
  0xbe   : > { %v1712_v17 = vadd.f32 %v1621_v3, %v1468_v50  ;;  %v1929_v51 = vrot.slane %v1821_v15, 1  ;;  %v1930_v52 = vrot.slane %v1822_v57, 1  ;;  %v2066_v27 = vmul.f32 %v6134_v13, %v6111_v10 }
  0xbf   : > { %v1779_v14 = vadd.f32 %v1747_v28, %v1711_v1  ;;  %v1932_v41 = vrot.slane %v1823_v9, 1  ;;  %v2067_v32 = vmul.f32 %v6134_v13, %v6121_v45  ;;  %v2173_v53 = vrot.slane %v2065_v40, 2 }
  0xc0   : > { %v1780_v44 = vadd.f32 %v1748_v42, %v1712_v17  ;;  %v1931_v56 = vsel %vm785_vm0, %v1929_v51, %v1930_v52  ;;  %v2174_v54 = vrot.slane %v2066_v27, 2  ;;  %v635_v33 = vmul.f32 %v5570_v18, %v6037_v8 }
  0xc1   : > { %v1933_v59 = vsel %vm785_vm0, %v1930_v52, %v1932_v41  ;;  %v2023_v60 = vadd.f32 %v1931_v56, %v1779_v14  ;;  %v2176_v62 = vrot.slane %v2067_v32, 2  ;;  %v636_v63 = vmul.f32 %v5570_v18, %v6039_v25 }
  0xc2   : > { %v2024_v58 = vadd.f32 %v1933_v59, %v1780_v44  ;;  %v2175_v2 = vsel %vm1030_vm1, %v2173_v53, %v2174_v54  ;;  %v710_v34 = vmul.f32 %v5574_v19, %v6037_v8  ;;  %v711_v5 = vmul.f32 %v5574_v19, %v6039_v25 }
  0xc3   : > { %v2177_v11 = vsel %vm1030_vm1, %v2174_v54, %v2176_v62  ;;  %v2267_v61 = vadd.f32 %v2175_v2, %v2023_v60  ;;  %v712_v24 = vmul.f32 %v5574_v19, %v6051_v46  ;;  %v955_v28 = vmul.f32 %v5578_v20, %v6037_v8  ;;  %v6184_v60 = vld [vmem:[#allocation2 + $0xd8] sm:$0xff]  ;;  %v6186_v62 = vld [vmem:[#allocation2 + $0xe0] sm:$0xff] }
  0xc4   : > { %v2268_v29 = vadd.f32 %v2177_v11, %v2024_v58  ;;  %v821_v31 = vrot.slane %v710_v34, 1  ;;  %v822_v35 = vrot.slane %v711_v5, 1  ;;  %v956_v37 = vmul.f32 %v5578_v20, %v6039_v25 }
  0xc5   : > { %v2306_v39 = vmul.f32 %v5712_v38, %v2267_v61  ;;  %v824_v42 = vrot.slane %v712_v24, 1  ;;  %v957_v50 = vmul.f32 %v5578_v20, %v6051_v46  ;;  %v1066_v26 = vrot.slane %v955_v28, 2  ;;  %v6195_v28 = vld [vmem:[#allocation2 + $0xe8] sm:$0x3] }
  0xc6   : > { %v2307_v15 = vmul.f32 %v5712_v38, %v2268_v29  ;;  %v823_v57 = vsel %vm785_vm0, %v821_v31, %v822_v35  ;;  %v1067_v3 = vrot.slane %v956_v37, 2  ;;  %v1193_v8 = vmul.f32 %v5597_v36, %v6107_v0 }
  0xc7   : > { %v2345_v1 = vadd.f32 %v5723_v47, %v2306_v39  ;;  %v825_v9 = vsel %vm785_vm0, %v822_v35, %v824_v42  ;;  %v912_v25 = vadd.f32 %v823_v57, %v635_v33  ;;  %v1069_v40 = vrot.slane %v957_v50, 2 }
  0xc8   : > { %v2346_v17 = vadd.f32 %v5723_v47, %v2307_v15  ;;  %v913_v51 = vadd.f32 %v825_v9, %v636_v63  ;;  %v1068_v46 = vsel %vm1030_vm1, %v1066_v26, %v1067_v3  ;;  %v1194_v38 = vmul.f32 %v5597_v36, %v6111_v10 }
  0xc9   : > { %v1070_v52 = vsel %vm1030_vm1, %v1067_v3, %v1069_v40  ;;  %v1157_v27 = vadd.f32 %v1068_v46, %v912_v25  ;;  %v1268_v14 = vmul.f32 %v5604_v43, %v6107_v0  ;;  %v1269_v41 = vmul.f32 %v5604_v43, %v6111_v10 }
  0xca   : > { %v2371_v32 = vpack.c.bf16 %v2346_v17, %v2345_v1  ;;  %v1158_v53 = vadd.f32 %v1070_v52, %v913_v51  ;;  %v1270_v47 = vmul.f32 %v5604_v43, %v6121_v45  ;;  %v1512_v44 = vmul.f32 %v5611_v48, %v6107_v0 }
  0xcb   : > { %v1225_v56 = vadd.f32 %v1193_v8, %v1157_v27  ;;  %v1378_v54 = vrot.slane %v1268_v14, 1  ;;  %v1379_v33 = vrot.slane %v1269_v41, 1  ;;  %v1513_v59 = vmul.f32 %v5611_v48, %v6111_v10 }
  0xcc   : > { %5190 = vmatprep.mubr.bf16.mxu0 %v2371_v32  ;;  %v1226_v63 = vadd.f32 %v1194_v38, %v1158_v53  ;;  %v1381_v58 = vrot.slane %v1270_v47, 1  ;;  %v1514_v2 = vmul.f32 %v5611_v48, %v6121_v45  ;;  %v1622_v34 = vrot.slane %v1512_v44, 2 }
  0xcd   : > { %v1380_v5 = vsel %vm785_vm0, %v1378_v54, %v1379_v33  ;;  %v1623_v11 = vrot.slane %v1513_v59, 2  ;;  %v1749_v61 = vmul.f32 %v5615_v49, %v6184_v60  ;;  %v1750_v24 = vmul.f32 %v5615_v49, %v6186_v62 }
  0xce   : > { %v1382_v29 = vsel %vm785_vm0, %v1379_v33, %v1381_v58  ;;  %v1469_v31 = vadd.f32 %v1380_v5, %v1225_v56  ;;  %v1625_v35 = vrot.slane %v1514_v2, 2  ;;  %v1824_v37 = vmul.f32 %v5626_v55, %v6184_v60 }
  0xcf   : > { %v1470_v39 = vadd.f32 %v1382_v29, %v1226_v63  ;;  %v1624_v42 = vsel %vm1030_vm1, %v1622_v34, %v1623_v11  ;;  %v1825_v50 = vmul.f32 %v5626_v55, %v6186_v62  ;;  %v1826_v26 = vmul.f32 %v5626_v55, %v6195_v28  ;;  %v6233_v29 = vld [vmem:[%s8235_s2] ss:$0 sm:$0xff] }
  0xd0   : > { %v1626_v15 = vsel %vm1030_vm1, %v1623_v11, %v1625_v35  ;;  %v1713_v57 = vadd.f32 %v1624_v42, %v1469_v31  ;;  %v1934_v3 = vrot.slane %v1824_v37, 1  ;;  %v2068_v8 = vmul.f32 %v6134_v13, %v6184_v60 }
  0xd1   : > { %v1714_v1 = vadd.f32 %v1626_v15, %v1470_v39  ;;  %v1935_v9 = vrot.slane %v1825_v50, 1  ;;  %v1937_v25 = vrot.slane %v1826_v26, 1  ;;  %v2069_v40 = vmul.f32 %v6134_v13, %v6186_v62  ;;  %v6246_v26 = vld [vmem:[%s8236_s3] ss:$0 sm:$0xff] }
  0xd2   : > { %v1781_v17 = vadd.f32 %v1749_v61, %v1713_v57  ;;  %v2070_v51 = vmul.f32 %v6134_v13, %v6195_v28  ;;  %v2178_v46 = vrot.slane %v2068_v8, 2  ;;  %v637_v38 = vmul.f32 %v5570_v18, %v6107_v0 }
  0xd3   : > { %v1782_v52 = vadd.f32 %v1750_v24, %v1714_v1  ;;  %v1936_v27 = vsel %vm785_vm0, %v1934_v3, %v1935_v9  ;;  %v1938_v14 = vsel %vm785_vm0, %v1935_v9, %v1937_v25  ;;  %v2179_v41 = vrot.slane %v2069_v40, 2 }
  0xd4   : > { %v2025_v32 = vadd.f32 %v1936_v27, %v1781_v17  ;;  %v2181_v53 = vrot.slane %v2070_v51, 2  ;;  %v638_v47 = vmul.f32 %v5570_v18, %v6111_v10  ;;  %v713_v44 = vmul.f32 %v5574_v19, %v6107_v0 }
  0xd5   : > { %v2026_v56 = vadd.f32 %v1938_v14, %v1782_v52  ;;  %v2180_v54 = vsel %vm1030_vm1, %v2178_v46, %v2179_v41  ;;  %v714_v33 = vmul.f32 %v5574_v19, %v6111_v10  ;;  %v715_v59 = vmul.f32 %v5574_v19, %v6121_v45 }
  0xd6   : > { %v2182_v63 = vsel %vm1030_vm1, %v2179_v41, %v2181_v53  ;;  %v2269_v58 = vadd.f32 %v2180_v54, %v2025_v32  ;;  %v826_v2 = vrot.slane %v713_v44, 1  ;;  %v958_v34 = vmul.f32 %v5578_v20, %v6107_v0  ;;  %v6262_v41 = vld [vmem:[#allocation2 + $0xf0] sm:$0xff] }
  0xd7   : > { %v2270_v5 = vadd.f32 %v2182_v63, %v2026_v56  ;;  %v827_v11 = vrot.slane %v714_v33, 1  ;;  %v829_v61 = vrot.slane %v715_v59, 1  ;;  %v959_v24 = vmul.f32 %v5578_v20, %v6111_v10  ;;  %v6266_v56 = vld [vmem:[#allocation2 + $0xf8] sm:$0xff] }
  0xd8   : > { %v2308_v31 = vmul.f32 %v6233_v29, %v2269_v58  ;;  %v960_v35 = vmul.f32 %v5578_v20, %v6121_v45  ;;  %v1071_v37 = vrot.slane %v958_v34, 2  ;;  %v1195_v0 = vmul.f32 %v5597_v36, %v6184_v60 }
  0xd9   : > { %v2309_v39 = vmul.f32 %v6233_v29, %v2270_v5  ;;  %v828_v42 = vsel %vm785_vm0, %v826_v2, %v827_v11  ;;  %v830_v10 = vsel %vm785_vm0, %v827_v11, %v829_v61  ;;  %v1072_v50 = vrot.slane %v959_v24, 2  ;;  %v6276_v11 = vld [vmem:[#allocation2 + $0x100] sm:$0x3] }
  0xda   : > { %v2347_v15 = vadd.f32 %v6246_v26, %v2308_v31  ;;  %v914_v57 = vadd.f32 %v828_v42, %v637_v38  ;;  %v915_v45 = vadd.f32 %v830_v10, %v638_v47  ;;  %v1074_v3 = vrot.slane %v960_v35, 2 }
  0xdb   : > { %v2348_v8 = vadd.f32 %v6246_v26, %v2309_v39  ;;  %v1073_v1 = vsel %vm1030_vm1, %v1071_v37, %v1072_v50  ;;  %v1196_v9 = vmul.f32 %v5597_v36, %v6186_v62  ;;  %v1271_v25 = vmul.f32 %v5604_v43, %v6184_v60 }
  0xdc   : > { %v1075_v40 = vsel %vm1030_vm1, %v1072_v50, %v1074_v3  ;;  %v1159_v17 = vadd.f32 %v1073_v1, %v914_v57  ;;  %v1272_v51 = vmul.f32 %v5604_v43, %v6186_v62  ;;  %v1273_v46 = vmul.f32 %v5604_v43, %v6195_v28 }
  0xdd   : > { %v2372_v38 = vpack.c.bf16 %v2348_v8, %v2347_v15  ;;  %v1160_v52 = vadd.f32 %v1075_v40, %v915_v45  ;;  %v1383_v27 = vrot.slane %v1271_v25, 1  ;;  %v1515_v14 = vmul.f32 %v5611_v48, %v6184_v60 }
  0xde   : > { %v1227_v32 = vadd.f32 %v1195_v0, %v1159_v17  ;;  %v1384_v53 = vrot.slane %v1272_v51, 1  ;;  %v1386_v47 = vrot.slane %v1273_v46, 1  ;;  %v1516_v44 = vmul.f32 %v5611_v48, %v6186_v62 }
  0xdf   : > { %5191 = vmatmul.mubr.bf16.gmra.mxu0 %v2372_v38  ;;  %v1228_v54 = vadd.f32 %v1196_v9, %v1160_v52  ;;  %v1517_v33 = vmul.f32 %v5611_v48, %v6195_v28  ;;  %v1627_v59 = vrot.slane %v1515_v14, 2  ;;  %v1751_v63 = vmul.f32 %v5615_v49, %v6262_v41 }
  0xe0   : > { %v1385_v58 = vsel %vm785_vm0, %v1383_v27, %v1384_v53  ;;  %v1387_v2 = vsel %vm785_vm0, %v1384_v53, %v1386_v47  ;;  %v1628_v34 = vrot.slane %v1516_v44, 2  ;;  %v1752_v5 = vmul.f32 %v5615_v49, %v6266_v56 }
  0xe1   : > { %v1471_v61 = vadd.f32 %v1385_v58, %v1227_v32  ;;  %v1472_v24 = vadd.f32 %v1387_v2, %v1228_v54  ;;  %v1630_v31 = vrot.slane %v1517_v33, 2  ;;  %v1827_v35 = vmul.f32 %v5626_v55, %v6262_v41 }
  0xe2   : > { %v1629_v37 = vsel %vm1030_vm1, %v1627_v59, %v1628_v34  ;;  %v1828_v0 = vmul.f32 %v5626_v55, %v6266_v56  ;;  %v1829_v39 = vmul.f32 %v5626_v55, %v6276_v11  ;;  %v2071_v42 = vmul.f32 %v6134_v13, %v6262_v41 }
  0xe3   : > { %v1631_v10 = vsel %vm1030_vm1, %v1628_v34, %v1630_v31  ;;  %v1715_v50 = vadd.f32 %v1629_v37, %v1471_v61  ;;  %v1939_v15 = vrot.slane %v1827_v35, 1  ;;  %v2072_v57 = vmul.f32 %v6134_v13, %v6266_v56 }
  0xe4   : > { %v1716_v45 = vadd.f32 %v1631_v10, %v1472_v24  ;;  %v1940_v3 = vrot.slane %v1828_v0, 1  ;;  %v1942_v8 = vrot.slane %v1829_v39, 1  ;;  %v2073_v1 = vmul.f32 %v6134_v13, %v6276_v11 }
  0xe5   : > { %v1783_v9 = vadd.f32 %v1751_v63, %v1715_v50  ;;  %v2183_v25 = vrot.slane %v2071_v42, 2  ;;  %v2184_v40 = vrot.slane %v2072_v57, 2  ;;  %v639_v17 = vmul.f32 %v5570_v18, %v6184_v60 }
  0xe6   : > { %v1784_v51 = vadd.f32 %v1752_v5, %v1716_v45  ;;  %v1941_v46 = vsel %vm785_vm0, %v1939_v15, %v1940_v3  ;;  %v1943_v38 = vsel %vm785_vm0, %v1940_v3, %v1942_v8  ;;  %v2186_v52 = vrot.slane %v2073_v1, 2 }
  0xe7   : > { %v2027_v27 = vadd.f32 %v1941_v46, %v1783_v9  ;;  %v2185_v14 = vsel %vm1030_vm1, %v2183_v25, %v2184_v40  ;;  %v640_v32 = vmul.f32 %v5570_v18, %v6186_v62  ;;  %v716_v53 = vmul.f32 %v5574_v19, %v6184_v60 }
  0xe8   : > { %v2028_v47 = vadd.f32 %v1943_v38, %v1784_v51  ;;  %v2187_v44 = vsel %vm1030_vm1, %v2184_v40, %v2186_v52  ;;  %v717_v54 = vmul.f32 %v5574_v19, %v6186_v62  ;;  %v718_v33 = vmul.f32 %v5574_v19, %v6195_v28  ;;  %v6334_v52 = vld [vmem:[#allocation2 + $0x108] sm:$0xff] }
  0xe9   : > { %v2271_v59 = vadd.f32 %v2185_v14, %v2027_v27  ;;  %v831_v63 = vrot.slane %v716_v53, 1  ;;  %v961_v58 = vmul.f32 %v5578_v20, %v6184_v60  ;;  %v962_v2 = vmul.f32 %v5578_v20, %v6186_v62 }
  0xea   : > { %v2272_v34 = vadd.f32 %v2187_v44, %v2028_v47  ;;  %v832_v5 = vrot.slane %v717_v54, 1  ;;  %v834_v61 = vrot.slane %v718_v33, 1  ;;  %v963_v24 = vmul.f32 %v5578_v20, %v6195_v28  ;;  %v6336_v47 = vld [vmem:[#allocation2 + $0x110] sm:$0xff] }
  0xeb   : > { %v2310_v31 = vmul.f32 %v6233_v29, %v2271_v59  ;;  %v1076_v35 = vrot.slane %v961_v58, 2  ;;  %v1077_v37 = vrot.slane %v962_v2, 2  ;;  %v1197_v0 = vmul.f32 %v5597_v36, %v6262_v41 }
  0xec   : > { %v2311_v39 = vmul.f32 %v6233_v29, %v2272_v34  ;;  %v833_v60 = vsel %vm785_vm0, %v831_v63, %v832_v5  ;;  %v835_v42 = vsel %vm785_vm0, %v832_v5, %v834_v61  ;;  %v1079_v62 = vrot.slane %v963_v24, 2  ;;  %v6348_v5 = vld [vmem:[#allocation2 + $0x118] sm:$0x3] }
  0xed   : > { %v2349_v10 = vadd.f32 %v6246_v26, %v2310_v31  ;;  %v916_v50 = vadd.f32 %v833_v60, %v639_v17  ;;  %v917_v15 = vadd.f32 %v835_v42, %v640_v32  ;;  %v1078_v28 = vsel %vm1030_vm1, %v1076_v35, %v1077_v37 }
  0xee   : > { %v2350_v57 = vadd.f32 %v6246_v26, %v2311_v39  ;;  %v1080_v45 = vsel %vm1030_vm1, %v1077_v37, %v1079_v62  ;;  %v1198_v3 = vmul.f32 %v5597_v36, %v6266_v56  ;;  %v1274_v8 = vmul.f32 %v5604_v43, %v6262_v41 }
  0xef   : > { %v1161_v1 = vadd.f32 %v1078_v28, %v916_v50  ;;  %v1162_v9 = vadd.f32 %v1080_v45, %v917_v15  ;;  %v1275_v25 = vmul.f32 %v5604_v43, %v6266_v56  ;;  %v1276_v40 = vmul.f32 %v5604_v43, %v6276_v11 }
  0xf0   : > { %v2373_v17 = vpack.c.bf16 %v2350_v57, %v2349_v10  ;;  %v1388_v51 = vrot.slane %v1274_v8, 1  ;;  %v1518_v46 = vmul.f32 %v5611_v48, %v6262_v41  ;;  %v1519_v38 = vmul.f32 %v5611_v48, %v6266_v56 }
  0xf1   : > { %v1229_v27 = vadd.f32 %v1197_v0, %v1161_v1  ;;  %v1230_v14 = vadd.f32 %v1198_v3, %v1162_v9  ;;  %v1389_v32 = vrot.slane %v1275_v25, 1  ;;  %v1391_v53 = vrot.slane %v1276_v40, 1 }
  0xf2   : > { %5194 = vmatprep.mubr.bf16.mxu0 %v2373_v17  ;;  %v1520_v44 = vmul.f32 %v5611_v48, %v6276_v11  ;;  %v1632_v54 = vrot.slane %v1518_v46, 2  ;;  %v1633_v33 = vrot.slane %v1519_v38, 2  ;;  %v1753_v59 = vmul.f32 %v5615_v49, %v6334_v52 }
  0xf3   : > { %v1390_v63 = vsel %vm785_vm0, %v1388_v51, %v1389_v32  ;;  %v1392_v58 = vsel %vm785_vm0, %v1389_v32, %v1391_v53  ;;  %v1754_v2 = vmul.f32 %v5615_v49, %v6336_v47  ;;  %v1830_v34 = vmul.f32 %v5626_v55, %v6334_v52 }
  0xf4   : > { %v1473_v61 = vadd.f32 %v1390_v63, %v1229_v27  ;;  %v1474_v24 = vadd.f32 %v1392_v58, %v1230_v14  ;;  %v1634_v31 = vsel %vm1030_vm1, %v1632_v54, %v1633_v33  ;;  %v1635_v35 = vrot.slane %v1520_v44, 2 }
  0xf5   : > { %v1831_v37 = vmul.f32 %v5626_v55, %v6336_v47  ;;  %v1832_v0 = vmul.f32 %v5626_v55, %v6348_v5  ;;  %v1944_v39 = vrot.slane %v1830_v34, 1  ;;  %v2074_v60 = vmul.f32 %v6134_v13, %v6334_v52 }
  0xf6   : > { %v1636_v42 = vsel %vm1030_vm1, %v1633_v33, %v1635_v35  ;;  %v1717_v62 = vadd.f32 %v1634_v31, %v1473_v61  ;;  %v2075_v10 = vmul.f32 %v6134_v13, %v6336_v47  ;;  %v2076_v50 = vmul.f32 %v6134_v13, %v6348_v5 }
  0xf7   : > { %v1718_v15 = vadd.f32 %v1636_v42, %v1474_v24  ;;  %v1945_v28 = vrot.slane %v1831_v37, 1  ;;  %v1947_v57 = vrot.slane %v1832_v0, 1  ;;  %v2188_v45 = vrot.slane %v2074_v60, 2 }
  0xf8   : > { %v1785_v3 = vadd.f32 %v1753_v59, %v1717_v62  ;;  %v2189_v8 = vrot.slane %v2075_v10, 2  ;;  %v2191_v1 = vrot.slane %v2076_v50, 2  ;;  %v641_v9 = vmul.f32 %v5570_v18, %v6262_v41 }
  0xf9   : > { %v1786_v25 = vadd.f32 %v1754_v2, %v1718_v15  ;;  %v1946_v40 = vsel %vm785_vm0, %v1944_v39, %v1945_v28  ;;  %v1948_v17 = vsel %vm785_vm0, %v1945_v28, %v1947_v57  ;;  %v642_v51 = vmul.f32 %v5570_v18, %v6266_v56 }
  0xfa   : > { %v2029_v46 = vadd.f32 %v1946_v40, %v1785_v3  ;;  %v2190_v38 = vsel %vm1030_vm1, %v2188_v45, %v2189_v8  ;;  %v2192_v27 = vsel %vm1030_vm1, %v2189_v8, %v2191_v1  ;;  %v719_v14 = vmul.f32 %v5574_v19, %v6262_v41 }
  0xfb   : > { %v2030_v32 = vadd.f32 %v1948_v17, %v1786_v25  ;;  %v720_v53 = vmul.f32 %v5574_v19, %v6266_v56  ;;  %v721_v44 = vmul.f32 %v5574_v19, %v6276_v11  ;;  %v964_v54 = vmul.f32 %v5578_v20, %v6262_v41 }
  0xfc   : > { %v2273_v33 = vadd.f32 %v2190_v38, %v2029_v46  ;;  %v836_v59 = vrot.slane %v719_v14, 1  ;;  %v965_v63 = vmul.f32 %v5578_v20, %v6266_v56  ;;  %v966_v58 = vmul.f32 %v5578_v20, %v6276_v11  ;;  %v6407_v46 = vld [vmem:[#allocation2 + $0x120] sm:$0xff] }
  0xfd   : > { %v2274_v2 = vadd.f32 %v2192_v27, %v2030_v32  ;;  %v837_v34 = vrot.slane %v720_v53, 1  ;;  %v839_v61 = vrot.slane %v721_v44, 1  ;;  %v1081_v24 = vrot.slane %v964_v54, 2  ;;  %v6411_v53 = vld [vmem:[#allocation2 + $0x128] sm:$0xff] }
  0xfe   : > { %v2312_v31 = vmul.f32 %v6233_v29, %v2273_v33  ;;  %v1082_v35 = vrot.slane %v965_v63, 2  ;;  %v1084_v37 = vrot.slane %v966_v58, 2  ;;  %v1199_v0 = vmul.f32 %v5597_v36, %v6334_v52 }
  0xff   : > { %v2313_v41 = vmul.f32 %v6233_v29, %v2274_v2  ;;  %v838_v39 = vsel %vm785_vm0, %v836_v59, %v837_v34  ;;  %v840_v56 = vsel %vm785_vm0, %v837_v34, %v839_v61  ;;  %v1200_v11 = vmul.f32 %v5597_v36, %v6336_v47  ;;  %v6419_v61 = vld [vmem:[#allocation2 + $0x130] sm:$0x3] }
 0x100   : > { %v2351_v60 = vadd.f32 %v6246_v26, %v2312_v31  ;;  %v918_v42 = vadd.f32 %v838_v39, %v641_v9  ;;  %v919_v62 = vadd.f32 %v840_v56, %v642_v51  ;;  %v1083_v10 = vsel %vm1030_vm1, %v1081_v24, %v1082_v35  ;;  %v5275_v51 = vld [vmem:[%s8243_s10 + $0x38] sm:$0xff]  }
 0x101   : > { %v2352_v50 = vadd.f32 %v6246_v26, %v2313_v41  ;;  %v1085_v15 = vsel %vm1030_vm1, %v1082_v35, %v1084_v37  ;;  %v1277_v28 = vmul.f32 %v5604_v43, %v6334_v52  ;;  %v1278_v57 = vmul.f32 %v5604_v43, %v6336_v47  ;;  %5210 = vmatprep.subr.bf16.mxu1 %v5275_v51 }
 0x102   : > { %v1163_v45 = vadd.f32 %v1083_v10, %v918_v42  ;;  %v1164_v3 = vadd.f32 %v1085_v15, %v919_v62  ;;  %v1279_v8 = vmul.f32 %v5604_v43, %v6348_v5  ;;  %v1521_v1 = vmul.f32 %v5611_v48, %v6334_v52  ;;  %5211 = vmatpush3.bf16.msra.mxu1 %v5275_v51 }
 0x103   : > { %v2374_v9 = vpack.c.bf16 %v2352_v50, %v2351_v60  ;;  %v1393_v25 = vrot.slane %v1277_v28, 1  ;;  %v1394_v40 = vrot.slane %v1278_v57, 1  ;;  %v1522_v17 = vmul.f32 %v5611_v48, %v6336_v47 }
 0x104   : > { %v1231_v38 = vadd.f32 %v1199_v0, %v1163_v45  ;;  %v1232_v27 = vadd.f32 %v1200_v11, %v1164_v3  ;;  %v1396_v14 = vrot.slane %v1279_v8, 1  ;;  %v1523_v32 = vmul.f32 %v5611_v48, %v6348_v5  ;;  %v5276_v0 = vld [vmem:[%s8243_s10 + $0x30] sm:$0xff]  }
 0x105   : > { %5195 = vmatmul.mubr.bf16.gmra.mxu0 %v2374_v9  ;;  %v1395_v44 = vsel %vm785_vm0, %v1393_v25, %v1394_v40  ;;  %v1637_v54 = vrot.slane %v1521_v1, 2  ;;  %v1638_v33 = vrot.slane %v1522_v17, 2  ;;  %v1755_v59 = vmul.f32 %v5615_v49, %v6407_v46  ;;  %5212 = vmatprep.subr.bf16.mxu1 %v5276_v0 }
 0x106   : > { %v1397_v63 = vsel %vm785_vm0, %v1394_v40, %v1396_v14  ;;  %v1475_v58 = vadd.f32 %v1395_v44, %v1231_v38  ;;  %v1640_v2 = vrot.slane %v1523_v32, 2  ;;  %v1756_v34 = vmul.f32 %v5615_v49, %v6411_v53  ;;  %5213 = vmatpush3.bf16.msra.mxu1 %v5276_v0 }
 0x107   : > { %v1476_v24 = vadd.f32 %v1397_v63, %v1232_v27  ;;  %v1639_v31 = vsel %vm1030_vm1, %v1637_v54, %v1638_v33  ;;  %v1833_v35 = vmul.f32 %v5626_v55, %v6407_v46  ;;  %v1834_v37 = vmul.f32 %v5626_v55, %v6411_v53 }
 0x108   : > { %v1641_v41 = vsel %vm1030_vm1, %v1638_v33, %v1640_v2  ;;  %v1719_v39 = vadd.f32 %v1639_v31, %v1475_v58  ;;  %v1835_v56 = vmul.f32 %v5626_v55, %v6419_v61  ;;  %v2077_v11 = vmul.f32 %v6134_v13, %v6407_v46 }
 0x109   : > { %v1720_v60 = vadd.f32 %v1641_v41, %v1476_v24  ;;  %v1949_v42 = vrot.slane %v1833_v35, 1  ;;  %v1950_v62 = vrot.slane %v1834_v37, 1  ;;  %v2078_v10 = vmul.f32 %v6134_v13, %v6411_v53 }
 0x10a   : > { %v1787_v50 = vadd.f32 %v1755_v59, %v1719_v39  ;;  %v1952_v15 = vrot.slane %v1835_v56, 1  ;;  %v2079_v28 = vmul.f32 %v6134_v13, %v6419_v61  ;;  %v2193_v57 = vrot.slane %v2077_v11, 2 }
 0x10b   : > { %v1788_v45 = vadd.f32 %v1756_v34, %v1720_v60  ;;  %v1951_v3 = vsel %vm785_vm0, %v1949_v42, %v1950_v62  ;;  %v2194_v8 = vrot.slane %v2078_v10, 2  ;;  %v643_v1 = vmul.f32 %v5570_v18, %v6334_v52 }
 0x10c   : > { %v1953_v9 = vsel %vm785_vm0, %v1950_v62, %v1952_v15  ;;  %v2031_v25 = vadd.f32 %v1951_v3, %v1787_v50  ;;  %v2196_v40 = vrot.slane %v2079_v28, 2  ;;  %v644_v17 = vmul.f32 %v5570_v18, %v6336_v47 }
 0x10d   : > { %v2032_v51 = vadd.f32 %v1953_v9, %v1788_v45  ;;  %v2195_v38 = vsel %vm1030_vm1, %v2193_v57, %v2194_v8  ;;  %v722_v27 = vmul.f32 %v5574_v19, %v6334_v52  ;;  %v723_v14 = vmul.f32 %v5574_v19, %v6336_v47 }
 0x10e   : > { %v2197_v32 = vsel %vm1030_vm1, %v2194_v8, %v2196_v40  ;;  %v2275_v44 = vadd.f32 %v2195_v38, %v2031_v25  ;;  %v724_v54 = vmul.f32 %v5574_v19, %v6348_v5  ;;  %v967_v33 = vmul.f32 %v5578_v20, %v6334_v52 }
 0x10f   : > { %v2276_v59 = vadd.f32 %v2197_v32, %v2032_v51  ;;  %v841_v63 = vrot.slane %v722_v27, 1  ;;  %v842_v58 = vrot.slane %v723_v14, 1  ;;  %v968_v2 = vmul.f32 %v5578_v20, %v6336_v47  ;;  %v6482_v51 = vld [vmem:[#allocation2 + $0x140] sm:$0xff] }
 0x110   : > { %v2314_v34 = vmul.f32 %v6233_v29, %v2275_v44  ;;  %v844_v24 = vrot.slane %v724_v54, 1  ;;  %v969_v31 = vmul.f32 %v5578_v20, %v6348_v5  ;;  %v1086_v35 = vrot.slane %v967_v33, 2 }
 0x111   : > { %v2315_v37 = vmul.f32 %v6233_v29, %v2276_v59  ;;  %v843_v0 = vsel %vm785_vm0, %v841_v63, %v842_v58  ;;  %v1087_v41 = vrot.slane %v968_v2, 2  ;;  %v1201_v52 = vmul.f32 %v5597_v36, %v6407_v46  ;;  %v6491_v63 = vld [vmem:[#allocation2 + $0x148] sm:$0x3] }
 0x112   : > { %v2353_v39 = vadd.f32 %v6246_v26, %v2314_v34  ;;  %v845_v56 = vsel %vm785_vm0, %v842_v58, %v844_v24  ;;  %v920_v47 = vadd.f32 %v843_v0, %v643_v1  ;;  %v1089_v11 = vrot.slane %v969_v31, 2 }
 0x113   : > { %v2354_v60 = vadd.f32 %v6246_v26, %v2315_v37  ;;  %v921_v42 = vadd.f32 %v845_v56, %v644_v17  ;;  %v1088_v5 = vsel %vm1030_vm1, %v1086_v35, %v1087_v41  ;;  %v1202_v62 = vmul.f32 %v5597_v36, %v6411_v53  ;;  %v6480_v17 = vld [vmem:[#allocation2 + $0x138] sm:$0xff] }
 0x114   : > { %v1090_v10 = vsel %vm1030_vm1, %v1087_v41, %v1089_v11  ;;  %v1165_v50 = vadd.f32 %v1088_v5, %v920_v47  ;;  %v1280_v15 = vmul.f32 %v5604_v43, %v6407_v46  ;;  %v1281_v28 = vmul.f32 %v5604_v43, %v6411_v53 }
 0x115   : > { %v2375_v57 = vpack.c.bf16 %v2354_v60, %v2353_v39  ;;  %v1166_v45 = vadd.f32 %v1090_v10, %v921_v42  ;;  %v1282_v3 = vmul.f32 %v5604_v43, %v6419_v61  ;;  %v1524_v8 = vmul.f32 %v5611_v48, %v6407_v46 }
 0x116   : > { %v1233_v1 = vadd.f32 %v1201_v52, %v1165_v50  ;;  %v1398_v9 = vrot.slane %v1280_v15, 1  ;;  %v1399_v25 = vrot.slane %v1281_v28, 1  ;;  %v1525_v40 = vmul.f32 %v5611_v48, %v6411_v53 }
 0x117   : > { %5198 = vmatprep.mubr.bf16.mxu0 %v2375_v57  ;;  %v1234_v38 = vadd.f32 %v1202_v62, %v1166_v45  ;;  %v1401_v27 = vrot.slane %v1282_v3, 1  ;;  %v1526_v14 = vmul.f32 %v5611_v48, %v6419_v61  ;;  %v1642_v32 = vrot.slane %v1524_v8, 2 }
 0x118   : > { %v1400_v44 = vsel %vm785_vm0, %v1398_v9, %v1399_v25  ;;  %v1643_v54 = vrot.slane %v1525_v40, 2  ;;  %v1757_v33 = vmul.f32 %v5615_v49, %v6480_v17  ;;  %v1758_v59 = vmul.f32 %v5615_v49, %v6482_v51 }
 0x119   : > { %v1402_v58 = vsel %vm785_vm0, %v1399_v25, %v1401_v27  ;;  %v1477_v2 = vadd.f32 %v1400_v44, %v1233_v1  ;;  %v1645_v34 = vrot.slane %v1526_v14, 2  ;;  %v1836_v24 = vmul.f32 %v5626_v55, %v6480_v17 }
 0x11a   : > { %v1478_v31 = vadd.f32 %v1402_v58, %v1234_v38  ;;  %v1644_v35 = vsel %vm1030_vm1, %v1642_v32, %v1643_v54  ;;  %v1837_v37 = vmul.f32 %v5626_v55, %v6482_v51  ;;  %v1838_v0 = vmul.f32 %v5626_v55, %v6491_v63 }
 0x11b   : > { %v1646_v41 = vsel %vm1030_vm1, %v1643_v54, %v1645_v34  ;;  %v1721_v52 = vadd.f32 %v1644_v35, %v1477_v2  ;;  %v1954_v39 = vrot.slane %v1836_v24, 1  ;;  %v2080_v56 = vmul.f32 %v6134_v13, %v6480_v17 }
 0x11c   : > { %v1722_v47 = vadd.f32 %v1646_v41, %v1478_v31  ;;  %v1955_v11 = vrot.slane %v1837_v37, 1  ;;  %v1957_v60 = vrot.slane %v1838_v0, 1  ;;  %v2081_v42 = vmul.f32 %v6134_v13, %v6482_v51 }
 0x11d   : > { %v1789_v5 = vadd.f32 %v1757_v33, %v1721_v52  ;;  %v2082_v62 = vmul.f32 %v6134_v13, %v6491_v63  ;;  %v2198_v10 = vrot.slane %v2080_v56, 2  ;;  %v645_v50 = vmul.f32 %v5570_v18, %v6407_v46 }
 0x11e   : > { %v1790_v15 = vadd.f32 %v1758_v59, %v1722_v47  ;;  %v1956_v28 = vsel %vm785_vm0, %v1954_v39, %v1955_v11  ;;  %v1958_v57 = vsel %vm785_vm0, %v1955_v11, %v1957_v60  ;;  %v2199_v45 = vrot.slane %v2081_v42, 2 }
 0x11f   : > { %v2033_v3 = vadd.f32 %v1956_v28, %v1789_v5  ;;  %v2201_v8 = vrot.slane %v2082_v62, 2  ;;  %v646_v1 = vmul.f32 %v5570_v18, %v6411_v53  ;;  %v725_v9 = vmul.f32 %v5574_v19, %v6407_v46 }
 0x120   : > { %v2034_v25 = vadd.f32 %v1958_v57, %v1790_v15  ;;  %v2200_v40 = vsel %vm1030_vm1, %v2198_v10, %v2199_v45  ;;  %v726_v38 = vmul.f32 %v5574_v19, %v6411_v53  ;;  %v727_v27 = vmul.f32 %v5574_v19, %v6419_v61 }
 0x121   : > { %v2202_v14 = vsel %vm1030_vm1, %v2199_v45, %v2201_v8  ;;  %v2277_v32 = vadd.f32 %v2200_v40, %v2033_v3  ;;  %v846_v44 = vrot.slane %v725_v9, 1  ;;  %v970_v54 = vmul.f32 %v5578_v20, %v6407_v46  ;;  %v5277_v45 = vld [vmem:[%s8243_s10 + $0x28] sm:$0xff]   ;;  %v6551_v3 = vld [vmem:[#allocation2 + $0x150] sm:$0xff]  ;;  %v6555_v40 = vld [vmem:[#allocation2 + $0x158] sm:$0xff] }
 0x122   : > { %v2278_v33 = vadd.f32 %v2202_v14, %v2034_v25  ;;  %v847_v59 = vrot.slane %v726_v38, 1  ;;  %v849_v58 = vrot.slane %v727_v27, 1  ;;  %v971_v2 = vmul.f32 %v5578_v20, %v6411_v53  ;;  %5214 = vmatprep.subr.bf16.mxu1 %v5277_v45 }
 0x123   : > { %v2316_v34 = vmul.f32 %v6233_v29, %v2277_v32  ;;  %v972_v24 = vmul.f32 %v5578_v20, %v6419_v61  ;;  %v1091_v31 = vrot.slane %v970_v54, 2  ;;  %v1203_v35 = vmul.f32 %v5597_v36, %v6480_v17  ;;  %5215 = vmatpush3.bf16.msra.mxu1 %v5277_v45 }
 0x124   : > { %v2317_v37 = vmul.f32 %v6233_v29, %v2278_v33  ;;  %v848_v0 = vsel %vm785_vm0, %v846_v44, %v847_v59  ;;  %v850_v46 = vsel %vm785_vm0, %v847_v59, %v849_v58  ;;  %v1092_v41 = vrot.slane %v971_v2, 2  ;;  %v6565_v58 = vld [vmem:[#allocation2 + $0x160] sm:$0x3] }
 0x125   : > { %v2355_v52 = vadd.f32 %v6246_v26, %v2316_v34  ;;  %v922_v39 = vadd.f32 %v848_v0, %v645_v50  ;;  %v923_v53 = vadd.f32 %v850_v46, %v646_v1  ;;  %v1094_v56 = vrot.slane %v972_v24, 2 }
 0x126   : > { %v2356_v47 = vadd.f32 %v6246_v26, %v2317_v37  ;;  %v1093_v61 = vsel %vm1030_vm1, %v1091_v31, %v1092_v41  ;;  %v1204_v11 = vmul.f32 %v5597_v36, %v6482_v51  ;;  %v1283_v60 = vmul.f32 %v5604_v43, %v6480_v17 }
 0x127   : > { %v1095_v42 = vsel %vm1030_vm1, %v1092_v41, %v1094_v56  ;;  %v1167_v5 = vadd.f32 %v1093_v61, %v922_v39  ;;  %v1284_v62 = vmul.f32 %v5604_v43, %v6482_v51  ;;  %v1285_v10 = vmul.f32 %v5604_v43, %v6491_v63 }
 0x128   : > { %v2376_v50 = vpack.c.bf16 %v2356_v47, %v2355_v52  ;;  %v1168_v15 = vadd.f32 %v1095_v42, %v923_v53  ;;  %v1403_v28 = vrot.slane %v1283_v60, 1  ;;  %v1527_v57 = vmul.f32 %v5611_v48, %v6480_v17 }
 0x129   : > { %v1235_v8 = vadd.f32 %v1203_v35, %v1167_v5  ;;  %v1404_v1 = vrot.slane %v1284_v62, 1  ;;  %v1406_v9 = vrot.slane %v1285_v10, 1  ;;  %v1528_v25 = vmul.f32 %v5611_v48, %v6482_v51  ;;  %v5278_v35 = vld [vmem:[%s8243_s10 + $0x20] sm:$0xff]  }
 0x12a   : > { %5199 = vmatmul.mubr.bf16.gmra.mxu0 %v2376_v50  ;;  %v1236_v38 = vadd.f32 %v1204_v11, %v1168_v15  ;;  %v1529_v27 = vmul.f32 %v5611_v48, %v6491_v63  ;;  %v1647_v14 = vrot.slane %v1527_v57, 2  ;;  %v1759_v32 = vmul.f32 %v5615_v49, %v6551_v3  ;;  %5216 = vmatprep.subr.bf16.mxu1 %v5278_v35 }
 0x12b   : > { %v1405_v44 = vsel %vm785_vm0, %v1403_v28, %v1404_v1  ;;  %v1407_v54 = vsel %vm785_vm0, %v1404_v1, %v1406_v9  ;;  %v1648_v33 = vrot.slane %v1528_v25, 2  ;;  %v1760_v59 = vmul.f32 %v5615_v49, %v6555_v40  ;;  %5217 = vmatpush3.bf16.msra.mxu1 %v5278_v35 }
 0x12c   : > { %v1479_v2 = vadd.f32 %v1405_v44, %v1235_v8  ;;  %v1480_v34 = vadd.f32 %v1407_v54, %v1236_v38  ;;  %v1650_v24 = vrot.slane %v1529_v27, 2  ;;  %v1839_v31 = vmul.f32 %v5626_v55, %v6551_v3 }
 0x12d   : > { %v1649_v37 = vsel %vm1030_vm1, %v1647_v14, %v1648_v33  ;;  %v1840_v0 = vmul.f32 %v5626_v55, %v6555_v40  ;;  %v1841_v46 = vmul.f32 %v5626_v55, %v6565_v58  ;;  %v2083_v41 = vmul.f32 %v6134_v13, %v6551_v3 }
 0x12e   : > { %v1651_v52 = vsel %vm1030_vm1, %v1648_v33, %v1650_v24  ;;  %v1723_v39 = vadd.f32 %v1649_v37, %v1479_v2  ;;  %v1959_v53 = vrot.slane %v1839_v31, 1  ;;  %v2084_v56 = vmul.f32 %v6134_v13, %v6555_v40 }
 0x12f   : > { %v1724_v47 = vadd.f32 %v1651_v52, %v1480_v34  ;;  %v1960_v61 = vrot.slane %v1840_v0, 1  ;;  %v1962_v11 = vrot.slane %v1841_v46, 1  ;;  %v2085_v60 = vmul.f32 %v6134_v13, %v6565_v58 }
 0x130   : > { %v1791_v42 = vadd.f32 %v1759_v32, %v1723_v39  ;;  %v2203_v5 = vrot.slane %v2083_v41, 2  ;;  %v2204_v62 = vrot.slane %v2084_v56, 2  ;;  %v647_v10 = vmul.f32 %v5570_v18, %v6480_v17 }
 0x131   : > { %v1792_v50 = vadd.f32 %v1760_v59, %v1724_v47  ;;  %v1961_v15 = vsel %vm785_vm0, %v1959_v53, %v1960_v61  ;;  %v1963_v28 = vsel %vm785_vm0, %v1960_v61, %v1962_v11  ;;  %v2206_v57 = vrot.slane %v2085_v60, 2 }
 0x132   : > { %v2035_v45 = vadd.f32 %v1961_v15, %v1791_v42  ;;  %v2205_v8 = vsel %vm1030_vm1, %v2203_v5, %v2204_v62  ;;  %v648_v1 = vmul.f32 %v5570_v18, %v6482_v51  ;;  %v728_v13 = vmul.f32 %v5574_v19, %v6480_v17 }
 0x133   : > { %v2036_v9 = vadd.f32 %v1963_v28, %v1792_v50  ;;  %v2207_v25 = vsel %vm1030_vm1, %v2204_v62, %v2206_v57  ;;  %v729_v38 = vmul.f32 %v5574_v19, %v6482_v51  ;;  %v730_v27 = vmul.f32 %v5574_v19, %v6491_v63  ;;  %v6626_v28 = vld [vmem:[#allocation2 + $0x168] sm:$0xff] }
 0x134   : > { %v2279_v14 = vadd.f32 %v2205_v8, %v2035_v45  ;;  %v851_v32 = vrot.slane %v728_v13, 1  ;;  %v973_v44 = vmul.f32 %v5578_v20, %v6480_v17  ;;  %v974_v54 = vmul.f32 %v5578_v20, %v6482_v51  ;;  %v6628_v13 = vld [vmem:[#allocation2 + $0x170] sm:$0xff] }
 0x135   : > { %v2280_v33 = vadd.f32 %v2207_v25, %v2036_v9  ;;  %v852_v59 = vrot.slane %v729_v38, 1  ;;  %v854_v2 = vrot.slane %v730_v27, 1  ;;  %v975_v34 = vmul.f32 %v5578_v20, %v6491_v63 }
 0x136   : > { %v2318_v24 = vmul.f32 %v6233_v29, %v2279_v14  ;;  %v1096_v31 = vrot.slane %v973_v44, 2  ;;  %v1097_v35 = vrot.slane %v974_v54, 2  ;;  %v1205_v37 = vmul.f32 %v5597_v36, %v6551_v3 }
 0x137   : > { %v2319_v0 = vmul.f32 %v6233_v29, %v2280_v33  ;;  %v853_v17 = vsel %vm785_vm0, %v851_v32, %v852_v59  ;;  %v855_v46 = vsel %vm785_vm0, %v852_v59, %v854_v2  ;;  %v1099_v51 = vrot.slane %v975_v34, 2  ;;  %v6640_v33 = vld [vmem:[#allocation2 + $0x178] sm:$0x3] }
 0x138   : > { %v2357_v41 = vadd.f32 %v6246_v26, %v2318_v24  ;;  %v924_v52 = vadd.f32 %v853_v17, %v647_v10  ;;  %v925_v39 = vadd.f32 %v855_v46, %v648_v1  ;;  %v1098_v63 = vsel %vm1030_vm1, %v1096_v31, %v1097_v35 }
 0x139   : > { %v2358_v53 = vadd.f32 %v6246_v26, %v2319_v0  ;;  %v1100_v56 = vsel %vm1030_vm1, %v1097_v35, %v1099_v51  ;;  %v1206_v47 = vmul.f32 %v5597_v36, %v6555_v40  ;;  %v1286_v61 = vmul.f32 %v5604_v43, %v6551_v3  ;;  %v6650_v0 = vld [vmem:[%s8234_s1 + $0x8] ss:$0 sm:$0xff] }
 0x13a   : > { %v1169_v11 = vadd.f32 %v1098_v63, %v924_v52  ;;  %v1170_v60 = vadd.f32 %v1100_v56, %v925_v39  ;;  %v1287_v42 = vmul.f32 %v5604_v43, %v6555_v40  ;;  %v1288_v5 = vmul.f32 %v5604_v43, %v6565_v58 }
 0x13b   : > { %v2377_v62 = vpack.c.bf16 %v2358_v53, %v2357_v41  ;;  %v1408_v10 = vrot.slane %v1286_v61, 1  ;;  %v1530_v50 = vmul.f32 %v5611_v48, %v6551_v3  ;;  %v1531_v15 = vmul.f32 %v5611_v48, %v6555_v40 }
 0x13c   : > { %v1237_v57 = vadd.f32 %v1205_v37, %v1169_v11  ;;  %v1238_v45 = vadd.f32 %v1206_v47, %v1170_v60  ;;  %v1409_v8 = vrot.slane %v1287_v42, 1  ;;  %v1411_v1 = vrot.slane %v1288_v5, 1 }
 0x13d   : > { %5202 = vmatprep.mubr.bf16.mxu0 %v2377_v62  ;;  %v1532_v9 = vmul.f32 %v5611_v48, %v6565_v58  ;;  %v1652_v25 = vrot.slane %v1530_v50, 2  ;;  %v1653_v38 = vrot.slane %v1531_v15, 2  ;;  %v1761_v27 = vmul.f32 %v5615_v49, %v6626_v28 }
 0x13e   : > { %v1410_v14 = vsel %vm785_vm0, %v1408_v10, %v1409_v8  ;;  %v1412_v32 = vsel %vm785_vm0, %v1409_v8, %v1411_v1  ;;  %v1762_v44 = vmul.f32 %v5615_v49, %v6628_v13  ;;  %v1842_v54 = vmul.f32 %v5626_v55, %v6626_v28 }
 0x13f   : > { %v1481_v59 = vadd.f32 %v1410_v14, %v1237_v57  ;;  %v1482_v2 = vadd.f32 %v1412_v32, %v1238_v45  ;;  %v1654_v34 = vsel %vm1030_vm1, %v1652_v25, %v1653_v38  ;;  %v1655_v24 = vrot.slane %v1532_v9, 2 }
 0x140   : > { %v1843_v31 = vmul.f32 %v5626_v55, %v6628_v13  ;;  %v1844_v35 = vmul.f32 %v5626_v55, %v6640_v33  ;;  %v1964_v37 = vrot.slane %v1842_v54, 1  ;;  %v2086_v17 = vmul.f32 %v6650_v0, %v6626_v28 }
 0x141   : > { %v1656_v46 = vsel %vm1030_vm1, %v1653_v38, %v1655_v24  ;;  %v1725_v51 = vadd.f32 %v1654_v34, %v1481_v59  ;;  %v2087_v41 = vmul.f32 %v6650_v0, %v6628_v13  ;;  %v2088_v52 = vmul.f32 %v6650_v0, %v6640_v33 }
 0x142   : > { %v1726_v39 = vadd.f32 %v1656_v46, %v1482_v2  ;;  %v1965_v63 = vrot.slane %v1843_v31, 1  ;;  %v1967_v53 = vrot.slane %v1844_v35, 1  ;;  %v2208_v56 = vrot.slane %v2086_v17, 2 }
 0x143   : > { %v1793_v47 = vadd.f32 %v1761_v27, %v1725_v51  ;;  %v2209_v61 = vrot.slane %v2087_v41, 2  ;;  %v2211_v11 = vrot.slane %v2088_v52, 2  ;;  %v649_v60 = vmul.f32 %v5570_v18, %v6551_v3 }
 0x144   : > { %v1794_v42 = vadd.f32 %v1762_v44, %v1726_v39  ;;  %v1966_v5 = vsel %vm785_vm0, %v1964_v37, %v1965_v63  ;;  %v1968_v62 = vsel %vm785_vm0, %v1965_v63, %v1967_v53  ;;  %v650_v10 = vmul.f32 %v5570_v18, %v6555_v40 }
 0x145   : > { %v2037_v50 = vadd.f32 %v1966_v5, %v1793_v47  ;;  %v2210_v15 = vsel %vm1030_vm1, %v2208_v56, %v2209_v61  ;;  %v2212_v57 = vsel %vm1030_vm1, %v2209_v61, %v2211_v11  ;;  %v731_v45 = vmul.f32 %v5574_v19, %v6551_v3  ;;  %v5279_v5 = vld [vmem:[%s8243_s10 + $0x18] sm:$0xff]  }
 0x146   : > { %v2038_v8 = vadd.f32 %v1968_v62, %v1794_v42  ;;  %v732_v1 = vmul.f32 %v5574_v19, %v6555_v40  ;;  %v733_v9 = vmul.f32 %v5574_v19, %v6565_v58  ;;  %v976_v25 = vmul.f32 %v5578_v20, %v6551_v3  ;;  %v6704_v62 = vld [vmem:[#allocation2 + $0x180] sm:$0xff]  ;;  %5218 = vmatprep.subr.bf16.mxu1 %v5279_v5 }
 0x147   : > { %v2281_v38 = vadd.f32 %v2210_v15, %v2037_v50  ;;  %v856_v27 = vrot.slane %v731_v45, 1  ;;  %v977_v14 = vmul.f32 %v5578_v20, %v6555_v40  ;;  %v978_v32 = vmul.f32 %v5578_v20, %v6565_v58  ;;  %v6708_v45 = vpop.f32.mrf.mxu0  ;;  %5219 = vmatpush3.bf16.msra.mxu1 %v5279_v5 }
 0x148   : > { %v2282_v44 = vadd.f32 %v2212_v57, %v2038_v8  ;;  %v857_v54 = vrot.slane %v732_v1, 1  ;;  %v859_v59 = vrot.slane %v733_v9, 1  ;;  %v1101_v2 = vrot.slane %v976_v25, 2  ;;  %v6710_v8 = vld [vmem:[#allocation2 + $0x188] sm:$0xff] }
 0x149   : > { %v2320_v34 = vmul.f32 %v6233_v29, %v2281_v38  ;;  %v1102_v24 = vrot.slane %v977_v14, 2  ;;  %v1104_v31 = vrot.slane %v978_v32, 2  ;;  %v1207_v35 = vmul.f32 %v5597_v36, %v6626_v28 }
 0x14a   : > { %v2321_v3 = vmul.f32 %v6233_v29, %v2282_v44  ;;  %v858_v37 = vsel %vm785_vm0, %v856_v27, %v857_v54  ;;  %v860_v40 = vsel %vm785_vm0, %v857_v54, %v859_v59  ;;  %v1208_v58 = vmul.f32 %v5597_v36, %v6628_v13  ;;  %v6718_v54 = vld [vmem:[#allocation2 + $0x190] sm:$0x3] }
 0x14b   : > { %v2359_v17 = vadd.f32 %v6246_v26, %v2320_v34  ;;  %v926_v46 = vadd.f32 %v858_v37, %v649_v60  ;;  %v927_v51 = vadd.f32 %v860_v40, %v650_v10  ;;  %v1103_v41 = vsel %vm1030_vm1, %v1101_v2, %v1102_v24 }
 0x14c   : > { %v2360_v52 = vadd.f32 %v6246_v26, %v2321_v3  ;;  %v1105_v39 = vsel %vm1030_vm1, %v1102_v24, %v1104_v31  ;;  %v1289_v29 = vmul.f32 %v5604_v43, %v6626_v28  ;;  %v1290_v63 = vmul.f32 %v5604_v43, %v6628_v13  ;;  %v5280_v31 = vld [vmem:[%s8243_s10 + $0x10] sm:$0xff]  }
 0x14d   : > { %v1171_v53 = vadd.f32 %v1103_v41, %v926_v46  ;;  %v1172_v56 = vadd.f32 %v1105_v39, %v927_v51  ;;  %v1291_v47 = vmul.f32 %v5604_v43, %v6640_v33  ;;  %v1533_v61 = vmul.f32 %v5611_v48, %v6626_v28  ;;  %5220 = vmatprep.subr.bf16.mxu1 %v5280_v31 }
 0x14e   : > { %v2378_v11 = vpack.c.bf16 %v2360_v52, %v2359_v17  ;;  %v1413_v60 = vrot.slane %v1289_v29, 1  ;;  %v1414_v42 = vrot.slane %v1290_v63, 1  ;;  %v1534_v26 = vmul.f32 %v5611_v48, %v6628_v13  ;;  %5221 = vmatpush3.bf16.msra.mxu1 %v5280_v31 }
 0x14f   : > { %v1239_v10 = vadd.f32 %v1207_v35, %v1171_v53  ;;  %v1240_v50 = vadd.f32 %v1208_v58, %v1172_v56  ;;  %v1416_v15 = vrot.slane %v1291_v47, 1  ;;  %v1535_v57 = vmul.f32 %v5611_v48, %v6640_v33  ;;  %v6733_v58 = vpop.f32.mrf.mxu0 }
 0x150   : > { %5203 = vmatmul.mubr.bf16.gmra.mxu0 %v2378_v11  ;;  %v1415_v1 = vsel %vm785_vm0, %v1413_v60, %v1414_v42  ;;  %v1657_v9 = vrot.slane %v1533_v61, 2  ;;  %v1658_v25 = vrot.slane %v1534_v26, 2  ;;  %v1763_v38 = vmul.f32 %v5615_v49, %v6704_v62 }
 0x151   : > { %v1417_v27 = vsel %vm785_vm0, %v1414_v42, %v1416_v15  ;;  %v1483_v14 = vadd.f32 %v1415_v1, %v1239_v10  ;;  %v1660_v32 = vrot.slane %v1535_v57, 2  ;;  %v1764_v44 = vmul.f32 %v5615_v49, %v6710_v8  ;;  %v6745_v5 = vpop.f32.mrf.mxu0 }
 0x152   : > { %v1484_v59 = vadd.f32 %v1417_v27, %v1240_v50  ;;  %v1659_v2 = vsel %vm1030_vm1, %v1657_v9, %v1658_v25  ;;  %v1845_v34 = vmul.f32 %v5626_v55, %v6704_v62  ;;  %v1846_v24 = vmul.f32 %v5626_v55, %v6710_v8 }
 0x153   : > { %v1661_v35 = vsel %vm1030_vm1, %v1658_v25, %v1660_v32  ;;  %v1727_v3 = vadd.f32 %v1659_v2, %v1483_v14  ;;  %v1847_v37 = vmul.f32 %v5626_v55, %v6718_v54  ;;  %v2089_v40 = vmul.f32 %v6650_v0, %v6704_v62 }
 0x154   : > { %v1728_v17 = vadd.f32 %v1661_v35, %v1484_v59  ;;  %v1969_v46 = vrot.slane %v1845_v34, 1  ;;  %v1970_v51 = vrot.slane %v1846_v24, 1  ;;  %v2090_v41 = vmul.f32 %v6650_v0, %v6710_v8  ;;  %v6767_v24 = vpop.f32.mrf.mxu0 }
 0x155   : > { %v1795_v52 = vadd.f32 %v1763_v38, %v1727_v3  ;;  %v1972_v39 = vrot.slane %v1847_v37, 1  ;;  %v2091_v29 = vmul.f32 %v6650_v0, %v6718_v54  ;;  %v2213_v63 = vrot.slane %v2089_v40, 2  ;;  %v6776_v3 = vld [vmem:[%s8236_s3] ss:$0 sm:$0xff] }
 0x156   : > { %v1796_v53 = vadd.f32 %v1764_v44, %v1728_v17  ;;  %v1971_v56 = vsel %vm785_vm0, %v1969_v46, %v1970_v51  ;;  %v2214_v47 = vrot.slane %v2090_v41, 2  ;;  %v651_v61 = vmul.f32 %v5570_v18, %v6626_v28  ;;  %v6762_v44 = vld [vmem:[%s8235_s2] ss:$0 sm:$0xff] }
 0x157   : > { %v1973_v11 = vsel %vm785_vm0, %v1970_v51, %v1972_v39  ;;  %v2039_v60 = vadd.f32 %v1971_v56, %v1795_v52  ;;  %v2216_v42 = vrot.slane %v2091_v29, 2  ;;  %v652_v26 = vmul.f32 %v5570_v18, %v6628_v13 }
 0x158   : > { %v2040_v10 = vadd.f32 %v1973_v11, %v1796_v53  ;;  %v2215_v50 = vsel %vm1030_vm1, %v2213_v63, %v2214_v47  ;;  %v734_v15 = vmul.f32 %v5574_v19, %v6626_v28  ;;  %v735_v57 = vmul.f32 %v5574_v19, %v6628_v13  ;;  %v5184_v53 = vpop.f32.mrf.mxu0 }
 0x159   : > { %v2217_v1 = vsel %vm1030_vm1, %v2214_v47, %v2216_v42  ;;  %v2283_v9 = vadd.f32 %v2215_v50, %v2039_v60  ;;  %v736_v25 = vmul.f32 %v5574_v19, %v6640_v33  ;;  %v979_v18 = vmul.f32 %v5578_v20, %v6626_v28  ;;  %v614_v60 = vld [vmem:[#allocation2 + $0x1a8] sm:$0x3] }
 0x15a   : > { %v2284_v38 = vadd.f32 %v2217_v1, %v2040_v10  ;;  %v861_v27 = vrot.slane %v734_v15, 1  ;;  %v862_v14 = vrot.slane %v735_v57, 1  ;;  %v980_v32 = vmul.f32 %v5578_v20, %v6628_v13 }
 0x15b   : > { %v2322_v59 = vmul.f32 %v6762_v44, %v2283_v9  ;;  %v864_v2 = vrot.slane %v736_v25, 1  ;;  %v981_v19 = vmul.f32 %v5578_v20, %v6640_v33  ;;  %v1106_v34 = vrot.slane %v979_v18, 2  ;;  %v6798_v25 = vld [vmem:[#allocation2] sm:$0xff] }
 0x15c   : > { %v2323_v28 = vmul.f32 %v6762_v44, %v2284_v38  ;;  %v863_v31 = vsel %vm785_vm0, %v861_v27, %v862_v14  ;;  %v1107_v35 = vrot.slane %v980_v32, 2  ;;  %v1209_v13 = vmul.f32 %v5597_v36, %v6704_v62  ;;  %v2495_v38 = vpop.f32.mrf.mxu0 }
 0x15d   : > { %v2361_v37 = vadd.f32 %v6776_v3, %v2322_v59  ;;  %v865_v20 = vsel %vm785_vm0, %v862_v14, %v864_v2  ;;  %v928_v33 = vadd.f32 %v863_v31, %v651_v61  ;;  %v1109_v40 = vrot.slane %v981_v19, 2 }
 0x15e   : > { %v2362_v17 = vadd.f32 %v6776_v3, %v2323_v28  ;;  %v929_v46 = vadd.f32 %v865_v20, %v652_v26  ;;  %v1108_v51 = vsel %vm1030_vm1, %v1106_v34, %v1107_v35  ;;  %v1210_v41 = vmul.f32 %v5597_v36, %v6710_v8  ;;  %v5185_v20 = vpop.f32.mrf.mxu0 }
 0x15f   : > { %v1110_v52 = vsel %vm1030_vm1, %v1107_v35, %v1109_v40  ;;  %v1173_v39 = vadd.f32 %v1108_v51, %v928_v33  ;;  %v1292_v29 = vmul.f32 %v5604_v43, %v6704_v62  ;;  %v1293_v63 = vmul.f32 %v5604_v43, %v6710_v8 }
 0x160   : > { %v2379_v56 = vpack.c.bf16 %v2362_v17, %v2361_v37  ;;  %v1174_v47 = vadd.f32 %v1110_v52, %v929_v46  ;;  %v1294_v61 = vmul.f32 %v5604_v43, %v6718_v54  ;;  %v1536_v11 = vmul.f32 %v5611_v48, %v6704_v62 }
 0x161   : > { %v1241_v36 = vadd.f32 %v1209_v13, %v1173_v39  ;;  %v1418_v42 = vrot.slane %v1292_v29, 1  ;;  %v1419_v26 = vrot.slane %v1293_v63, 1  ;;  %v1537_v10 = vmul.f32 %v5611_v48, %v6710_v8 }
 0x162   : > { %5206 = vmatprep.mubr.bf16.mxu0 %v2379_v56  ;;  %v1242_v50 = vadd.f32 %v1210_v41, %v1174_v47  ;;  %v1421_v15 = vrot.slane %v1294_v61, 1  ;;  %v1538_v57 = vmul.f32 %v5611_v48, %v6718_v54  ;;  %v1662_v1 = vrot.slane %v1536_v11, 2  ;;  %v6809_v48 = vld [vmem:[%s8238_s5] ss:$0 sm:$0xff]  ;;  %v2498_v61 = vpop.f32.mrf.mxu0 }
 0x163   : > { %v1420_v9 = vsel %vm785_vm0, %v1418_v42, %v1419_v26  ;;  %v1663_v43 = vrot.slane %v1537_v10, 2  ;;  %v1765_v62 = vmul.f32 %v6798_v25, %v5615_v49  ;;  %v1848_v18 = vmul.f32 %v6798_v25, %v5626_v55 }
 0x164   : > { %v1422_v8 = vsel %vm785_vm0, %v1419_v26, %v1421_v15  ;;  %v1485_v27 = vadd.f32 %v1420_v9, %v1241_v36  ;;  %v1665_v14 = vrot.slane %v1538_v57, 2  ;;  %v1850_v32 = vmul.f32 %v5626_v55, %v614_v60  ;;  %v6819_v55 = vld [vmem:[%s8239_s6] ss:$0 sm:$0xff] }
 0x165   : > { %v1486_v54 = vadd.f32 %v1422_v8, %v1242_v50  ;;  %v1664_v59 = vsel %vm1030_vm1, %v1662_v1, %v1663_v43  ;;  %v1974_v2 = vrot.slane %v1848_v18, 1  ;;  %v2092_v49 = vmul.f32 %v6798_v25, %v6650_v0 }
 0x166   : > { %v1666_v19 = vsel %vm1030_vm1, %v1663_v43, %v1665_v14  ;;  %v1729_v34 = vadd.f32 %v1664_v59, %v1485_v27  ;;  %v1977_v28 = vrot.slane %v1850_v32, 1  ;;  %v2094_v31 = vmul.f32 %v6650_v0, %v614_v60  ;;  %v2857_v59 = vld [vmem:[%s8240_s7] sm:$0xff] }
 0x167   : > { %v1730_v35 = vadd.f32 %v1666_v19, %v1486_v54  ;;  %v2218_v13 = vrot.slane %v2092_v49, 2  ;;  %v2615_v37 = vmul.f32 %v6708_v45, %v6809_v48  ;;  %v2613_v46 = vmul.f32 %v6809_v48, %v6733_v58  ;;  %v2805_v54 = vld [vmem:[#allocation3 + $0x10] sm:$0x3] }
 0x168   : > { %v1797_v33 = vadd.f32 %v1765_v62, %v1729_v34  ;;  %v1978_v40 = vsel %vm785_vm0, %v1974_v2, %v1977_v28  ;;  %v2221_v17 = vrot.slane %v2094_v31, 2  ;;  %v2616_v41 = vmul.f32 %v6745_v5, %v6809_v48 }
 0x169   : > { %v1798_v51 = vadd.f32 %v1765_v62, %v1730_v35  ;;  %v2654_v0 = vadd.f32 %v6819_v55, %v2615_v37  ;;  %v2652_v29 = vadd.f32 %v6819_v55, %v2613_v46  ;;  %v2614_v45 = vmul.f32 %v6809_v48, %v6767_v24 }
 0x16a   : > { %v2041_v52 = vadd.f32 %v1974_v2, %v1797_v33  ;;  %v2222_v39 = vsel %vm1030_vm1, %v2218_v13, %v2221_v17  ;;  %v2655_v47 = vadd.f32 %v6819_v55, %v2616_v41  ;;  %v2619_v58 = vmul.f32 %v5184_v53, %v6809_v48 }
 0x16b   : > { %v2042_v63 = vadd.f32 %v1978_v40, %v1798_v51  ;;  %v2686_v56 = vmax.f32 %v2654_v0, 0.0  ;;  %v2684_v60 = vmax.f32 %v2652_v29, 0.0  ;;  %v2653_v36 = vadd.f32 %v6819_v55, %v2614_v45 }
 0x16c   : > { %v2285_v11 = vadd.f32 %v2218_v13, %v2041_v52  ;;  %v2617_v5 = vmul.f32 %v6809_v48, %v2495_v38  ;;  %v2687_v26 = vmax.f32 %v2655_v47, 0.0  ;;  %v2658_v10 = vadd.f32 %v6819_v55, %v2619_v58 }
 0x16d   : > { %v2286_v42 = vadd.f32 %v2222_v39, %v2042_v63  ;;  %2773 = vst [vmem:[#allocation3 + $0x31] sm:$0xff] %v2686_v56  ;;  %v2620_v24 = vmul.f32 %v5185_v20, %v6809_v48  ;;  %2771 = vst [vmem:[#allocation3 + $0x19] sm:$0xff] %v2684_v60  ;;  %v2685_v15 = vmax.f32 %v2653_v36, 0.0  ;;  %v2618_v57 = vmul.f32 %v6809_v48, %v2498_v61 }
 0x16e   : > { %v2324_v50 = vmul.f32 %v6762_v44, %v2285_v11  ;;  %v2656_v53 = vadd.f32 %v6819_v55, %v2617_v5  ;;  %2774 = vst [vmem:[#allocation3 + $0x39] sm:$0xff] %v2687_v26  ;;  %v2690_v9 = vmax.f32 %v2658_v10, 0.0  ;;  %v6857_v2 = vrot.slane %v2857_v59, %v619_v6 }
 0x16f   : > { %v2325_v1 = vmul.f32 %v6762_v44, %v2286_v42  ;;  %v2659_v43 = vadd.f32 %v6819_v55, %v2620_v24  ;;  %2772 = vst [vmem:[#allocation3 + $0x21] sm:$0xff] %v2685_v15  ;;  %v2657_v38 = vadd.f32 %v6819_v55, %v2618_v57  ;;  %v5281_v44 = vld [vmem:[%s8243_s10 + $0x8] sm:$0xff]   ;;  %v6861_v49 = vrot.slane %v2857_v59, %v687_v7 }
 0x170   : > { %v2363_v62 = vadd.f32 %v6776_v3, %v2324_v50  ;;  %v2688_v18 = vmax.f32 %v2656_v53, 0.0  ;;  %2777 = vst [vmem:[#allocation3 + $0x61] sm:$0xff] %v2690_v9  ;;  %5222 = vmatprep.subr.bf16.mxu1 %v5281_v44  ;;  %v6865_v19 = vrot.slane %v2857_v59, %v932_v12  ;;  %v6871_v28 = vrot.slane %v2857_v59, %v1177_v16  ;;  %v5282_v12 = vld [vmem:[%s8243_s10] sm:$0xff]  }
 0x171   : > { %v2364_v8 = vadd.f32 %v6776_v3, %v2325_v1  ;;  %v2691_v27 = vmax.f32 %v2659_v43, 0.0  ;;  %v2689_v14 = vmax.f32 %v2657_v38, 0.0  ;;  %5223 = vmatpush3.bf16.msra.mxu1 %v5281_v44  ;;  %v6875_v31 = vrot.slane %v2857_v59, %v1245_v21 }
 0x172   : > { %2775 = vst [vmem:[#allocation3 + $0x49] sm:$0xff] %v2688_v18  ;;  %v6879_v6 = vrot.slane %v2857_v59, %v1489_v22  ;;  %v6883_v7 = vrot.slane %v2857_v59, %v1733_v23  ;;  %v2931_v16 = vmul.f32 %v6798_v25, %v6861_v49  ;;  %v2933_v21 = vmul.f32 %v6861_v49, %v2805_v54 }
 0x173   : > { %v2380_v32 = vpack.c.bf16 %v2364_v8, %v2363_v62  ;;  %2778 = vst [vmem:[#allocation3 + $0x69] sm:$0xff] %v2691_v27  ;;  %2776 = vst [vmem:[#allocation3 + $0x51] sm:$0xff] %v2689_v14  ;;  %v6899_v22 = vrot.slane %v2857_v59, %v1801_v30  ;;  %v2863_v37 = vmul.f32 %v6798_v25, %v6857_v2  ;;  %5224 = vmatprep.subr.bf16.mxu1 %v5282_v12 }
 0x174   : > { %v6867_v34 = vld [vmem:[#allocation3 + $0x18] sm:$0xff]  ;;  %v3175_v20 = vmul.f32 %v6798_v25, %v6865_v19  ;;  %v3177_v33 = vmul.f32 %v6865_v19, %v2805_v54  ;;  %v3027_v46 = vrot.slane %v2931_v16, 1  ;;  %v3030_v4 = vrot.slane %v2933_v21, 1  ;;  %v6930_v57 = vld [vmem:[#allocation3 + $0x30] sm:$0xff] }
 0x175   : > { %5207 = vmatmul.mubr.bf16.gmra.mxu0 %v2380_v32  ;;  %v3419_v30 = vmul.f32 %v6871_v28, %v6867_v34  ;;  %5225 = vmatpush3.bf16.msra.mxu1 %v5282_v12  ;;  %v3487_v36 = vmul.f32 %v6875_v31, %v6867_v34  ;;  %v6933_v27 = vld [vmem:[#allocation3 + $0x38] sm:$0xff]  ;;  %v3731_v14 = vmul.f32 %v6879_v6, %v6867_v34  ;;  %v6939_v44 = vld [vmem:[#allocation3 + $0x40] sm:$0x3] }
 0x176   : > { %v6853_v3 = vld [vmem:[#allocation3 + $0x28] sm:$0x3]  ;;  %v6888_v35 = vld [vmem:[#allocation3 + $0x20] sm:$0xff]  ;;  %v3271_v41 = vrot.slane %v3175_v20, 2  ;;  %v3274_v25 = vrot.slane %v3177_v33, 2  ;;  %v3031_v45 = vsel %vm785_vm0, %v3027_v46, %v3030_v4  ;;  %v3139_v56 = vadd.f32 %v3027_v46, %v2863_v37 }
 0x177   : > { %v6895_v13 = vmul.f32 %v6861_v49, %v6853_v3  ;;  %v6908_v40 = vmul.f32 %v6865_v19, %v6853_v3  ;;  %v3420_v52 = vmul.f32 %v6871_v28, %v6888_v35  ;;  %v3140_v47 = vadd.f32 %v3031_v45, %v2863_v37  ;;  %v6944_v54 = vld [vmem:[%s8240_s7 + $0x8] ss:$0 sm:$0xff] }
 0x178   : > { %v3275_v58 = vsel %vm1030_vm1, %v3271_v41, %v3274_v25  ;;  %v3383_v42 = vadd.f32 %v3271_v41, %v3139_v56  ;;  %v3488_v10 = vmul.f32 %v6875_v31, %v6888_v35  ;;  %v3489_v24 = vmul.f32 %v6875_v31, %v6853_v3 }
 0x179   : > { %v3035_v0 = vrot.slane %v6895_v13, 1  ;;  %v3384_v26 = vadd.f32 %v3275_v58, %v3140_v47  ;;  %v3583_v1 = vrot.slane %v3487_v36, 1  ;;  %v3732_v32 = vmul.f32 %v6879_v6, %v6888_v35 }
 0x17a   : > { %v5188_v23 = vpop.f32.mrf.mxu0  ;;  %v3451_v9 = vadd.f32 %v3419_v30, %v3383_v42  ;;  %v3584_v62 = vrot.slane %v3488_v10, 1  ;;  %v3586_v18 = vrot.slane %v3489_v24, 1  ;;  %v3733_v16 = vmul.f32 %v6879_v6, %v6853_v3 }
 0x17b   : > { %v2623_v17 = vmul.f32 %v5188_v23, %v6809_v48  ;;  %v3452_v43 = vadd.f32 %v3420_v52, %v3384_v26  ;;  %v3975_v21 = vmul.f32 %v6883_v7, %v6930_v57  ;;  %v3827_v33 = vrot.slane %v3731_v14, 2 }
 0x17c   : > { %v2511_v51 = vpop.f32.mrf.mxu0  ;;  %v3585_v59 = vsel %vm785_vm0, %v3583_v1, %v3584_v62  ;;  %v3587_v12 = vsel %vm785_vm0, %v3584_v62, %v3586_v18  ;;  %v3830_v46 = vrot.slane %v3733_v16, 2  ;;  %v3976_v4 = vmul.f32 %v6883_v7, %v6933_v27  ;;  %v6988_v62 = vld [vmem:[%s8241_s8] ss:$0 sm:$0xff] }
 0x17d   : > { %v2662_v39 = vadd.f32 %v6819_v55, %v2623_v17  ;;  %v2621_v29 = vmul.f32 %v6809_v48, %v2511_v51  ;;  %v3695_v37 = vadd.f32 %v3585_v59, %v3451_v9  ;;  %v3696_v20 = vadd.f32 %v3587_v12, %v3452_v43 }
 0x17e   : > { %v5189_v63 = vpop.f32.mrf.mxu0  ;;  %v3828_v17 = vrot.slane %v3732_v32, 2  ;;  %v4043_v30 = vmul.f32 %v6899_v22, %v6930_v57  ;;  %v4044_v3 = vmul.f32 %v6899_v22, %v6933_v27  ;;  %v4045_v51 = vmul.f32 %v6899_v22, %v6939_v44 }
 0x17f   : > { %v2694_v61 = vmax.f32 %v2662_v39, 0.0  ;;  %v2660_v11 = vadd.f32 %v6819_v55, %v2621_v29  ;;  %v2624_v60 = vmul.f32 %v5189_v63, %v6809_v48  ;;  %v4287_v41 = vmul.f32 %v6944_v54, %v6930_v57 }
 0x180   : > { %v2514_v5 = vpop.f32.mrf.mxu0  ;;  %v4288_v25 = vmul.f32 %v6944_v54, %v6933_v27  ;;  %v3829_v52 = vsel %vm1030_vm1, %v3827_v33, %v3828_v17  ;;  %v3831_v39 = vsel %vm1030_vm1, %v3828_v17, %v3830_v46  ;;  %v4139_v29 = vrot.slane %v4043_v30, 1 }
 0x181   : > { %2781 = vst [vmem:[#allocation3 + $0x91] sm:$0xff] %v2694_v61  ;;  %v2692_v50 = vmax.f32 %v2660_v11, 0.0  ;;  %v2663_v15 = vadd.f32 %v6819_v55, %v2624_v60  ;;  %v2622_v53 = vmul.f32 %v6809_v48, %v2514_v5  ;;  %v4289_v45 = vmul.f32 %v6944_v54, %v6939_v44 }
 0x182   : > { %v3939_v63 = vadd.f32 %v3829_v52, %v3695_v37  ;;  %v3940_v56 = vadd.f32 %v3831_v39, %v3696_v20  ;;  %v4140_v47 = vrot.slane %v4044_v3, 1  ;;  %v4142_v58 = vrot.slane %v4045_v51, 1 }
 0x183   : > { %2779 = vst [vmem:[#allocation3 + $0x79] sm:$0xff] %v2692_v50  ;;  %v2695_v38 = vmax.f32 %v2663_v15, 0.0  ;;  %v2661_v8 = vadd.f32 %v6819_v55, %v2622_v53  ;;  %v3279_v61 = vrot.slane %v6908_v40, 2  ;;  %v4383_v11 = vrot.slane %v4287_v41, 2 }
 0x184   : > { %v4384_v60 = vrot.slane %v4288_v25, 2  ;;  %v4386_v36 = vrot.slane %v4289_v45, 2  ;;  %v4007_v5 = vadd.f32 %v3975_v21, %v3939_v63  ;;  %v4008_v42 = vadd.f32 %v3976_v4, %v3940_v56  ;;  %v7003_v21 = vld [vmem:[%s8242_s9] ss:$0 sm:$0xff] }
 0x185   : > { %2782 = vst [vmem:[#allocation3 + $0x99] sm:$0xff] %v2695_v38  ;;  %v2693_v23 = vmax.f32 %v2661_v8, 0.0  ;;  %v4141_v26 = vsel %vm785_vm0, %v4139_v29, %v4140_v47  ;;  %v4143_v10 = vsel %vm785_vm0, %v4140_v47, %v4142_v58  ;;  %v6975_v15 = vmul.f32 %v6871_v28, %v6930_v57 }
 0x186   : > { %v4385_v24 = vsel %vm1030_vm1, %v4383_v11, %v4384_v60  ;;  %v4387_v50 = vsel %vm1030_vm1, %v4384_v60, %v4386_v36  ;;  %v3490_v40 = vmul.f32 %v6875_v31, %v6930_v57  ;;  %v4251_v53 = vadd.f32 %v4141_v26, %v4007_v5  ;;  %v7026_v60 = vld [vmem:[#allocation3 + $0x48] sm:$0xff] }
 0x187   : > { %2780 = vst [vmem:[#allocation3 + $0x81] sm:$0xff] %v2693_v23  ;;  %v4252_v1 = vadd.f32 %v4143_v10, %v4008_v42  ;;  %v3734_v9 = vmul.f32 %v6879_v6, %v6930_v57  ;;  %v6983_v43 = vmul.f32 %v6857_v2, %v6930_v57  ;;  %v2865_v18 = vmul.f32 %v6857_v2, %v6867_v34 }
 0x188   : > { %v2934_v38 = vmul.f32 %v6861_v49, %v6867_v34  ;;  %v3178_v8 = vmul.f32 %v6865_v19, %v6867_v34  ;;  %v3588_v14 = vrot.slane %v3490_v40, 1  ;;  %v4495_v32 = vadd.f32 %v4385_v24, %v4251_v53 }
 0x189   : > { %v4496_v59 = vadd.f32 %v4387_v50, %v4252_v1  ;;  %v3832_v12 = vrot.slane %v3734_v9, 2  ;;  %v6998_v16 = vmul.f32 %v6861_v49, %v6930_v57  ;;  %v3422_v20 = vmul.f32 %v6871_v28, %v6933_v27 }
 0x18a   : > { %v3032_v23 = vrot.slane %v2934_v38, 1  ;;  %v3276_v37 = vrot.slane %v3178_v8, 2  ;;  %v3491_v34 = vmul.f32 %v6875_v31, %v6933_v27  ;;  %v4534_v33 = vmul.f32 %v6988_v62, %v4495_v32 }
 0x18b   : > { %v4535_v17 = vmul.f32 %v6988_v62, %v4496_v59  ;;  %v3492_v46 = vmul.f32 %v6875_v31, %v6939_v44  ;;  %v3735_v4 = vmul.f32 %v6879_v6, %v6933_v27  ;;  %v2866_v30 = vmul.f32 %v6857_v2, %v6888_v35 }
 0x18c   : > { %v2935_v3 = vmul.f32 %v6861_v49, %v6888_v35  ;;  %v3179_v51 = vmul.f32 %v6865_v19, %v6888_v35  ;;  %v3589_v41 = vrot.slane %v3491_v34, 1  ;;  %v4573_v25 = vadd.f32 %v7003_v21, %v4534_v33 }
 0x18d   : > { %v4574_v52 = vadd.f32 %v7003_v21, %v4535_v17  ;;  %v3591_v39 = vrot.slane %v3492_v46, 1  ;;  %v3736_v29 = vmul.f32 %v6879_v6, %v6939_v44  ;;  %v3833_v47 = vrot.slane %v3735_v4, 2 }
 0x18e   : > { %v3033_v45 = vrot.slane %v2935_v3, 1  ;;  %v3277_v63 = vrot.slane %v3179_v51, 2  ;;  %v3590_v56 = vsel %vm785_vm0, %v3588_v14, %v3589_v41  ;;  %v4605_v58 = vmax.f32 %v4573_v25, 0.0 }
 0x18f   : > { %v4606_v11 = vmax.f32 %v4574_v52, 0.0  ;;  %v3592_v35 = vsel %vm785_vm0, %v3589_v41, %v3591_v39  ;;  %v3835_v36 = vrot.slane %v3736_v29, 2  ;;  %v3834_v53 = vsel %vm1030_vm1, %v3832_v12, %v3833_v47 }
 0x190   : > { %v3034_v5 = vsel %vm785_vm0, %v3032_v23, %v3033_v45  ;;  %v3036_v42 = vsel %vm785_vm0, %v3033_v45, %v3035_v0  ;;  %v3278_v26 = vsel %vm1030_vm1, %v3276_v37, %v3277_v63  ;;  %v3280_v10 = vsel %vm1030_vm1, %v3277_v63, %v3279_v61  ;;  %v7043_v0 = vld [vmem:[#allocation3 + $0x50] sm:$0xff]  ;;  %v7045_v61 = vld [vmem:[#allocation3 + $0x58] sm:$0x3] }
 0x191   : > { %v4637_v24 = vpack.c.bf16 %v4606_v11, %v4605_v58  ;;  %v3141_v50 = vadd.f32 %v3034_v5, %v2865_v18  ;;  %v3142_v40 = vadd.f32 %v3036_v42, %v2866_v30  ;;  %v3836_v1 = vsel %vm1030_vm1, %v3833_v47, %v3835_v36 }
 0x192   : > { %v3977_v9 = vmul.f32 %v6883_v7, %v7026_v60  ;;  %v4046_v38 = vmul.f32 %v6899_v22, %v7026_v60  ;;  %v4290_v13 = vmul.f32 %v6944_v54, %v7026_v60  ;;  %v2868_v14 = vmul.f32 %v6857_v2, %v6933_v27 }
 0x193   : > { %5226 = vmatprep.mubr.bf16.mxu1 %v4637_v24  ;;  %v3385_v18 = vadd.f32 %v3278_v26, %v3141_v50  ;;  %v3386_v8 = vadd.f32 %v3280_v10, %v3142_v40  ;;  %v2938_v32 = vmul.f32 %v6861_v49, %v6933_v27  ;;  %v3978_v59 = vmul.f32 %v6883_v7, %v7043_v0 }
 0x194   : > { %v4047_v12 = vmul.f32 %v6899_v22, %v7043_v0  ;;  %v4048_v23 = vmul.f32 %v6899_v22, %v7045_v61  ;;  %v4144_v37 = vrot.slane %v4046_v38, 1  ;;  %v4291_v17 = vmul.f32 %v6944_v54, %v7043_v0 }
 0x195   : > { %v3453_v34 = vadd.f32 %v6975_v15, %v3385_v18  ;;  %v3454_v33 = vadd.f32 %v3422_v20, %v3386_v8  ;;  %v4292_v46 = vmul.f32 %v6944_v54, %v7045_v61  ;;  %v4388_v3 = vrot.slane %v4290_v13, 2 }
 0x196   : > { %v4145_v4 = vrot.slane %v4047_v12, 1  ;;  %v4147_v30 = vrot.slane %v4048_v23, 1  ;;  %v2939_v51 = vmul.f32 %v6861_v49, %v6939_v44  ;;  %v4389_v52 = vrot.slane %v4291_v17, 2 }
 0x197   : > { %v3697_v41 = vadd.f32 %v3590_v56, %v3453_v34  ;;  %v3698_v25 = vadd.f32 %v3592_v35, %v3454_v33  ;;  %v4391_v39 = vrot.slane %v4292_v46, 2  ;;  %v3037_v20 = vrot.slane %v6998_v16, 1 }
 0x198   : > { %v4146_v29 = vsel %vm785_vm0, %v4144_v37, %v4145_v4  ;;  %v4148_v15 = vsel %vm785_vm0, %v4145_v4, %v4147_v30  ;;  %v3038_v45 = vrot.slane %v2938_v32, 1  ;;  %v4390_v11 = vsel %vm1030_vm1, %v4388_v3, %v4389_v52 }
 0x199   : > { %v3941_v47 = vadd.f32 %v3834_v53, %v3697_v41  ;;  %v3942_v58 = vadd.f32 %v3836_v1, %v3698_v25  ;;  %v4392_v36 = vsel %vm1030_vm1, %v4389_v52, %v4391_v39  ;;  %v3040_v35 = vrot.slane %v2939_v51, 1 }
 0x19a   : > { %v3039_v56 = vsel %vm785_vm0, %v3037_v20, %v3038_v45  ;;  %v3181_v42 = vmul.f32 %v6865_v19, %v6930_v57  ;;  %v3182_v50 = vmul.f32 %v6865_v19, %v6933_v27  ;;  %v3183_v38 = vmul.f32 %v6865_v19, %v6939_v44 }
 0x19b   : > { %v4009_v10 = vadd.f32 %v3977_v9, %v3941_v47  ;;  %v4010_v24 = vadd.f32 %v3978_v59, %v3942_v58  ;;  %v3143_v16 = vadd.f32 %v3039_v56, %v6983_v43  ;;  %v3041_v1 = vsel %vm785_vm0, %v3038_v45, %v3040_v35  ;;  %v7098_v47 = vld [vmem:[#allocation3 + $0x60] sm:$0xff]  ;;  %v7100_v58 = vld [vmem:[#allocation3 + $0x68] sm:$0xff] }
 0x19c   : > { %v3144_v8 = vadd.f32 %v3041_v1, %v2868_v14  ;;  %v3281_v9 = vrot.slane %v3181_v42, 2  ;;  %v3282_v27 = vrot.slane %v3182_v50, 2  ;;  %v3284_v34 = vrot.slane %v3183_v38, 2 }
 0x19d   : > { %v4253_v18 = vadd.f32 %v4146_v29, %v4009_v10  ;;  %v4254_v57 = vadd.f32 %v4148_v15, %v4010_v24  ;;  %v3423_v33 = vmul.f32 %v6871_v28, %v7026_v60  ;;  %v3424_v39 = vmul.f32 %v6871_v28, %v7043_v0 }
 0x19e   : > { %v3283_v46 = vsel %vm1030_vm1, %v3281_v9, %v3282_v27  ;;  %v3285_v3 = vsel %vm1030_vm1, %v3282_v27, %v3284_v34  ;;  %v3493_v45 = vmul.f32 %v6875_v31, %v7026_v60  ;;  %v3739_v50 = vmul.f32 %v6879_v6, %v7045_v61 }
 0x19f   : > { %v5192_v63 = vpop.f32.mrf.mxu0  ;;  %v4497_v23 = vadd.f32 %v4390_v11, %v4253_v18  ;;  %v4498_v37 = vadd.f32 %v4392_v36, %v4254_v57  ;;  %v3387_v51 = vadd.f32 %v3283_v46, %v3143_v16  ;;  %v3388_v52 = vadd.f32 %v3285_v3, %v3144_v8 }
 0x1a0   : > { %v2627_v5 = vmul.f32 %v5192_v63, %v6809_v48  ;;  %v3494_v36 = vmul.f32 %v6875_v31, %v7043_v0  ;;  %v3593_v42 = vrot.slane %v3493_v45, 1  ;;  %v3738_v16 = vmul.f32 %v6879_v6, %v7043_v0 }
 0x1a1   : > { %v2527_v26 = vpop.f32.mrf.mxu0  ;;  %v4536_v4 = vmul.f32 %v6988_v62, %v4497_v23  ;;  %v4537_v30 = vmul.f32 %v6988_v62, %v4498_v37  ;;  %v3455_v20 = vadd.f32 %v3423_v33, %v3387_v51  ;;  %v3456_v11 = vadd.f32 %v3424_v39, %v3388_v52 }
 0x1a2   : > { %v2666_v40 = vadd.f32 %v6819_v55, %v2627_v5  ;;  %v2625_v53 = vmul.f32 %v6809_v48, %v2527_v26  ;;  %v3495_v5 = vmul.f32 %v6875_v31, %v7045_v61  ;;  %v3737_v26 = vmul.f32 %v6879_v6, %v7026_v60 }
 0x1a3   : > { %v5193_v13 = vpop.f32.mrf.mxu0  ;;  %v4575_v29 = vadd.f32 %v7003_v21, %v4536_v4  ;;  %v4576_v15 = vadd.f32 %v7003_v21, %v4537_v30  ;;  %v3594_v10 = vrot.slane %v3494_v36, 1  ;;  %v3979_v38 = vmul.f32 %v6883_v7, %v7098_v47 }
 0x1a4   : > { %v2698_v32 = vmax.f32 %v2666_v40, 0.0  ;;  %v2664_v43 = vadd.f32 %v6819_v55, %v2625_v53  ;;  %v2628_v59 = vmul.f32 %v5193_v13, %v6809_v48  ;;  %v3596_v24 = vrot.slane %v3495_v5, 1  ;;  %v7112_v53 = vld [vmem:[#allocation3 + $0x70] sm:$0x3] }
 0x1a5   : > { %v2530_v12 = vpop.f32.mrf.mxu0  ;;  %v4607_v56 = vmax.f32 %v4575_v29, 0.0  ;;  %v4608_v35 = vmax.f32 %v4576_v15, 0.0  ;;  %v3837_v1 = vrot.slane %v3737_v26, 2  ;;  %v3980_v13 = vmul.f32 %v6883_v7, %v7100_v58 }
 0x1a6   : > { %2785 = vst [vmem:[#allocation3 + $0xc1] sm:$0xff] %v2698_v32  ;;  %v2696_v44 = vmax.f32 %v2664_v43, 0.0  ;;  %v2667_v17 = vadd.f32 %v6819_v55, %v2628_v59  ;;  %v2626_v14 = vmul.f32 %v6809_v48, %v2530_v12  ;;  %v3595_v18 = vsel %vm785_vm0, %v3593_v42, %v3594_v10 }
 0x1a7   : > { %v4638_v40 = vpack.c.bf16 %v4608_v35, %v4607_v56  ;;  %v3597_v57 = vsel %vm785_vm0, %v3594_v10, %v3596_v24  ;;  %v3838_v8 = vrot.slane %v3738_v16, 2  ;;  %v3840_v9 = vrot.slane %v3739_v50, 2 }
 0x1a8   : > { %2783 = vst [vmem:[#allocation3 + $0xa9] sm:$0xff] %v2696_v44  ;;  %v2699_v41 = vmax.f32 %v2667_v17, 0.0  ;;  %v2665_v25 = vadd.f32 %v6819_v55, %v2626_v14  ;;  %v3699_v32 = vadd.f32 %v3595_v18, %v3455_v20  ;;  %v3700_v43 = vadd.f32 %v3597_v57, %v3456_v11 }
 0x1a9   : > { %5227 = vmatmul.mubr.bf16.vlgmr.msra.gmra.mxu1 %v4638_v40  ;;  %v4049_v59 = vmul.f32 %v6899_v22, %v7098_v47  ;;  %v4050_v27 = vmul.f32 %v6899_v22, %v7100_v58  ;;  %v3839_v12 = vsel %vm1030_vm1, %v3837_v1, %v3838_v8  ;;  %v3841_v23 = vsel %vm1030_vm1, %v3838_v8, %v3840_v9 }
 0x1aa   : > { %2786 = vst [vmem:[#allocation3 + $0xc9] sm:$0xff] %v2699_v41  ;;  %v2697_v63 = vmax.f32 %v2665_v25, 0.0  ;;  %v4051_v37 = vmul.f32 %v6899_v22, %v7112_v53  ;;  %v4293_v34 = vmul.f32 %v6944_v54, %v7098_v47  ;;  %v3943_v33 = vadd.f32 %v3839_v12, %v3699_v32 }
 0x1ab   : > { %v3944_v44 = vadd.f32 %v3841_v23, %v3700_v43  ;;  %v4149_v17 = vrot.slane %v4049_v59, 1  ;;  %v4150_v14 = vrot.slane %v4050_v27, 1  ;;  %v4294_v4 = vmul.f32 %v6944_v54, %v7100_v58 }
 0x1ac   : > { %2784 = vst [vmem:[#allocation3 + $0xb1] sm:$0xff] %v2697_v63  ;;  %v4152_v46 = vrot.slane %v4051_v37, 1  ;;  %v4295_v30 = vmul.f32 %v6944_v54, %v7112_v53  ;;  %v4393_v3 = vrot.slane %v4293_v34, 2  ;;  %v4011_v51 = vadd.f32 %v3979_v38, %v3943_v33 }
 0x1ad   : > { %v4012_v41 = vadd.f32 %v3980_v13, %v3944_v44  ;;  %v4151_v25 = vsel %vm785_vm0, %v4149_v17, %v4150_v14  ;;  %v2869_v52 = vmul.f32 %v6857_v2, %v7026_v60  ;;  %v4394_v29 = vrot.slane %v4294_v4, 2  ;;  %v7172_v4 = vld [vmem:[#allocation3 + $0x80] sm:$0xff] }
 0x1ae   : > { %v4153_v39 = vsel %vm785_vm0, %v4150_v14, %v4152_v46  ;;  %v4396_v15 = vrot.slane %v4295_v30, 2  ;;  %v2870_v20 = vmul.f32 %v6857_v2, %v7043_v0  ;;  %v4255_v45 = vadd.f32 %v4151_v25, %v4011_v51  ;;  %v7170_v46 = vld [vmem:[#allocation3 + $0x78] sm:$0xff] }
 0x1af   : > { %v4256_v63 = vadd.f32 %v4153_v39, %v4012_v41  ;;  %v2940_v11 = vmul.f32 %v6861_v49, %v7026_v60  ;;  %v2941_v36 = vmul.f32 %v6861_v49, %v7043_v0  ;;  %v4395_v5 = vsel %vm1030_vm1, %v4393_v3, %v4394_v29 }
 0x1b0   : > { %v4397_v56 = vsel %vm1030_vm1, %v4394_v29, %v4396_v15  ;;  %v2942_v35 = vmul.f32 %v6861_v49, %v7045_v61  ;;  %v3184_v42 = vmul.f32 %v6865_v19, %v7026_v60  ;;  %v4499_v26 = vadd.f32 %v4395_v5, %v4255_v45  ;;  %v7180_v15 = vld [vmem:[#allocation3 + $0x88] sm:$0x3] }
 0x1b1   : > { %v4500_v10 = vadd.f32 %v4397_v56, %v4256_v63  ;;  %v3042_v24 = vrot.slane %v2940_v11, 1  ;;  %v3043_v16 = vrot.slane %v2941_v36, 1  ;;  %v3185_v40 = vmul.f32 %v6865_v19, %v7043_v0 }
 0x1b2   : > { %v3045_v50 = vrot.slane %v2942_v35, 1  ;;  %v3186_v1 = vmul.f32 %v6865_v19, %v7045_v61  ;;  %v3286_v38 = vrot.slane %v3184_v42, 2  ;;  %v4538_v13 = vmul.f32 %v6988_v62, %v4499_v26 }
 0x1b3   : > { %v4539_v18 = vmul.f32 %v6988_v62, %v4500_v10  ;;  %v3044_v57 = vsel %vm785_vm0, %v3042_v24, %v3043_v16  ;;  %v3425_v60 = vmul.f32 %v6871_v28, %v7098_v47  ;;  %v3287_v32 = vrot.slane %v3185_v40, 2 }
 0x1b4   : > { %v3046_v8 = vsel %vm785_vm0, %v3043_v16, %v3045_v50  ;;  %v3145_v9 = vadd.f32 %v3044_v57, %v2869_v52  ;;  %v3289_v43 = vrot.slane %v3186_v1, 2  ;;  %v4577_v0 = vadd.f32 %v7003_v21, %v4538_v13 }
 0x1b5   : > { %v4578_v59 = vadd.f32 %v7003_v21, %v4539_v18  ;;  %v3146_v61 = vadd.f32 %v3046_v8, %v2870_v20  ;;  %v3426_v27 = vmul.f32 %v6871_v28, %v7100_v58  ;;  %v3288_v12 = vsel %vm1030_vm1, %v3286_v38, %v3287_v32 }
 0x1b6   : > { %v3290_v23 = vsel %vm1030_vm1, %v3287_v32, %v3289_v43  ;;  %v3496_v37 = vmul.f32 %v6875_v31, %v7098_v47  ;;  %v3497_v34 = vmul.f32 %v6875_v31, %v7100_v58  ;;  %v4609_v33 = vmax.f32 %v4577_v0, 0.0 }
 0x1b7   : > { %v4610_v44 = vmax.f32 %v4578_v59, 0.0  ;;  %v3389_v17 = vadd.f32 %v3288_v12, %v3145_v9  ;;  %v3390_v14 = vadd.f32 %v3290_v23, %v3146_v61  ;;  %v3498_v30 = vmul.f32 %v6875_v31, %v7112_v53 }
 0x1b8   : > { %v3598_v3 = vrot.slane %v3496_v37, 1  ;;  %v3599_v51 = vrot.slane %v3497_v34, 1  ;;  %v3740_v41 = vmul.f32 %v6879_v6, %v7098_v47  ;;  %v3741_v29 = vmul.f32 %v6879_v6, %v7100_v58 }
 0x1b9   : > { %v4639_v25 = vpack.c.bf16 %v4610_v44, %v4609_v33  ;;  %v3457_v52 = vadd.f32 %v3425_v60, %v3389_v17  ;;  %v3458_v39 = vadd.f32 %v3426_v27, %v3390_v14  ;;  %v3601_v45 = vrot.slane %v3498_v30, 1 }
 0x1ba   : > { %v3600_v20 = vsel %vm785_vm0, %v3598_v3, %v3599_v51  ;;  %v3742_v63 = vmul.f32 %v6879_v6, %v7112_v53  ;;  %v3842_v11 = vrot.slane %v3740_v41, 2  ;;  %v3843_v5 = vrot.slane %v3741_v29, 2 }
 0x1bb   : > { %5230 = vmatprep.mubr.bf16.mxu1 %v4639_v25  ;;  %v3701_v36 = vadd.f32 %v3600_v20, %v3457_v52  ;;  %v3981_v56 = vmul.f32 %v6883_v7, %v7170_v46  ;;  %v3982_v35 = vmul.f32 %v6883_v7, %v7172_v4  ;;  %v3602_v42 = vsel %vm785_vm0, %v3599_v51, %v3601_v45 }
 0x1bc   : > { %v3845_v26 = vrot.slane %v3742_v63, 2  ;;  %v4052_v10 = vmul.f32 %v6899_v22, %v7170_v46  ;;  %v4053_v24 = vmul.f32 %v6899_v22, %v7172_v4  ;;  %v3702_v16 = vadd.f32 %v3602_v42, %v3458_v39 }
 0x1bd   : > { %v3844_v50 = vsel %vm1030_vm1, %v3842_v11, %v3843_v5  ;;  %v4054_v40 = vmul.f32 %v6899_v22, %v7180_v15  ;;  %v4296_v1 = vmul.f32 %v6944_v54, %v7170_v46  ;;  %v4297_v32 = vmul.f32 %v6944_v54, %v7172_v4 }
 0x1be   : > { %v3846_v38 = vsel %vm1030_vm1, %v3843_v5, %v3845_v26  ;;  %v3945_v13 = vadd.f32 %v3844_v50, %v3701_v36  ;;  %v4154_v18 = vrot.slane %v4052_v10, 1  ;;  %v4155_v57 = vrot.slane %v4053_v24, 1 }
 0x1bf   : > { %v3946_v8 = vadd.f32 %v3846_v38, %v3702_v16  ;;  %v4157_v9 = vrot.slane %v4054_v40, 1  ;;  %v4298_v43 = vmul.f32 %v6944_v54, %v7180_v15  ;;  %v4398_v27 = vrot.slane %v4296_v1, 2 }
 0x1c0   : > { %v4013_v59 = vadd.f32 %v3981_v56, %v3945_v13  ;;  %v4156_v61 = vsel %vm785_vm0, %v4154_v18, %v4155_v57  ;;  %v4399_v34 = vrot.slane %v4297_v32, 2  ;;  %v2871_v30 = vmul.f32 %v6857_v2, %v7098_v47 }
 0x1c1   : > { %v4014_v23 = vadd.f32 %v3982_v35, %v3946_v8  ;;  %v4158_v37 = vsel %vm785_vm0, %v4155_v57, %v4157_v9  ;;  %v4401_v33 = vrot.slane %v4298_v43, 2  ;;  %v2872_v52 = vmul.f32 %v6857_v2, %v7100_v58 }
 0x1c2   : > { %v4257_v14 = vadd.f32 %v4156_v61, %v4013_v59  ;;  %v4400_v41 = vsel %vm1030_vm1, %v4398_v27, %v4399_v34  ;;  %v2943_v36 = vmul.f32 %v6861_v49, %v7098_v47  ;;  %v2944_v5 = vmul.f32 %v6861_v49, %v7100_v58 }
 0x1c3   : > { %v4258_v51 = vadd.f32 %v4158_v37, %v4014_v23  ;;  %v4402_v25 = vsel %vm1030_vm1, %v4399_v34, %v4401_v33  ;;  %v2945_v56 = vmul.f32 %v6861_v49, %v7112_v53  ;;  %v3187_v18 = vmul.f32 %v6865_v19, %v7098_v47 }
 0x1c4   : > { %v4501_v45 = vadd.f32 %v4400_v41, %v4257_v14  ;;  %v3047_v16 = vrot.slane %v2943_v36, 1  ;;  %v3048_v50 = vrot.slane %v2944_v5, 1  ;;  %v3188_v8 = vmul.f32 %v6865_v19, %v7100_v58 }
 0x1c5   : > { %v5196_v60 = vpop.f32.mrf.mxu0  ;;  %v4502_v11 = vadd.f32 %v4402_v25, %v4258_v51  ;;  %v3050_v40 = vrot.slane %v2945_v56, 1  ;;  %v3189_v59 = vmul.f32 %v6865_v19, %v7112_v53  ;;  %v3291_v61 = vrot.slane %v3187_v18, 2  ;;  %v7253_v51 = vld [vmem:[#allocation3 + $0x98] sm:$0xff] }
 0x1c6   : > { %v2631_v0 = vmul.f32 %v5196_v60, %v6809_v48  ;;  %v4540_v10 = vmul.f32 %v6988_v62, %v4501_v45  ;;  %v3292_v47 = vrot.slane %v3188_v8, 2  ;;  %v3427_v27 = vmul.f32 %v6871_v28, %v7170_v46 }
 0x1c7   : > { %v2543_v12 = vpop.f32.mrf.mxu0  ;;  %v4541_v24 = vmul.f32 %v6988_v62, %v4502_v11  ;;  %v3051_v60 = vsel %vm785_vm0, %v3048_v50, %v3050_v40  ;;  %v3499_v58 = vmul.f32 %v6875_v31, %v7170_v46  ;;  %v3500_v23 = vmul.f32 %v6875_v31, %v7172_v4 }
 0x1c8   : > { %v2670_v44 = vadd.f32 %v6819_v55, %v2631_v0  ;;  %v2629_v17 = vmul.f32 %v6809_v48, %v2543_v12  ;;  %v4579_v13 = vadd.f32 %v7003_v21, %v4540_v10  ;;  %v3148_v0 = vadd.f32 %v3051_v60, %v2872_v52 }
 0x1c9   : > { %v5197_v3 = vpop.f32.mrf.mxu0  ;;  %v4580_v57 = vadd.f32 %v7003_v21, %v4541_v24  ;;  %v3428_v12 = vmul.f32 %v6871_v28, %v7172_v4  ;;  %v3293_v34 = vsel %vm1030_vm1, %v3291_v61, %v3292_v47  ;;  %v3294_v33 = vrot.slane %v3189_v59, 2 }
 0x1ca   : > { %v2702_v39 = vmax.f32 %v2670_v44, 0.0  ;;  %v2668_v29 = vadd.f32 %v6819_v55, %v2629_v17  ;;  %v2632_v20 = vmul.f32 %v5197_v3, %v6809_v48  ;;  %v4611_v32 = vmax.f32 %v4579_v13, 0.0  ;;  %v7249_v44 = vld [vmem:[#allocation3 + $0x90] sm:$0xff] }
 0x1cb   : > { %v2546_v63 = vpop.f32.mrf.mxu0  ;;  %v3501_v53 = vmul.f32 %v6875_v31, %v7180_v15  ;;  %v3603_v14 = vrot.slane %v3499_v58, 1  ;;  %v3743_v3 = vmul.f32 %v6879_v6, %v7170_v46  ;;  %v3295_v41 = vsel %vm1030_vm1, %v3292_v47, %v3294_v33 }
 0x1cc   : > { %2789 = vst [vmem:[#allocation3 + $0xf1] sm:$0xff] %v2702_v39  ;;  %v2700_v35 = vmax.f32 %v2668_v29, 0.0  ;;  %v2671_v42 = vadd.f32 %v6819_v55, %v2632_v20  ;;  %v2630_v26 = vmul.f32 %v6809_v48, %v2546_v63  ;;  %v3049_v48 = vsel %vm785_vm0, %v3047_v16, %v3048_v50  ;;  %v7260_v29 = vld [vmem:[#allocation3 + $0xa0] sm:$0x3] }
 0x1cd   : > { %v3147_v43 = vadd.f32 %v3049_v48, %v2871_v30  ;;  %v3604_v30 = vrot.slane %v3500_v23, 1  ;;  %v3606_v25 = vrot.slane %v3501_v53, 1  ;;  %v3744_v52 = vmul.f32 %v6879_v6, %v7172_v4 }
 0x1ce   : > { %2787 = vst [vmem:[#allocation3 + $0xd9] sm:$0xff] %v2700_v35  ;;  %v2703_v1 = vmax.f32 %v2671_v42, 0.0  ;;  %v2669_v38 = vadd.f32 %v6819_v55, %v2630_v26  ;;  %v4612_v55 = vmax.f32 %v4580_v57, 0.0  ;;  %v3745_v39 = vmul.f32 %v6879_v6, %v7180_v15 }
 0x1cf   : > { %v3391_v17 = vadd.f32 %v3293_v34, %v3147_v43  ;;  %v3392_v20 = vadd.f32 %v3295_v41, %v3148_v0  ;;  %v3605_v63 = vsel %vm785_vm0, %v3603_v14, %v3604_v30  ;;  %v3847_v11 = vrot.slane %v3743_v3, 2 }
 0x1d0   : > { %2790 = vst [vmem:[#allocation3 + $0xf9] sm:$0xff] %v2703_v1  ;;  %v2701_v9 = vmax.f32 %v2669_v38, 0.0  ;;  %v4640_v37 = vpack.c.bf16 %v4612_v55, %v4611_v32  ;;  %v3607_v36 = vsel %vm785_vm0, %v3604_v30, %v3606_v25  ;;  %v3848_v5 = vrot.slane %v3744_v52, 2 }
 0x1d1   : > { %v3459_v45 = vadd.f32 %v3427_v27, %v3391_v17  ;;  %v3850_v56 = vrot.slane %v3745_v39, 2  ;;  %v3983_v35 = vmul.f32 %v6883_v7, %v7249_v44  ;;  %v3460_v42 = vadd.f32 %v3428_v12, %v3392_v20 }
 0x1d2   : > { %2788 = vst [vmem:[#allocation3 + $0xe1] sm:$0xff] %v2701_v9  ;;  %5231 = vmatmul.mubr.bf16.gmra.mxu1 %v4640_v37  ;;  %v3984_v10 = vmul.f32 %v6883_v7, %v7253_v51  ;;  %v4055_v24 = vmul.f32 %v6899_v22, %v7249_v44  ;;  %v3849_v16 = vsel %vm1030_vm1, %v3847_v11, %v3848_v5 }
 0x1d3   : > { %v3703_v26 = vadd.f32 %v3605_v63, %v3459_v45  ;;  %v3851_v50 = vsel %vm1030_vm1, %v3848_v5, %v3850_v56  ;;  %v4056_v40 = vmul.f32 %v6899_v22, %v7253_v51  ;;  %v4057_v1 = vmul.f32 %v6899_v22, %v7260_v29 }
 0x1d4   : > { %v3704_v38 = vadd.f32 %v3607_v36, %v3460_v42  ;;  %v4159_v18 = vrot.slane %v4055_v24, 1  ;;  %v4299_v57 = vmul.f32 %v6944_v54, %v7249_v44  ;;  %v4300_v8 = vmul.f32 %v6944_v54, %v7253_v51 }
 0x1d5   : > { %v3947_v13 = vadd.f32 %v3849_v16, %v3703_v26  ;;  %v4160_v48 = vrot.slane %v4056_v40, 1  ;;  %v4162_v60 = vrot.slane %v4057_v1, 1  ;;  %v4301_v9 = vmul.f32 %v6944_v54, %v7260_v29 }
 0x1d6   : > { %v3948_v32 = vadd.f32 %v3851_v50, %v3704_v38  ;;  %v4403_v0 = vrot.slane %v4299_v57, 2  ;;  %v2873_v55 = vmul.f32 %v6857_v2, %v7170_v46  ;;  %v4404_v47 = vrot.slane %v4300_v8, 2  ;;  %v7318_v57 = vld [vmem:[#allocation3 + $0xb0] sm:$0xff] }
 0x1d7   : > { %v4015_v43 = vadd.f32 %v3983_v35, %v3947_v13  ;;  %v4161_v59 = vsel %vm785_vm0, %v4159_v18, %v4160_v48  ;;  %v4163_v61 = vsel %vm785_vm0, %v4160_v48, %v4162_v60  ;;  %v4406_v27 = vrot.slane %v4301_v9, 2  ;;  %v7316_v18 = vld [vmem:[#allocation3 + $0xa8] sm:$0xff] }
 0x1d8   : > { %v4016_v12 = vadd.f32 %v3984_v10, %v3948_v32  ;;  %v2874_v23 = vmul.f32 %v6857_v2, %v7172_v4  ;;  %v2946_v37 = vmul.f32 %v6861_v49, %v7170_v46  ;;  %v4405_v34 = vsel %vm1030_vm1, %v4403_v0, %v4404_v47 }
 0x1d9   : > { %v4259_v58 = vadd.f32 %v4161_v59, %v4015_v43  ;;  %v4407_v33 = vsel %vm1030_vm1, %v4404_v47, %v4406_v27  ;;  %v2947_v53 = vmul.f32 %v6861_v49, %v7172_v4  ;;  %v2948_v17 = vmul.f32 %v6861_v49, %v7180_v15 }
 0x1da   : > { %v4260_v14 = vadd.f32 %v4163_v61, %v4016_v12  ;;  %v3052_v3 = vrot.slane %v2946_v37, 1  ;;  %v3190_v41 = vmul.f32 %v6865_v19, %v7170_v46  ;;  %v3191_v39 = vmul.f32 %v6865_v19, %v7172_v4 }
 0x1db   : > { %v4503_v30 = vadd.f32 %v4405_v34, %v4259_v58  ;;  %v3053_v25 = vrot.slane %v2947_v53, 1  ;;  %v3055_v52 = vrot.slane %v2948_v17, 1  ;;  %v3192_v20 = vmul.f32 %v6865_v19, %v7180_v15  ;;  %v7340_v17 = vld [vmem:[#allocation3 + $0xb8] sm:$0x3] }
 0x1dc   : > { %v4504_v45 = vadd.f32 %v4407_v33, %v4260_v14  ;;  %v3296_v11 = vrot.slane %v3190_v41, 2  ;;  %v3429_v36 = vmul.f32 %v6871_v28, %v7249_v44  ;;  %v3297_v46 = vrot.slane %v3191_v39, 2  ;;  %v7337_v33 = vld [vmem:[%s8238_s5] ss:$0 sm:$0xff] }
 0x1dd   : > { %v4542_v63 = vmul.f32 %v6988_v62, %v4503_v30  ;;  %v3054_v5 = vsel %vm785_vm0, %v3052_v3, %v3053_v25  ;;  %v3056_v56 = vsel %vm785_vm0, %v3053_v25, %v3055_v52  ;;  %v3299_v35 = vrot.slane %v3192_v20, 2 }
 0x1de   : > { %v4543_v42 = vmul.f32 %v6988_v62, %v4504_v45  ;;  %v3149_v26 = vadd.f32 %v3054_v5, %v2873_v55  ;;  %v3150_v10 = vadd.f32 %v3056_v56, %v2874_v23  ;;  %v3298_v15 = vsel %vm1030_vm1, %v3296_v11, %v3297_v46  ;;  %v7350_v45 = vld [vmem:[%s8239_s6] ss:$0 sm:$0xff] }
 0x1df   : > { %v4581_v4 = vadd.f32 %v7003_v21, %v4542_v63  ;;  %v3300_v24 = vsel %vm1030_vm1, %v3297_v46, %v3299_v35  ;;  %v3430_v16 = vmul.f32 %v6871_v28, %v7253_v51  ;;  %v3502_v50 = vmul.f32 %v6875_v31, %v7249_v44 }
 0x1e0   : > { %v4582_v40 = vadd.f32 %v7003_v21, %v4543_v42  ;;  %v3393_v38 = vadd.f32 %v3298_v15, %v3149_v26  ;;  %v3394_v13 = vadd.f32 %v3300_v24, %v3150_v10  ;;  %v3503_v48 = vmul.f32 %v6875_v31, %v7253_v51 }
 0x1e1   : > { %v4613_v1 = vmax.f32 %v4581_v4, 0.0  ;;  %v3504_v60 = vmul.f32 %v6875_v31, %v7260_v29  ;;  %v3608_v8 = vrot.slane %v3502_v50, 1  ;;  %v3746_v9 = vmul.f32 %v6879_v6, %v7249_v44 }
 0x1e2   : > { %v4614_v32 = vmax.f32 %v4582_v40, 0.0  ;;  %v3461_v43 = vadd.f32 %v3429_v36, %v3393_v38  ;;  %v3462_v0 = vadd.f32 %v3430_v16, %v3394_v13  ;;  %v3747_v55 = vmul.f32 %v6879_v6, %v7253_v51 }
 0x1e3   : > { %v3609_v59 = vrot.slane %v3503_v48, 1  ;;  %v3611_v61 = vrot.slane %v3504_v60, 1  ;;  %v3748_v47 = vmul.f32 %v6879_v6, %v7260_v29  ;;  %v3852_v27 = vrot.slane %v3746_v9, 2 }
 0x1e4   : > { %v4641_v58 = vpack.c.bf16 %v4614_v32, %v4613_v1  ;;  %v3853_v23 = vrot.slane %v3747_v55, 2  ;;  %v3985_v37 = vmul.f32 %v6883_v7, %v7316_v18  ;;  %v3986_v34 = vmul.f32 %v6883_v7, %v7318_v57 }
 0x1e5   : > { %v3610_v14 = vsel %vm785_vm0, %v3608_v8, %v3609_v59  ;;  %v3612_v30 = vsel %vm785_vm0, %v3609_v59, %v3611_v61  ;;  %v3855_v3 = vrot.slane %v3748_v47, 2  ;;  %v4058_v20 = vmul.f32 %v6899_v22, %v7316_v18 }
 0x1e6   : > { %5234 = vmatprep.mubr.bf16.mxu1 %v4641_v58  ;;  %v3705_v25 = vadd.f32 %v3610_v14, %v3461_v43  ;;  %v3706_v52 = vadd.f32 %v3612_v30, %v3462_v0  ;;  %v3854_v39 = vsel %vm1030_vm1, %v3852_v27, %v3853_v23  ;;  %v4059_v5 = vmul.f32 %v6899_v22, %v7318_v57 }
 0x1e7   : > { %v3856_v36 = vsel %vm1030_vm1, %v3853_v23, %v3855_v3  ;;  %v4060_v42 = vmul.f32 %v6899_v22, %v7340_v17  ;;  %v4164_v4 = vrot.slane %v4058_v20, 1  ;;  %v4302_v38 = vmul.f32 %v6944_v54, %v7316_v18 }
 0x1e8   : > { %v3949_v46 = vadd.f32 %v3854_v39, %v3705_v25  ;;  %v3950_v35 = vadd.f32 %v3856_v36, %v3706_v52  ;;  %v4165_v24 = vrot.slane %v4059_v5, 1  ;;  %v4303_v43 = vmul.f32 %v6944_v54, %v7318_v57 }
 0x1e9   : > { %v4167_v1 = vrot.slane %v4060_v42, 1  ;;  %v4304_v0 = vmul.f32 %v6944_v54, %v7340_v17  ;;  %v4408_v47 = vrot.slane %v4302_v38, 2  ;;  %v2875_v58 = vmul.f32 %v6857_v2, %v7249_v44 }
 0x1ea   : > { %v5200_v12 = vpop.f32.mrf.mxu0  ;;  %v4017_v50 = vadd.f32 %v3985_v37, %v3949_v46  ;;  %v4018_v40 = vadd.f32 %v3986_v34, %v3950_v35  ;;  %v4166_v8 = vsel %vm785_vm0, %v4164_v4, %v4165_v24  ;;  %v4409_v27 = vrot.slane %v4303_v43, 2 }
 0x1eb   : > { %v2635_v53 = vmul.f32 %v7337_v33, %v5200_v12  ;;  %v4168_v9 = vsel %vm785_vm0, %v4165_v24, %v4167_v1  ;;  %v4411_v12 = vrot.slane %v4304_v0, 2  ;;  %v2876_v23 = vmul.f32 %v6857_v2, %v7253_v51 }
 0x1ec   : > { %v2559_v41 = vpop.f32.mrf.mxu0  ;;  %v4261_v32 = vadd.f32 %v4166_v8, %v4017_v50  ;;  %v4262_v61 = vadd.f32 %v4168_v9, %v4018_v40  ;;  %v2949_v34 = vmul.f32 %v6861_v49, %v7249_v44  ;;  %v2950_v54 = vmul.f32 %v6861_v49, %v7253_v51 }
 0x1ed   : > { %v2674_v63 = vadd.f32 %v7350_v45, %v2635_v53  ;;  %v2633_v11 = vmul.f32 %v7337_v33, %v2559_v41  ;;  %v2951_v53 = vmul.f32 %v6861_v49, %v7260_v29  ;;  %v4410_v14 = vsel %vm1030_vm1, %v4408_v47, %v4409_v27  ;;  %v7416_v47 = vld [vmem:[#allocation3 + $0xd0] sm:$0x3] }
 0x1ee   : > { %v5201_v56 = vpop.f32.mrf.mxu0  ;;  %v4412_v30 = vsel %vm1030_vm1, %v4409_v27, %v4411_v12  ;;  %v3193_v3 = vmul.f32 %v6865_v19, %v7249_v44  ;;  %v3194_v41 = vmul.f32 %v6865_v19, %v7253_v51  ;;  %v4505_v25 = vadd.f32 %v4410_v14, %v4261_v32 }
 0x1ef   : > { %v2706_v26 = vmax.f32 %v2674_v63, 0.0  ;;  %v2672_v10 = vadd.f32 %v7350_v45, %v2633_v11  ;;  %v2636_v15 = vmul.f32 %v7337_v33, %v5201_v56  ;;  %v4506_v52 = vadd.f32 %v4412_v30, %v4262_v61 }
 0x1f0   : > { %v2562_v16 = vpop.f32.mrf.mxu0  ;;  %v3057_v39 = vrot.slane %v2949_v34, 1  ;;  %v3058_v20 = vrot.slane %v2950_v54, 1  ;;  %v3060_v63 = vrot.slane %v2951_v53, 1  ;;  %v3195_v11 = vmul.f32 %v6865_v19, %v7260_v29 }
 0x1f1   : > { %2793 = vst [vmem:[#allocation3 + $0x121] sm:$0xff] %v2706_v26  ;;  %v2704_v13 = vmax.f32 %v2672_v10, 0.0  ;;  %v2675_v48 = vadd.f32 %v7350_v45, %v2636_v15  ;;  %v2634_v60 = vmul.f32 %v7337_v33, %v2562_v16  ;;  %v3301_v36 = vrot.slane %v3193_v3, 2 }
 0x1f2   : > { %v3302_v5 = vrot.slane %v3194_v41, 2  ;;  %v4544_v56 = vmul.f32 %v6988_v62, %v4505_v25  ;;  %v4545_v46 = vmul.f32 %v6988_v62, %v4506_v52  ;;  %v3059_v44 = vsel %vm785_vm0, %v3057_v39, %v3058_v20  ;;  %v7436_v39 = vld [vmem:[%s8240_s7 + $0x8] ss:$0 sm:$0xff] }
 0x1f3   : > { %2791 = vst [vmem:[#allocation3 + $0x109] sm:$0xff] %v2704_v13  ;;  %v2707_v55 = vmax.f32 %v2675_v48, 0.0  ;;  %v2673_v59 = vadd.f32 %v7350_v45, %v2634_v60  ;;  %v3431_v51 = vmul.f32 %v6871_v28, %v7316_v18  ;;  %v3061_v35 = vsel %vm785_vm0, %v3058_v20, %v3060_v63  ;;  %v7406_v13 = vld [vmem:[#allocation3 + $0xc0] sm:$0xff]  ;;  %v7410_v60 = vld [vmem:[#allocation3 + $0xc8] sm:$0xff] }
 0x1f4   : > { %v3151_v42 = vadd.f32 %v3059_v44, %v2875_v58  ;;  %v3303_v4 = vsel %vm1030_vm1, %v3301_v36, %v3302_v5  ;;  %v3304_v26 = vrot.slane %v3195_v11, 2  ;;  %v4583_v10 = vadd.f32 %v7003_v21, %v4544_v56 }
 0x1f5   : > { %2794 = vst [vmem:[#allocation3 + $0x129] sm:$0xff] %v2707_v55  ;;  %v2705_v37 = vmax.f32 %v2673_v59, 0.0  ;;  %v4584_v29 = vadd.f32 %v7003_v21, %v4545_v46  ;;  %v3152_v15 = vadd.f32 %v3061_v35, %v2876_v23  ;;  %v3432_v24 = vmul.f32 %v6871_v28, %v7318_v57 }
 0x1f6   : > { %v3305_v62 = vsel %vm1030_vm1, %v3302_v5, %v3304_v26  ;;  %v3395_v16 = vadd.f32 %v3303_v4, %v3151_v42  ;;  %v3505_v50 = vmul.f32 %v6875_v31, %v7316_v18  ;;  %v3506_v40 = vmul.f32 %v6875_v31, %v7318_v57 }
 0x1f7   : > { %2792 = vst [vmem:[#allocation3 + $0x111] sm:$0xff] %v2705_v37  ;;  %v4615_v1 = vmax.f32 %v4583_v10, 0.0  ;;  %v4616_v38 = vmax.f32 %v4584_v29, 0.0  ;;  %v3396_v48 = vadd.f32 %v3305_v62, %v3152_v15  ;;  %v3507_v21 = vmul.f32 %v6875_v31, %v7340_v17 }
 0x1f8   : > { %v3463_v8 = vadd.f32 %v3431_v51, %v3395_v16  ;;  %v3613_v9 = vrot.slane %v3505_v50, 1  ;;  %v3614_v32 = vrot.slane %v3506_v40, 1  ;;  %v3749_v43 = vmul.f32 %v6879_v6, %v7316_v18 }
 0x1f9   : > { %v4642_v0 = vpack.c.bf16 %v4616_v38, %v4615_v1  ;;  %v3464_v55 = vadd.f32 %v3432_v24, %v3396_v48  ;;  %v3616_v59 = vrot.slane %v3507_v21, 1  ;;  %v3750_v61 = vmul.f32 %v6879_v6, %v7318_v57 }
 0x1fa   : > { %v3615_v27 = vsel %vm785_vm0, %v3613_v9, %v3614_v32  ;;  %v3751_v12 = vmul.f32 %v6879_v6, %v7340_v17  ;;  %v3857_v58 = vrot.slane %v3749_v43, 2  ;;  %v3987_v23 = vmul.f32 %v6883_v7, %v7406_v13 }
 0x1fb   : > { %5235 = vmatmul.mubr.bf16.gmra.mxu1 %v4642_v0  ;;  %v3617_v37 = vsel %vm785_vm0, %v3614_v32, %v3616_v59  ;;  %v3707_v34 = vadd.f32 %v3615_v27, %v3463_v8  ;;  %v3858_v54 = vrot.slane %v3750_v61, 2  ;;  %v3988_v53 = vmul.f32 %v6883_v7, %v7410_v60 }
 0x1fc   : > { %v3708_v14 = vadd.f32 %v3617_v37, %v3464_v55  ;;  %v3860_v30 = vrot.slane %v3751_v12, 2  ;;  %v4061_v3 = vmul.f32 %v6899_v22, %v7406_v13  ;;  %v4062_v41 = vmul.f32 %v6899_v22, %v7410_v60  ;;  %v7468_v12 = vld [vmem:[%s8241_s8] ss:$0 sm:$0xff] }
 0x1fd   : > { %v3859_v25 = vsel %vm1030_vm1, %v3857_v58, %v3858_v54  ;;  %v4063_v52 = vmul.f32 %v6899_v22, %v7416_v47  ;;  %v4305_v20 = vmul.f32 %v7436_v39, %v7406_v13  ;;  %v4306_v63 = vmul.f32 %v7436_v39, %v7410_v60 }
 0x1fe   : > { %v3861_v11 = vsel %vm1030_vm1, %v3858_v54, %v3860_v30  ;;  %v3951_v36 = vadd.f32 %v3859_v25, %v3707_v34  ;;  %v4169_v5 = vrot.slane %v4061_v3, 1  ;;  %v4170_v56 = vrot.slane %v4062_v41, 1 }
 0x1ff   : > { %v3952_v46 = vadd.f32 %v3861_v11, %v3708_v14  ;;  %v4172_v44 = vrot.slane %v4063_v52, 1  ;;  %v4307_v51 = vmul.f32 %v7436_v39, %v7416_v47  ;;  %v4413_v35 = vrot.slane %v4305_v20, 2 }
 0x200   : > { %v4019_v42 = vadd.f32 %v3987_v23, %v3951_v36  ;;  %v4171_v4 = vsel %vm785_vm0, %v4169_v5, %v4170_v56  ;;  %v4414_v26 = vrot.slane %v4306_v63, 2  ;;  %v2877_v10 = vmul.f32 %v6857_v2, %v7316_v18 }
 0x201   : > { %v4020_v29 = vadd.f32 %v3988_v53, %v3952_v46  ;;  %v4173_v15 = vsel %vm785_vm0, %v4170_v56, %v4172_v44  ;;  %v4416_v24 = vrot.slane %v4307_v51, 2  ;;  %v2878_v62 = vmul.f32 %v6857_v2, %v7318_v57  ;;  %v7479_v53 = vld [vmem:[%s8242_s9] ss:$0 sm:$0xff] }
 0x202   : > { %v4263_v16 = vadd.f32 %v4171_v4, %v4019_v42  ;;  %v4415_v50 = vsel %vm1030_vm1, %v4413_v35, %v4414_v26  ;;  %v2952_v40 = vmul.f32 %v6861_v49, %v7316_v18  ;;  %v2953_v1 = vmul.f32 %v6861_v49, %v7318_v57 }
 0x203   : > { %v4264_v38 = vadd.f32 %v4173_v15, %v4020_v29  ;;  %v4417_v48 = vsel %vm1030_vm1, %v4414_v26, %v4416_v24  ;;  %v2954_v21 = vmul.f32 %v6861_v49, %v7340_v17  ;;  %v3196_v8 = vmul.f32 %v6865_v19, %v7316_v18 }
 0x204   : > { %v4507_v9 = vadd.f32 %v4415_v50, %v4263_v16  ;;  %v3062_v32 = vrot.slane %v2952_v40, 1  ;;  %v3063_v43 = vrot.slane %v2953_v1, 1  ;;  %v3197_v0 = vmul.f32 %v6865_v19, %v7318_v57  ;;  %v7498_v50 = vld [vmem:[#allocation3 + $0xd8] sm:$0xff] }
 0x205   : > { %v4508_v55 = vadd.f32 %v4417_v48, %v4264_v38  ;;  %v3065_v59 = vrot.slane %v2954_v21, 1  ;;  %v3198_v61 = vmul.f32 %v6865_v19, %v7340_v17  ;;  %v3306_v27 = vrot.slane %v3196_v8, 2  ;;  %v7502_v38 = vld [vmem:[#allocation3 + $0xe0] sm:$0xff] }
 0x206   : > { %v4546_v58 = vmul.f32 %v7468_v12, %v4507_v9  ;;  %v3064_v18 = vsel %vm785_vm0, %v3062_v32, %v3063_v43  ;;  %v3307_v23 = vrot.slane %v3197_v0, 2  ;;  %v3433_v37 = vmul.f32 %v6871_v28, %v7406_v13 }
 0x207   : > { %v4547_v57 = vmul.f32 %v7468_v12, %v4508_v55  ;;  %v3066_v34 = vsel %vm785_vm0, %v3063_v43, %v3065_v59  ;;  %v3153_v54 = vadd.f32 %v3064_v18, %v2877_v10  ;;  %v3309_v17 = vrot.slane %v3198_v61, 2 }
 0x208   : > { %v4585_v14 = vadd.f32 %v7479_v53, %v4546_v58  ;;  %v3154_v30 = vadd.f32 %v3066_v34, %v2878_v62  ;;  %v3308_v3 = vsel %vm1030_vm1, %v3306_v27, %v3307_v23  ;;  %v3434_v41 = vmul.f32 %v6871_v28, %v7410_v60  ;;  %v7514_v34 = vld [vmem:[#allocation3 + $0xe8] sm:$0x3] }
 0x209   : > { %v4586_v25 = vadd.f32 %v7479_v53, %v4547_v57  ;;  %v3310_v52 = vsel %vm1030_vm1, %v3307_v23, %v3309_v17  ;;  %v3397_v20 = vadd.f32 %v3308_v3, %v3153_v54  ;;  %v3508_v63 = vmul.f32 %v6875_v31, %v7406_v13 }
 0x20a   : > { %v4617_v36 = vmax.f32 %v4585_v14, 0.0  ;;  %v3398_v5 = vadd.f32 %v3310_v52, %v3154_v30  ;;  %v3509_v56 = vmul.f32 %v6875_v31, %v7410_v60  ;;  %v3510_v46 = vmul.f32 %v6875_v31, %v7416_v47 }
 0x20b   : > { %v4618_v51 = vmax.f32 %v4586_v25, 0.0  ;;  %v3465_v35 = vadd.f32 %v3433_v37, %v3397_v20  ;;  %v3618_v42 = vrot.slane %v3508_v63, 1  ;;  %v3752_v15 = vmul.f32 %v6879_v6, %v7406_v13 }
 0x20c   : > { %v3466_v26 = vadd.f32 %v3434_v41, %v3398_v5  ;;  %v3619_v10 = vrot.slane %v3509_v56, 1  ;;  %v3621_v29 = vrot.slane %v3510_v46, 1  ;;  %v3753_v40 = vmul.f32 %v6879_v6, %v7410_v60 }
 0x20d   : > { %v4643_v16 = vpack.c.bf16 %v4618_v51, %v4617_v36  ;;  %v3754_v8 = vmul.f32 %v6879_v6, %v7416_v47  ;;  %v3862_v9 = vrot.slane %v3752_v15, 2  ;;  %v3989_v18 = vmul.f32 %v6883_v7, %v7498_v50 }
 0x20e   : > { %v3620_v48 = vsel %vm785_vm0, %v3618_v42, %v3619_v10  ;;  %v3622_v21 = vsel %vm785_vm0, %v3619_v10, %v3621_v29  ;;  %v3863_v27 = vrot.slane %v3753_v40, 2  ;;  %v3990_v54 = vmul.f32 %v6883_v7, %v7502_v38 }
 0x20f   : > { %5238 = vmatprep.mubr.bf16.mxu1 %v4643_v16  ;;  %v3709_v55 = vadd.f32 %v3620_v48, %v3465_v35  ;;  %v3710_v61 = vadd.f32 %v3622_v21, %v3466_v26  ;;  %v3865_v58 = vrot.slane %v3754_v8, 2  ;;  %v4064_v30 = vmul.f32 %v6899_v22, %v7498_v50 }
 0x210   : > { %v5204_v11 = vpop.f32.mrf.mxu0  ;;  %v3864_v17 = vsel %vm1030_vm1, %v3862_v9, %v3863_v27  ;;  %v4065_v3 = vmul.f32 %v6899_v22, %v7502_v38  ;;  %v4066_v63 = vmul.f32 %v6899_v22, %v7514_v34  ;;  %v4308_v5 = vmul.f32 %v7436_v39, %v7498_v50 }
 0x211   : > { %v2639_v44 = vmul.f32 %v7337_v33, %v5204_v11  ;;  %v3866_v14 = vsel %vm1030_vm1, %v3863_v27, %v3865_v58  ;;  %v3953_v52 = vadd.f32 %v3864_v17, %v3709_v55  ;;  %v4174_v11 = vrot.slane %v4064_v30, 1 }
 0x212   : > { %v2575_v4 = vpop.f32.mrf.mxu0  ;;  %v3954_v20 = vadd.f32 %v3866_v14, %v3710_v61  ;;  %v4175_v36 = vrot.slane %v4065_v3, 1  ;;  %v4309_v51 = vmul.f32 %v7436_v39, %v7502_v38  ;;  %v4177_v42 = vrot.slane %v4066_v63, 1 }
 0x213   : > { %v2678_v24 = vadd.f32 %v7350_v45, %v2639_v44  ;;  %v2637_v62 = vmul.f32 %v7337_v33, %v2575_v4  ;;  %v4021_v46 = vadd.f32 %v3989_v18, %v3953_v52  ;;  %v4310_v4 = vmul.f32 %v7436_v39, %v7514_v34 }
 0x214   : > { %v5205_v1 = vpop.f32.mrf.mxu0  ;;  %v4022_v44 = vadd.f32 %v3990_v54, %v3954_v20  ;;  %v4176_v35 = vsel %vm785_vm0, %v4174_v11, %v4175_v36  ;;  %v4418_v26 = vrot.slane %v4308_v5, 2  ;;  %v4419_v29 = vrot.slane %v4309_v51, 2 }
 0x215   : > { %v2710_v32 = vmax.f32 %v2678_v24, 0.0  ;;  %v2676_v43 = vadd.f32 %v7350_v45, %v2637_v62  ;;  %v2640_v0 = vmul.f32 %v7337_v33, %v5205_v1  ;;  %v4265_v10 = vadd.f32 %v4176_v35, %v4021_v46  ;;  %v7571_v35 = vld [vmem:[#allocation3 + $0xf0] sm:$0xff] }
 0x216   : > { %v2578_v59 = vpop.f32.mrf.mxu0  ;;  %v2879_v15 = vmul.f32 %v6857_v2, %v7406_v13  ;;  %v2880_v24 = vmul.f32 %v6857_v2, %v7410_v60  ;;  %v4178_v62 = vsel %vm785_vm0, %v4175_v36, %v4177_v42  ;;  %v4421_v16 = vrot.slane %v4310_v4, 2  ;;  %v7573_v42 = vld [vmem:[#allocation3 + $0xf8] sm:$0xff] }
 0x217   : > { %2797 = vst [vmem:[#allocation3 + $0x151] sm:$0xff] %v2710_v32  ;;  %v2708_v23 = vmax.f32 %v2676_v43, 0.0  ;;  %v2679_v37 = vadd.f32 %v7350_v45, %v2640_v0  ;;  %v2638_v57 = vmul.f32 %v7337_v33, %v2578_v59  ;;  %v2955_v40 = vmul.f32 %v6861_v49, %v7406_v13 }
 0x218   : > { %v2956_v1 = vmul.f32 %v6861_v49, %v7410_v60  ;;  %v4266_v48 = vadd.f32 %v4178_v62, %v4022_v44  ;;  %v4420_v21 = vsel %vm1030_vm1, %v4418_v26, %v4419_v29  ;;  %v2957_v8 = vmul.f32 %v6861_v49, %v7416_v47 }
 0x219   : > { %2795 = vst [vmem:[#allocation3 + $0x139] sm:$0xff] %v2708_v23  ;;  %v2711_v41 = vmax.f32 %v2679_v37, 0.0  ;;  %v2677_v25 = vadd.f32 %v7350_v45, %v2638_v57  ;;  %v3199_v9 = vmul.f32 %v6865_v19, %v7406_v13  ;;  %v4422_v32 = vsel %vm1030_vm1, %v4419_v29, %v4421_v16 }
 0x21a   : > { %v4509_v43 = vadd.f32 %v4420_v21, %v4265_v10  ;;  %v3067_v0 = vrot.slane %v2955_v40, 1  ;;  %v3068_v55 = vrot.slane %v2956_v1, 1  ;;  %v4510_v59 = vadd.f32 %v4422_v32, %v4266_v48 }
 0x21b   : > { %2798 = vst [vmem:[#allocation3 + $0x159] sm:$0xff] %v2711_v41  ;;  %v2709_v56 = vmax.f32 %v2677_v25, 0.0  ;;  %v3070_v61 = vrot.slane %v2957_v8, 1  ;;  %v3200_v27 = vmul.f32 %v6865_v19, %v7410_v60  ;;  %v3201_v58 = vmul.f32 %v6865_v19, %v7416_v47 }
 0x21c   : > { %v4548_v18 = vmul.f32 %v7468_v12, %v4509_v43  ;;  %v3069_v23 = vsel %vm785_vm0, %v3067_v0, %v3068_v55  ;;  %v3311_v37 = vrot.slane %v3199_v9, 2  ;;  %v3435_v13 = vmul.f32 %v6871_v28, %v7498_v50 }
 0x21d   : > { %2796 = vst [vmem:[#allocation3 + $0x141] sm:$0xff] %v2709_v56  ;;  %v4549_v57 = vmul.f32 %v7468_v12, %v4510_v59  ;;  %v3071_v54 = vsel %vm785_vm0, %v3068_v55, %v3070_v61  ;;  %v3155_v17 = vadd.f32 %v3069_v23, %v2879_v15  ;;  %v3312_v14 = vrot.slane %v3200_v27, 2 }
 0x21e   : > { %v4587_v30 = vadd.f32 %v7479_v53, %v4548_v18  ;;  %v3156_v60 = vadd.f32 %v3071_v54, %v2880_v24  ;;  %v3314_v3 = vrot.slane %v3201_v58, 2  ;;  %v3436_v47 = vmul.f32 %v6871_v28, %v7502_v38  ;;  %v7579_v24 = vld [vmem:[#allocation3 + $0x100] sm:$0x3] }
 0x21f   : > { %v4588_v41 = vadd.f32 %v7479_v53, %v4549_v57  ;;  %v3313_v25 = vsel %vm1030_vm1, %v3311_v37, %v3312_v14  ;;  %v3511_v52 = vmul.f32 %v6875_v31, %v7498_v50  ;;  %v3512_v20 = vmul.f32 %v6875_v31, %v7502_v38 }
 0x220   : > { %v4619_v63 = vmax.f32 %v4587_v30, 0.0  ;;  %v3315_v11 = vsel %vm1030_vm1, %v3312_v14, %v3314_v3  ;;  %v3399_v36 = vadd.f32 %v3313_v25, %v3155_v17  ;;  %v3513_v5 = vmul.f32 %v6875_v31, %v7514_v34 }
 0x221   : > { %v4620_v56 = vmax.f32 %v4588_v41, 0.0  ;;  %v3400_v46 = vadd.f32 %v3315_v11, %v3156_v60  ;;  %v3623_v44 = vrot.slane %v3511_v52, 1  ;;  %v3624_v51 = vrot.slane %v3512_v20, 1 }
 0x222   : > { %v3467_v4 = vadd.f32 %v3435_v13, %v3399_v36  ;;  %v3626_v26 = vrot.slane %v3513_v5, 1  ;;  %v3755_v10 = vmul.f32 %v6879_v6, %v7498_v50  ;;  %v3756_v29 = vmul.f32 %v6879_v6, %v7502_v38 }
 0x223   : > { %v4644_v15 = vpack.c.bf16 %v4620_v56, %v4619_v63  ;;  %v3468_v62 = vadd.f32 %v3436_v47, %v3400_v46  ;;  %v3625_v16 = vsel %vm785_vm0, %v3623_v44, %v3624_v51  ;;  %v3757_v40 = vmul.f32 %v6879_v6, %v7514_v34 }
 0x224   : > { %v3627_v1 = vsel %vm785_vm0, %v3624_v51, %v3626_v26  ;;  %v3711_v48 = vadd.f32 %v3625_v16, %v3467_v4  ;;  %v3867_v21 = vrot.slane %v3755_v10, 2  ;;  %v3868_v8 = vrot.slane %v3756_v29, 2 }
 0x225   : > { %5239 = vmatmul.mubr.bf16.gmra.mxu1 %v4644_v15  ;;  %v3712_v9 = vadd.f32 %v3627_v1, %v3468_v62  ;;  %v3870_v32 = vrot.slane %v3757_v40, 2  ;;  %v3991_v43 = vmul.f32 %v6883_v7, %v7571_v35  ;;  %v3992_v0 = vmul.f32 %v6883_v7, %v7573_v42 }
 0x226   : > { %v3869_v55 = vsel %vm1030_vm1, %v3867_v21, %v3868_v8  ;;  %v4067_v59 = vmul.f32 %v6899_v22, %v7571_v35  ;;  %v4068_v61 = vmul.f32 %v6899_v22, %v7573_v42  ;;  %v4069_v27 = vmul.f32 %v6899_v22, %v7579_v24 }
 0x227   : > { %v3871_v58 = vsel %vm1030_vm1, %v3868_v8, %v3870_v32  ;;  %v3955_v18 = vadd.f32 %v3869_v55, %v3711_v48  ;;  %v4311_v23 = vmul.f32 %v7436_v39, %v7571_v35  ;;  %v4312_v37 = vmul.f32 %v7436_v39, %v7573_v42 }
 0x228   : > { %v3956_v13 = vadd.f32 %v3871_v58, %v3712_v9  ;;  %v4179_v57 = vrot.slane %v4067_v59, 1  ;;  %v4180_v54 = vrot.slane %v4068_v61, 1  ;;  %v4182_v17 = vrot.slane %v4069_v27, 1 }
 0x229   : > { %v4023_v14 = vadd.f32 %v3991_v43, %v3955_v18  ;;  %v4313_v30 = vmul.f32 %v7436_v39, %v7579_v24  ;;  %v4423_v60 = vrot.slane %v4311_v23, 2  ;;  %v4424_v3 = vrot.slane %v4312_v37, 2 }
 0x22a   : > { %v4024_v47 = vadd.f32 %v3992_v0, %v3956_v13  ;;  %v4181_v41 = vsel %vm785_vm0, %v4179_v57, %v4180_v54  ;;  %v4183_v25 = vsel %vm785_vm0, %v4180_v54, %v4182_v17  ;;  %v2881_v52 = vmul.f32 %v6857_v2, %v7498_v50 }
 0x22b   : > { %v4267_v20 = vadd.f32 %v4181_v41, %v4023_v14  ;;  %v4425_v63 = vsel %vm1030_vm1, %v4423_v60, %v4424_v3  ;;  %v4426_v11 = vrot.slane %v4313_v30, 2  ;;  %v2882_v36 = vmul.f32 %v6857_v2, %v7502_v38 }
 0x22c   : > { %v4268_v5 = vadd.f32 %v4183_v25, %v4024_v47  ;;  %v2958_v56 = vmul.f32 %v6861_v49, %v7498_v50  ;;  %v2959_v46 = vmul.f32 %v6861_v49, %v7502_v38  ;;  %v2960_v44 = vmul.f32 %v6861_v49, %v7514_v34 }
 0x22d   : > { %v4427_v51 = vsel %vm1030_vm1, %v4424_v3, %v4426_v11  ;;  %v4511_v4 = vadd.f32 %v4425_v63, %v4267_v20  ;;  %v3202_v26 = vmul.f32 %v6865_v19, %v7498_v50  ;;  %v3203_v10 = vmul.f32 %v6865_v19, %v7502_v38 }
 0x22e   : > { %v4512_v29 = vadd.f32 %v4427_v51, %v4268_v5  ;;  %v3072_v15 = vrot.slane %v2958_v56, 1  ;;  %v3073_v62 = vrot.slane %v2959_v46, 1  ;;  %v3075_v16 = vrot.slane %v2960_v44, 1 }
 0x22f   : > { %v4550_v1 = vmul.f32 %v7468_v12, %v4511_v4  ;;  %v3204_v48 = vmul.f32 %v6865_v19, %v7514_v34  ;;  %v3316_v21 = vrot.slane %v3202_v26, 2  ;;  %v3317_v8 = vrot.slane %v3203_v10, 2  ;;  %v7649_v26 = vld [vmem:[#allocation3 + $0x108] sm:$0xff]  ;;  %v7651_v10 = vld [vmem:[#allocation3 + $0x110] sm:$0xff] }
 0x230   : > { %v4551_v32 = vmul.f32 %v7468_v12, %v4512_v29  ;;  %v3074_v50 = vsel %vm785_vm0, %v3072_v15, %v3073_v62  ;;  %v3076_v38 = vsel %vm785_vm0, %v3073_v62, %v3075_v16  ;;  %v3437_v57 = vmul.f32 %v6871_v28, %v7571_v35 }
 0x231   : > { %v4589_v0 = vadd.f32 %v7479_v53, %v4550_v1  ;;  %v3157_v55 = vadd.f32 %v3074_v50, %v2881_v52  ;;  %v3158_v59 = vadd.f32 %v3076_v38, %v2882_v36  ;;  %v3318_v61 = vsel %vm1030_vm1, %v3316_v21, %v3317_v8  ;;  %v7660_v1 = vld [vmem:[#allocation3 + $0x118] sm:$0x3] }
 0x232   : > { %v4590_v58 = vadd.f32 %v7479_v53, %v4551_v32  ;;  %v3319_v18 = vrot.slane %v3204_v48, 2  ;;  %v3438_v54 = vmul.f32 %v6871_v28, %v7573_v42  ;;  %v3514_v25 = vmul.f32 %v6875_v31, %v7571_v35 }
 0x233   : > { %v4621_v37 = vmax.f32 %v4589_v0, 0.0  ;;  %v3401_v13 = vadd.f32 %v3318_v61, %v3157_v55  ;;  %v3515_v52 = vmul.f32 %v6875_v31, %v7573_v42  ;;  %v3516_v56 = vmul.f32 %v6875_v31, %v7579_v24 }
 0x234   : > { %v4622_v60 = vmax.f32 %v4590_v58, 0.0  ;;  %v3320_v47 = vsel %vm1030_vm1, %v3317_v8, %v3319_v18  ;;  %v3628_v46 = vrot.slane %v3514_v25, 1  ;;  %v3758_v29 = vmul.f32 %v6879_v6, %v7571_v35 }
 0x235   : > { %v5208_v40 = vpop.f32.mrf.mxu0  ;;  %v3469_v41 = vadd.f32 %v3437_v57, %v3401_v13  ;;  %v3402_v5 = vadd.f32 %v3320_v47, %v3158_v59  ;;  %v3629_v44 = vrot.slane %v3515_v52, 1  ;;  %v3631_v16 = vrot.slane %v3516_v56, 1 }
 0x236   : > { %v2643_v9 = vmul.f32 %v7337_v33, %v5208_v40  ;;  %v4645_v36 = vpack.c.bf16 %v4622_v60, %v4621_v37  ;;  %v3760_v40 = vmul.f32 %v6879_v6, %v7579_v24  ;;  %v3872_v21 = vrot.slane %v3758_v29, 2 }
 0x237   : > { %v2591_v43 = vpop.f32.mrf.mxu0  ;;  %v3470_v15 = vadd.f32 %v3438_v54, %v3402_v5  ;;  %v3630_v62 = vsel %vm785_vm0, %v3628_v46, %v3629_v44  ;;  %v3993_v50 = vmul.f32 %v6883_v7, %v7649_v26  ;;  %v3994_v38 = vmul.f32 %v6883_v7, %v7651_v10 }
 0x238   : > { %v2682_v27 = vadd.f32 %v7350_v45, %v2643_v9  ;;  %v2641_v34 = vmul.f32 %v7337_v33, %v2591_v43  ;;  %5242 = vmatprep.mubr.bf16.mxu1 %v4645_v36  ;;  %v3713_v48 = vadd.f32 %v3630_v62, %v3469_v41  ;;  %v3632_v9 = vsel %vm785_vm0, %v3629_v44, %v3631_v16 }
 0x239   : > { %v5209_v23 = vpop.f32.mrf.mxu0  ;;  %v3875_v32 = vrot.slane %v3760_v40, 2  ;;  %v3714_v43 = vadd.f32 %v3632_v9, %v3470_v15  ;;  %v4070_v55 = vmul.f32 %v6899_v22, %v7649_v26  ;;  %v4071_v59 = vmul.f32 %v6899_v22, %v7651_v10 }
 0x23a   : > { %v2714_v17 = vmax.f32 %v2682_v27, 0.0  ;;  %v2680_v14 = vadd.f32 %v7350_v45, %v2641_v34  ;;  %v2644_v30 = vmul.f32 %v7337_v33, %v5209_v23  ;;  %v4072_v34 = vmul.f32 %v6899_v22, %v7660_v1 }
 0x23b   : > { %v2594_v3 = vpop.f32.mrf.mxu0  ;;  %v4314_v58 = vmul.f32 %v7436_v39, %v7649_v26  ;;  %v4184_v23 = vrot.slane %v4070_v55, 1  ;;  %v4185_v37 = vrot.slane %v4071_v59, 1  ;;  %v4315_v13 = vmul.f32 %v7436_v39, %v7651_v10 }
 0x23c   : > { %2801 = vst [vmem:[#allocation3 + $0x181] sm:$0xff] %v2714_v17  ;;  %v2712_v20 = vmax.f32 %v2680_v14, 0.0  ;;  %v2683_v63 = vadd.f32 %v7350_v45, %v2644_v30  ;;  %v2642_v11 = vmul.f32 %v7337_v33, %v2594_v3  ;;  %v3759_v33 = vmul.f32 %v6879_v6, %v7573_v42 }
 0x23d   : > { %v4187_v54 = vrot.slane %v4072_v34, 1  ;;  %v4316_v17 = vmul.f32 %v7436_v39, %v7660_v1  ;;  %v4428_v14 = vrot.slane %v4314_v58, 2  ;;  %v4186_v60 = vsel %vm785_vm0, %v4184_v23, %v4185_v37  ;;  %v7715_v58 = vld [vmem:[#allocation3 + $0x120] sm:$0xff] }
 0x23e   : > { %2799 = vst [vmem:[#allocation3 + $0x169] sm:$0xff] %v2712_v20  ;;  %v2715_v51 = vmax.f32 %v2683_v63, 0.0  ;;  %v2681_v4 = vadd.f32 %v7350_v45, %v2642_v11  ;;  %v3873_v8 = vrot.slane %v3759_v33, 2  ;;  %v4429_v3 = vrot.slane %v4315_v13, 2  ;;  %v7721_v13 = vld [vmem:[#allocation3 + $0x128] sm:$0xff] }
 0x23f   : > { %v2883_v47 = vmul.f32 %v6857_v2, %v7571_v35  ;;  %v4188_v41 = vsel %vm785_vm0, %v4185_v37, %v4187_v54  ;;  %v4431_v52 = vrot.slane %v4316_v17, 2  ;;  %v2884_v20 = vmul.f32 %v6857_v2, %v7573_v42 }
 0x240   : > { %2802 = vst [vmem:[#allocation3 + $0x189] sm:$0xff] %v2715_v51  ;;  %v2713_v45 = vmax.f32 %v2681_v4, 0.0  ;;  %v3874_v0 = vsel %vm1030_vm1, %v3872_v21, %v3873_v8  ;;  %v3876_v61 = vsel %vm1030_vm1, %v3873_v8, %v3875_v32  ;;  %v4430_v11 = vsel %vm1030_vm1, %v4428_v14, %v4429_v3 }
 0x241   : > { %v3957_v27 = vadd.f32 %v3874_v0, %v3713_v48  ;;  %v3958_v18 = vadd.f32 %v3876_v61, %v3714_v43  ;;  %v2961_v36 = vmul.f32 %v6861_v49, %v7571_v35  ;;  %v2962_v5 = vmul.f32 %v6861_v49, %v7573_v42 }
 0x242   : > { %2800 = vst [vmem:[#allocation3 + $0x171] sm:$0xff] %v2713_v45  ;;  %v4432_v56 = vsel %vm1030_vm1, %v4429_v3, %v4431_v52  ;;  %v2963_v44 = vmul.f32 %v6861_v49, %v7579_v24  ;;  %v3205_v51 = vmul.f32 %v6865_v19, %v7571_v35  ;;  %v3206_v15 = vmul.f32 %v6865_v19, %v7573_v42 }
 0x243   : > { %v4025_v57 = vadd.f32 %v3993_v50, %v3957_v27  ;;  %v4026_v30 = vadd.f32 %v3994_v38, %v3958_v18  ;;  %v3077_v29 = vrot.slane %v2961_v36, 1  ;;  %v3078_v33 = vrot.slane %v2962_v5, 1 }
 0x244   : > { %v3080_v16 = vrot.slane %v2963_v44, 1  ;;  %v3207_v40 = vmul.f32 %v6865_v19, %v7579_v24  ;;  %v3321_v45 = vrot.slane %v3205_v51, 2  ;;  %v3322_v8 = vrot.slane %v3206_v15, 2 }
 0x245   : > { %v4269_v25 = vadd.f32 %v4186_v60, %v4025_v57  ;;  %v4270_v63 = vadd.f32 %v4188_v41, %v4026_v30  ;;  %v3079_v21 = vsel %vm785_vm0, %v3077_v29, %v3078_v33  ;;  %v3439_v35 = vmul.f32 %v6871_v28, %v7649_v26  ;;  %v7727_v41 = vld [vmem:[#allocation3 + $0x130] sm:$0x3] }
 0x246   : > { %v3081_v32 = vsel %vm785_vm0, %v3078_v33, %v3080_v16  ;;  %v3159_v42 = vadd.f32 %v3079_v21, %v2883_v47  ;;  %v3324_v50 = vrot.slane %v3207_v40, 2  ;;  %v3323_v24 = vsel %vm1030_vm1, %v3321_v45, %v3322_v8 }
 0x247   : > { %v4513_v46 = vadd.f32 %v4430_v11, %v4269_v25  ;;  %v4514_v4 = vadd.f32 %v4432_v56, %v4270_v63  ;;  %v3160_v43 = vadd.f32 %v3081_v32, %v2884_v20  ;;  %v3440_v0 = vmul.f32 %v6871_v28, %v7651_v10 }
 0x248   : > { %v3325_v59 = vsel %vm1030_vm1, %v3322_v8, %v3324_v50  ;;  %v3403_v61 = vadd.f32 %v3323_v24, %v3159_v42  ;;  %v3517_v27 = vmul.f32 %v6875_v31, %v7649_v26  ;;  %v3518_v23 = vmul.f32 %v6875_v31, %v7651_v10 }
 0x249   : > { %v4552_v62 = vmul.f32 %v7468_v12, %v4513_v46  ;;  %v4553_v48 = vmul.f32 %v7468_v12, %v4514_v4  ;;  %v3404_v18 = vadd.f32 %v3325_v59, %v3160_v43  ;;  %v3519_v37 = vmul.f32 %v6875_v31, %v7660_v1 }
 0x24a   : > { %v3471_v57 = vadd.f32 %v3439_v35, %v3403_v61  ;;  %v3633_v54 = vrot.slane %v3517_v27, 1  ;;  %v3761_v17 = vmul.f32 %v6879_v6, %v7649_v26  ;;  %v3762_v14 = vmul.f32 %v6879_v6, %v7651_v10 }
 0x24b   : > { %v4591_v9 = vadd.f32 %v7479_v53, %v4552_v62  ;;  %v4592_v38 = vadd.f32 %v7479_v53, %v4553_v48  ;;  %v3472_v60 = vadd.f32 %v3440_v0, %v3404_v18  ;;  %v3634_v3 = vrot.slane %v3518_v23, 1 }
 0x24c   : > { %v3636_v47 = vrot.slane %v3519_v37, 1  ;;  %v3763_v25 = vmul.f32 %v6879_v6, %v7660_v1  ;;  %v3877_v52 = vrot.slane %v3761_v17, 2  ;;  %v3878_v20 = vrot.slane %v3762_v14, 2 }
 0x24d   : > { %v4623_v55 = vmax.f32 %v4591_v9, 0.0  ;;  %v4624_v34 = vmax.f32 %v4592_v38, 0.0  ;;  %v3995_v63 = vmul.f32 %v6883_v7, %v7715_v58  ;;  %v3635_v11 = vsel %vm785_vm0, %v3633_v54, %v3634_v3 }
 0x24e   : > { %v3637_v36 = vsel %vm785_vm0, %v3634_v3, %v3636_v47  ;;  %v3996_v5 = vmul.f32 %v6883_v7, %v7721_v13  ;;  %v4073_v56 = vmul.f32 %v6899_v22, %v7715_v58  ;;  %v3715_v46 = vadd.f32 %v3635_v11, %v3471_v57 }
 0x24f   : > { %v4646_v30 = vpack.c.bf16 %v4624_v34, %v4623_v55  ;;  %v3716_v44 = vadd.f32 %v3637_v36, %v3472_v60  ;;  %v3879_v51 = vsel %vm1030_vm1, %v3877_v52, %v3878_v20  ;;  %v3880_v4 = vrot.slane %v3763_v25, 2 }
 0x250   : > { %v4074_v29 = vmul.f32 %v6899_v22, %v7721_v13  ;;  %v4075_v33 = vmul.f32 %v6899_v22, %v7727_v41  ;;  %v4189_v15 = vrot.slane %v4073_v56, 1  ;;  %v4317_v62 = vmul.f32 %v7436_v39, %v7715_v58 }
 0x251   : > { %5243 = vmatmul.mubr.bf16.gmra.mxu1 %v4646_v30  ;;  %v3881_v16 = vsel %vm1030_vm1, %v3878_v20, %v3880_v4  ;;  %v3959_v40 = vadd.f32 %v3879_v51, %v3715_v46  ;;  %v4318_v45 = vmul.f32 %v7436_v39, %v7721_v13  ;;  %v4319_v48 = vmul.f32 %v7436_v39, %v7727_v41 }
 0x252   : > { %v3960_v21 = vadd.f32 %v3881_v16, %v3716_v44  ;;  %v4190_v8 = vrot.slane %v4074_v29, 1  ;;  %v4192_v35 = vrot.slane %v4075_v33, 1  ;;  %v4433_v9 = vrot.slane %v4317_v62, 2 }
 0x253   : > { %v4027_v32 = vadd.f32 %v3995_v63, %v3959_v40  ;;  %v4434_v42 = vrot.slane %v4318_v45, 2  ;;  %v4436_v50 = vrot.slane %v4319_v48, 2  ;;  %v2885_v38 = vmul.f32 %v6857_v2, %v7649_v26  ;;  %v7789_v48 = vld [vmem:[#allocation3 + $0x138] sm:$0xff] }
 0x254   : > { %v4028_v43 = vadd.f32 %v3996_v5, %v3960_v21  ;;  %v4191_v24 = vsel %vm785_vm0, %v4189_v15, %v4190_v8  ;;  %v4193_v0 = vsel %vm785_vm0, %v4190_v8, %v4192_v35  ;;  %v2886_v55 = vmul.f32 %v6857_v2, %v7651_v10 }
 0x255   : > { %v4271_v59 = vadd.f32 %v4191_v24, %v4027_v32  ;;  %v4435_v61 = vsel %vm1030_vm1, %v4433_v9, %v4434_v42  ;;  %v4437_v27 = vsel %vm1030_vm1, %v4434_v42, %v4436_v50  ;;  %v2964_v34 = vmul.f32 %v6861_v49, %v7649_v26  ;;  %v7793_v9 = vld [vmem:[#allocation3 + $0x140] sm:$0xff]  ;;  %v7797_v24 = vld [vmem:[#allocation3 + $0x148] sm:$0x3] }
 0x256   : > { %v4272_v18 = vadd.f32 %v4193_v0, %v4028_v43  ;;  %v2965_v23 = vmul.f32 %v6861_v49, %v7651_v10  ;;  %v2966_v37 = vmul.f32 %v6861_v49, %v7660_v1  ;;  %v3208_v57 = vmul.f32 %v6865_v19, %v7649_v26 }
 0x257   : > { %v4515_v54 = vadd.f32 %v4435_v61, %v4271_v59  ;;  %v3082_v17 = vrot.slane %v2964_v34, 1  ;;  %v3209_v14 = vmul.f32 %v6865_v19, %v7651_v10  ;;  %v3210_v30 = vmul.f32 %v6865_v19, %v7660_v1 }
 0x258   : > { %v4516_v60 = vadd.f32 %v4437_v27, %v4272_v18  ;;  %v3083_v3 = vrot.slane %v2965_v23, 1  ;;  %v3085_v47 = vrot.slane %v2966_v37, 1  ;;  %v3326_v25 = vrot.slane %v3208_v57, 2 }
 0x259   : > { %v4554_v52 = vmul.f32 %v7468_v12, %v4515_v54  ;;  %v3327_v20 = vrot.slane %v3209_v14, 2  ;;  %v3329_v63 = vrot.slane %v3210_v30, 2  ;;  %v3441_v11 = vmul.f32 %v6871_v28, %v7715_v58 }
 0x25a   : > { %v4555_v26 = vmul.f32 %v7468_v12, %v4516_v60  ;;  %v3084_v36 = vsel %vm785_vm0, %v3082_v17, %v3083_v3  ;;  %v3086_v10 = vsel %vm785_vm0, %v3083_v3, %v3085_v47  ;;  %v3442_v1 = vmul.f32 %v6871_v28, %v7721_v13 }
 0x25b   : > { %v4593_v5 = vadd.f32 %v7479_v53, %v4554_v52  ;;  %v3161_v56 = vadd.f32 %v3084_v36, %v2885_v38  ;;  %v3162_v46 = vadd.f32 %v3086_v10, %v2886_v55  ;;  %v3328_v44 = vsel %vm1030_vm1, %v3326_v25, %v3327_v20 }
 0x25c   : > { %v4594_v51 = vadd.f32 %v7479_v53, %v4555_v26  ;;  %v3330_v4 = vsel %vm1030_vm1, %v3327_v20, %v3329_v63  ;;  %v3520_v29 = vmul.f32 %v6875_v31, %v7715_v58  ;;  %v3521_v33 = vmul.f32 %v6875_v31, %v7721_v13 }
 0x25d   : > { %v4625_v15 = vmax.f32 %v4593_v5, 0.0  ;;  %v3405_v62 = vadd.f32 %v3328_v44, %v3161_v56  ;;  %v3406_v16 = vadd.f32 %v3330_v4, %v3162_v46  ;;  %v3522_v40 = vmul.f32 %v6875_v31, %v7727_v41 }
 0x25e   : > { %v4626_v45 = vmax.f32 %v4594_v51, 0.0  ;;  %v3638_v21 = vrot.slane %v3520_v29, 1  ;;  %v3639_v8 = vrot.slane %v3521_v33, 1  ;;  %v3764_v35 = vmul.f32 %v6879_v6, %v7715_v58 }
 0x25f   : > { %v3473_v32 = vadd.f32 %v3441_v11, %v3405_v62  ;;  %v3474_v42 = vadd.f32 %v3442_v1, %v3406_v16  ;;  %v3641_v50 = vrot.slane %v3522_v40, 1  ;;  %v3765_v38 = vmul.f32 %v6879_v6, %v7721_v13 }
 0x260   : > { %v4647_v43 = vpack.c.bf16 %v4626_v45, %v4625_v15  ;;  %v3640_v0 = vsel %vm785_vm0, %v3638_v21, %v3639_v8  ;;  %v3766_v55 = vmul.f32 %v6879_v6, %v7727_v41  ;;  %v3882_v59 = vrot.slane %v3764_v35, 2 }
 0x261   : > { %v3642_v61 = vsel %vm785_vm0, %v3639_v8, %v3641_v50  ;;  %v3717_v27 = vadd.f32 %v3640_v0, %v3473_v32  ;;  %v3883_v34 = vrot.slane %v3765_v38, 2  ;;  %v3997_v18 = vmul.f32 %v6883_v7, %v7789_v48 }
 0x262   : > { %5246 = vmatprep.mubr.bf16.mxu1 %v4647_v43  ;;  %v3718_v23 = vadd.f32 %v3642_v61, %v3474_v42  ;;  %v3885_v37 = vrot.slane %v3766_v55, 2  ;;  %v3998_v57 = vmul.f32 %v6883_v7, %v7793_v9  ;;  %v4076_v54 = vmul.f32 %v6899_v22, %v7789_v48 }
 0x263   : > { %v3884_v17 = vsel %vm1030_vm1, %v3882_v59, %v3883_v34  ;;  %v4077_v14 = vmul.f32 %v6899_v22, %v7793_v9  ;;  %v4078_v30 = vmul.f32 %v6899_v22, %v7797_v24  ;;  %v4320_v60 = vmul.f32 %v7436_v39, %v7789_v48 }
 0x264   : > { %v3886_v3 = vsel %vm1030_vm1, %v3883_v34, %v3885_v37  ;;  %v3961_v47 = vadd.f32 %v3884_v17, %v3717_v27  ;;  %v4194_v25 = vrot.slane %v4076_v54, 1  ;;  %v4321_v52 = vmul.f32 %v7436_v39, %v7793_v9 }
 0x265   : > { %v3962_v20 = vadd.f32 %v3886_v3, %v3718_v23  ;;  %v4195_v63 = vrot.slane %v4077_v14, 1  ;;  %v4197_v11 = vrot.slane %v4078_v30, 1  ;;  %v4322_v26 = vmul.f32 %v7436_v39, %v7797_v24 }
 0x266   : > { %v4029_v36 = vadd.f32 %v3997_v18, %v3961_v47  ;;  %v4438_v10 = vrot.slane %v4320_v60, 2  ;;  %v4439_v1 = vrot.slane %v4321_v52, 2  ;;  %v2887_v5 = vmul.f32 %v6857_v2, %v7715_v58  ;;  %v7857_v47 = vld [vmem:[#allocation3 + $0x150] sm:$0xff] }
 0x267   : > { %v4030_v56 = vadd.f32 %v3998_v57, %v3962_v20  ;;  %v4196_v46 = vsel %vm785_vm0, %v4194_v25, %v4195_v63  ;;  %v4198_v44 = vsel %vm785_vm0, %v4195_v63, %v4197_v11  ;;  %v4441_v51 = vrot.slane %v4322_v26, 2  ;;  %v7859_v25 = vld [vmem:[#allocation3 + $0x158] sm:$0xff] }
 0x268   : > { %v4273_v4 = vadd.f32 %v4196_v46, %v4029_v36  ;;  %v4440_v29 = vsel %vm1030_vm1, %v4438_v10, %v4439_v1  ;;  %v2888_v33 = vmul.f32 %v6857_v2, %v7721_v13  ;;  %v2967_v39 = vmul.f32 %v6861_v49, %v7715_v58 }
 0x269   : > { %v4274_v15 = vadd.f32 %v4198_v44, %v4030_v56  ;;  %v4442_v62 = vsel %vm1030_vm1, %v4439_v1, %v4441_v51  ;;  %v2968_v16 = vmul.f32 %v6861_v49, %v7721_v13  ;;  %v2969_v40 = vmul.f32 %v6861_v49, %v7727_v41  ;;  %v7867_v1 = vld [vmem:[#allocation3 + $0x160] sm:$0x3] }
 0x26a   : > { %v4517_v45 = vadd.f32 %v4440_v29, %v4273_v4  ;;  %v3087_v21 = vrot.slane %v2967_v39, 1  ;;  %v3211_v8 = vmul.f32 %v6865_v19, %v7715_v58  ;;  %v3212_v35 = vmul.f32 %v6865_v19, %v7721_v13 }
 0x26b   : > { %v4518_v32 = vadd.f32 %v4442_v62, %v4274_v15  ;;  %v3088_v42 = vrot.slane %v2968_v16, 1  ;;  %v3090_v50 = vrot.slane %v2969_v40, 1  ;;  %v3213_v38 = vmul.f32 %v6865_v19, %v7727_v41 }
 0x26c   : > { %v4556_v43 = vmul.f32 %v7468_v12, %v4517_v45  ;;  %v3331_v0 = vrot.slane %v3211_v8, 2  ;;  %v3332_v55 = vrot.slane %v3212_v35, 2  ;;  %v3443_v59 = vmul.f32 %v6871_v28, %v7789_v48 }
 0x26d   : > { %v4557_v61 = vmul.f32 %v7468_v12, %v4518_v32  ;;  %v3089_v58 = vsel %vm785_vm0, %v3087_v21, %v3088_v42  ;;  %v3091_v27 = vsel %vm785_vm0, %v3088_v42, %v3090_v50  ;;  %v3334_v13 = vrot.slane %v3213_v38, 2  ;;  %v7888_v42 = vld [vmem:[%s8240_s7 + $0x8] ss:$0 sm:$0xff] }
 0x26e   : > { %v4595_v34 = vadd.f32 %v7479_v53, %v4556_v43  ;;  %v3163_v18 = vadd.f32 %v3089_v58, %v2887_v5  ;;  %v3164_v23 = vadd.f32 %v3091_v27, %v2888_v33  ;;  %v3333_v41 = vsel %vm1030_vm1, %v3331_v0, %v3332_v55 }
 0x26f   : > { %v4596_v37 = vadd.f32 %v7479_v53, %v4557_v61  ;;  %v3335_v57 = vsel %vm1030_vm1, %v3332_v55, %v3334_v13  ;;  %v3444_v54 = vmul.f32 %v6871_v28, %v7793_v9  ;;  %v3523_v12 = vmul.f32 %v6875_v31, %v7789_v48 }
 0x270   : > { %v4627_v17 = vmax.f32 %v4595_v34, 0.0  ;;  %v3407_v14 = vadd.f32 %v3333_v41, %v3163_v18  ;;  %v3408_v30 = vadd.f32 %v3335_v57, %v3164_v23  ;;  %v3524_v60 = vmul.f32 %v6875_v31, %v7793_v9 }
 0x271   : > { %v4628_v3 = vmax.f32 %v4596_v37, 0.0  ;;  %v3525_v53 = vmul.f32 %v6875_v31, %v7797_v24  ;;  %v3643_v52 = vrot.slane %v3523_v12, 1  ;;  %v3767_v20 = vmul.f32 %v6879_v6, %v7789_v48 }
 0x272   : > { %v3475_v63 = vadd.f32 %v3443_v59, %v3407_v14  ;;  %v3476_v11 = vadd.f32 %v3444_v54, %v3408_v30  ;;  %v3644_v26 = vrot.slane %v3524_v60, 1  ;;  %v3768_v36 = vmul.f32 %v6879_v6, %v7793_v9 }
 0x273   : > { %v4648_v10 = vpack.c.bf16 %v4628_v3, %v4627_v17  ;;  %v3646_v5 = vrot.slane %v3525_v53, 1  ;;  %v3769_v56 = vmul.f32 %v6879_v6, %v7797_v24  ;;  %v3887_v46 = vrot.slane %v3767_v20, 2 }
 0x274   : > { %v3645_v44 = vsel %vm785_vm0, %v3643_v52, %v3644_v26  ;;  %v3888_v51 = vrot.slane %v3768_v36, 2  ;;  %v3999_v4 = vmul.f32 %v6883_v7, %v7857_v47  ;;  %v4000_v29 = vmul.f32 %v6883_v7, %v7859_v25  ;;  %v7917_v36 = vld [vmem:[%s8241_s8] ss:$0 sm:$0xff] }
 0x275   : > { %5247 = vmatmul.mubr.bf16.gmra.mxu1 %v4648_v10  ;;  %v3647_v33 = vsel %vm785_vm0, %v3644_v26, %v3646_v5  ;;  %v3719_v39 = vadd.f32 %v3645_v44, %v3475_v63  ;;  %v3890_v15 = vrot.slane %v3769_v56, 2  ;;  %v4079_v62 = vmul.f32 %v6899_v22, %v7857_v47 }
 0x276   : > { %v3720_v16 = vadd.f32 %v3647_v33, %v3476_v11  ;;  %v3889_v40 = vsel %vm1030_vm1, %v3887_v46, %v3888_v51  ;;  %v4080_v45 = vmul.f32 %v6899_v22, %v7859_v25  ;;  %v4081_v21 = vmul.f32 %v6899_v22, %v7867_v1 }
 0x277   : > { %v3891_v8 = vsel %vm1030_vm1, %v3888_v51, %v3890_v15  ;;  %v3963_v35 = vadd.f32 %v3889_v40, %v3719_v39  ;;  %v4199_v32 = vrot.slane %v4079_v62, 1  ;;  %v4323_v50 = vmul.f32 %v7888_v42, %v7857_v47 }
 0x278   : > { %v3964_v38 = vadd.f32 %v3891_v8, %v3720_v16  ;;  %v4200_v43 = vrot.slane %v4080_v45, 1  ;;  %v4202_v0 = vrot.slane %v4081_v21, 1  ;;  %v4324_v55 = vmul.f32 %v7888_v42, %v7859_v25 }
 0x279   : > { %v4031_v59 = vadd.f32 %v3999_v4, %v3963_v35  ;;  %v4325_v61 = vmul.f32 %v7888_v42, %v7867_v1  ;;  %v4443_v58 = vrot.slane %v4323_v50, 2  ;;  %v2889_v27 = vmul.f32 %v6857_v2, %v7789_v48  ;;  %v7930_v4 = vld [vmem:[%s8242_s9] ss:$0 sm:$0xff]  ;;  %v7942_v50 = vld [vmem:[#allocation3 + $0x168] sm:$0xff] }
 0x27a   : > { %v4032_v13 = vadd.f32 %v4000_v29, %v3964_v38  ;;  %v4201_v34 = vsel %vm785_vm0, %v4199_v32, %v4200_v43  ;;  %v4203_v18 = vsel %vm785_vm0, %v4200_v43, %v4202_v0  ;;  %v4444_v23 = vrot.slane %v4324_v55, 2  ;;  %v7946_v55 = vld [vmem:[#allocation3 + $0x170] sm:$0xff] }
 0x27b   : > { %v4275_v41 = vadd.f32 %v4201_v34, %v4031_v59  ;;  %v4446_v37 = vrot.slane %v4325_v61, 2  ;;  %v2890_v57 = vmul.f32 %v6857_v2, %v7793_v9  ;;  %v2970_v54 = vmul.f32 %v6861_v49, %v7789_v48 }
 0x27c   : > { %v4276_v12 = vadd.f32 %v4203_v18, %v4032_v13  ;;  %v4445_v17 = vsel %vm1030_vm1, %v4443_v58, %v4444_v23  ;;  %v2971_v14 = vmul.f32 %v6861_v49, %v7793_v9  ;;  %v2972_v30 = vmul.f32 %v6861_v49, %v7797_v24 }
 0x27d   : > { %v4447_v60 = vsel %vm1030_vm1, %v4444_v23, %v4446_v37  ;;  %v4519_v3 = vadd.f32 %v4445_v17, %v4275_v41  ;;  %v3092_v53 = vrot.slane %v2970_v54, 1  ;;  %v3214_v52 = vmul.f32 %v6865_v19, %v7789_v48  ;;  %v7954_v41 = vld [vmem:[#allocation3 + $0x178] sm:$0x3] }
 0x27e   : > { %v4520_v20 = vadd.f32 %v4447_v60, %v4276_v12  ;;  %v3093_v63 = vrot.slane %v2971_v14, 1  ;;  %v3095_v11 = vrot.slane %v2972_v30, 1  ;;  %v3215_v26 = vmul.f32 %v6865_v19, %v7793_v9 }
 0x27f   : > { %v4558_v10 = vmul.f32 %v7917_v36, %v4519_v3  ;;  %v3216_v5 = vmul.f32 %v6865_v19, %v7797_v24  ;;  %v3336_v56 = vrot.slane %v3214_v52, 2  ;;  %v3445_v48 = vmul.f32 %v6871_v28, %v7857_v47 }
 0x280   : > { %v4559_v46 = vmul.f32 %v7917_v36, %v4520_v20  ;;  %v3094_v44 = vsel %vm785_vm0, %v3092_v53, %v3093_v63  ;;  %v3096_v9 = vsel %vm785_vm0, %v3093_v63, %v3095_v11  ;;  %v3337_v51 = vrot.slane %v3215_v26, 2 }
 0x281   : > { %v4597_v29 = vadd.f32 %v7930_v4, %v4558_v10  ;;  %v3165_v33 = vadd.f32 %v3094_v44, %v2889_v27  ;;  %v3166_v24 = vadd.f32 %v3096_v9, %v2890_v57  ;;  %v3339_v39 = vrot.slane %v3216_v5, 2 }
 0x282   : > { %v4598_v15 = vadd.f32 %v7930_v4, %v4559_v46  ;;  %v3338_v62 = vsel %vm1030_vm1, %v3336_v56, %v3337_v51  ;;  %v3446_v16 = vmul.f32 %v6871_v28, %v7859_v25  ;;  %v3526_v40 = vmul.f32 %v6875_v31, %v7857_v47 }
 0x283   : > { %v4629_v45 = vmax.f32 %v4597_v29, 0.0  ;;  %v3340_v21 = vsel %vm1030_vm1, %v3337_v51, %v3339_v39  ;;  %v3409_v8 = vadd.f32 %v3338_v62, %v3165_v33  ;;  %v3527_v35 = vmul.f32 %v6875_v31, %v7859_v25 }
 0x284   : > { %v4630_v32 = vmax.f32 %v4598_v15, 0.0  ;;  %v3410_v38 = vadd.f32 %v3340_v21, %v3166_v24  ;;  %v3528_v43 = vmul.f32 %v6875_v31, %v7867_v1  ;;  %v3648_v0 = vrot.slane %v3526_v40, 1 }
 0x285   : > { %v3477_v59 = vadd.f32 %v3445_v48, %v3409_v8  ;;  %v3649_v61 = vrot.slane %v3527_v35, 1  ;;  %v3770_v58 = vmul.f32 %v6879_v6, %v7857_v47  ;;  %v3771_v27 = vmul.f32 %v6879_v6, %v7859_v25 }
 0x286   : > { %v4649_v13 = vpack.c.bf16 %v4630_v32, %v4629_v45  ;;  %v3478_v34 = vadd.f32 %v3446_v16, %v3410_v38  ;;  %v3651_v18 = vrot.slane %v3528_v43, 1  ;;  %v3772_v23 = vmul.f32 %v6879_v6, %v7867_v1 }
 0x287   : > { %v3650_v37 = vsel %vm785_vm0, %v3648_v0, %v3649_v61  ;;  %v3892_v57 = vrot.slane %v3770_v58, 2  ;;  %v3893_v54 = vrot.slane %v3771_v27, 2  ;;  %v4001_v12 = vmul.f32 %v6883_v7, %v7942_v50 }
 0x288   : > { %5250 = vmatprep.mubr.bf16.mxu1 %v4649_v13  ;;  %v3652_v17 = vsel %vm785_vm0, %v3649_v61, %v3651_v18  ;;  %v3721_v14 = vadd.f32 %v3650_v37, %v3477_v59  ;;  %v3895_v30 = vrot.slane %v3772_v23, 2  ;;  %v4002_v60 = vmul.f32 %v6883_v7, %v7946_v55 }
 0x289   : > { %v3722_v3 = vadd.f32 %v3652_v17, %v3478_v34  ;;  %v3894_v53 = vsel %vm1030_vm1, %v3892_v57, %v3893_v54  ;;  %v4082_v52 = vmul.f32 %v6899_v22, %v7942_v50  ;;  %v4083_v20 = vmul.f32 %v6899_v22, %v7946_v55 }
 0x28a   : > { %v3896_v63 = vsel %vm1030_vm1, %v3893_v54, %v3895_v30  ;;  %v3965_v11 = vadd.f32 %v3894_v53, %v3721_v14  ;;  %v4084_v26 = vmul.f32 %v6899_v22, %v7954_v41  ;;  %v4326_v10 = vmul.f32 %v7888_v42, %v7942_v50 }
 0x28b   : > { %v3966_v5 = vadd.f32 %v3896_v63, %v3722_v3  ;;  %v4204_v56 = vrot.slane %v4082_v52, 1  ;;  %v4205_v48 = vrot.slane %v4083_v20, 1  ;;  %v4327_v46 = vmul.f32 %v7888_v42, %v7946_v55 }
 0x28c   : > { %v4033_v44 = vadd.f32 %v4001_v12, %v3965_v11  ;;  %v4207_v9 = vrot.slane %v4084_v26, 1  ;;  %v4328_v51 = vmul.f32 %v7888_v42, %v7954_v41  ;;  %v4448_v29 = vrot.slane %v4326_v10, 2  ;;  %v8010_v10 = vld [vmem:[#allocation3 + $0x180] sm:$0xff] }
 0x28d   : > { %v4034_v33 = vadd.f32 %v4002_v60, %v3966_v5  ;;  %v4206_v24 = vsel %vm785_vm0, %v4204_v56, %v4205_v48  ;;  %v4449_v39 = vrot.slane %v4327_v46, 2  ;;  %v2891_v15 = vmul.f32 %v6857_v2, %v7857_v47  ;;  %v8016_v46 = vld [vmem:[#allocation3 + $0x188] sm:$0xff] }
 0x28e   : > { %v4208_v62 = vsel %vm785_vm0, %v4205_v48, %v4207_v9  ;;  %v4277_v16 = vadd.f32 %v4206_v24, %v4033_v44  ;;  %v4451_v40 = vrot.slane %v4328_v51, 2  ;;  %v2892_v45 = vmul.f32 %v6857_v2, %v7859_v25 }
 0x28f   : > { %v4278_v21 = vadd.f32 %v4208_v62, %v4034_v33  ;;  %v4450_v8 = vsel %vm1030_vm1, %v4448_v29, %v4449_v39  ;;  %v2973_v35 = vmul.f32 %v6861_v49, %v7857_v47  ;;  %v2974_v32 = vmul.f32 %v6861_v49, %v7859_v25  ;;  %v8022_v62 = vld [vmem:[#allocation3 + $0x190] sm:$0x3] }
 0x290   : > { %v4452_v38 = vsel %vm1030_vm1, %v4449_v39, %v4451_v40  ;;  %v4521_v43 = vadd.f32 %v4450_v8, %v4277_v16  ;;  %v2975_v0 = vmul.f32 %v6861_v49, %v7867_v1  ;;  %v3217_v59 = vmul.f32 %v6865_v19, %v7857_v47  ;;  %v8028_v8 = vpop.f32.mrf.mxu1 }
 0x291   : > { %v4522_v61 = vadd.f32 %v4452_v38, %v4278_v21  ;;  %v3097_v58 = vrot.slane %v2973_v35, 1  ;;  %v3098_v27 = vrot.slane %v2974_v32, 1  ;;  %v3218_v13 = vmul.f32 %v6865_v19, %v7859_v25 }
 0x292   : > { %v4560_v34 = vmul.f32 %v7917_v36, %v4521_v43  ;;  %v3100_v18 = vrot.slane %v2975_v0, 1  ;;  %v3219_v23 = vmul.f32 %v6865_v19, %v7867_v1  ;;  %v3341_v37 = vrot.slane %v3217_v59, 2 }
 0x293   : > { %v4561_v57 = vmul.f32 %v7917_v36, %v4522_v61  ;;  %v3099_v54 = vsel %vm785_vm0, %v3097_v58, %v3098_v27  ;;  %v3342_v12 = vrot.slane %v3218_v13, 2  ;;  %v3447_v47 = vmul.f32 %v6871_v28, %v7942_v50 }
 0x294   : > { %v4599_v17 = vadd.f32 %v7930_v4, %v4560_v34  ;;  %v3101_v14 = vsel %vm785_vm0, %v3098_v27, %v3100_v18  ;;  %v3167_v25 = vadd.f32 %v3099_v54, %v2891_v15  ;;  %v3344_v30 = vrot.slane %v3219_v23, 2 }
 0x295   : > { %v4600_v60 = vadd.f32 %v7930_v4, %v4561_v57  ;;  %v3168_v3 = vadd.f32 %v3101_v14, %v2892_v45  ;;  %v3343_v1 = vsel %vm1030_vm1, %v3341_v37, %v3342_v12  ;;  %v3448_v53 = vmul.f32 %v6871_v28, %v7946_v55 }
 0x296   : > { %v4631_v52 = vmax.f32 %v4599_v17, 0.0  ;;  %v3345_v20 = vsel %vm1030_vm1, %v3342_v12, %v3344_v30  ;;  %v3411_v63 = vadd.f32 %v3343_v1, %v3167_v25  ;;  %v3529_v11 = vmul.f32 %v6875_v31, %v7942_v50  ;;  %v8048_v12 = vpop.f32.mrf.mxu1 }
 0x297   : > { %v4632_v26 = vmax.f32 %v4600_v60, 0.0  ;;  %v3412_v5 = vadd.f32 %v3345_v20, %v3168_v3  ;;  %v3530_v56 = vmul.f32 %v6875_v31, %v7946_v55  ;;  %v3531_v48 = vmul.f32 %v6875_v31, %v7954_v41 }
 0x298   : > { %v3479_v44 = vadd.f32 %v3447_v47, %v3411_v63  ;;  %v3653_v9 = vrot.slane %v3529_v11, 1  ;;  %v3773_v51 = vmul.f32 %v6879_v6, %v7942_v50  ;;  %v3774_v29 = vmul.f32 %v6879_v6, %v7946_v55 }
 0x299   : > { %v4650_v33 = vpack.c.bf16 %v4632_v26, %v4631_v52  ;;  %v3480_v24 = vadd.f32 %v3448_v53, %v3412_v5  ;;  %v3654_v39 = vrot.slane %v3530_v56, 1  ;;  %v3656_v15 = vrot.slane %v3531_v48, 1  ;;  %v8060_v48 = vpop.f32.mrf.mxu1 }
 0x29a   : > { %v3775_v16 = vmul.f32 %v6879_v6, %v7954_v41  ;;  %v3897_v40 = vrot.slane %v3773_v51, 2  ;;  %v3898_v45 = vrot.slane %v3774_v29, 2  ;;  %v4003_v21 = vmul.f32 %v6883_v7, %v8010_v10 }
 0x29b   : > { %5251 = vmatmul.mubr.bf16.gmra.mxu1 %v4650_v33  ;;  %v3655_v35 = vsel %vm785_vm0, %v3653_v9, %v3654_v39  ;;  %v3657_v32 = vsel %vm785_vm0, %v3654_v39, %v3656_v15  ;;  %v4004_v38 = vmul.f32 %v6883_v7, %v8016_v46  ;;  %v4085_v43 = vmul.f32 %v6899_v22, %v8010_v10 }
 0x29c   : > { %v3723_v0 = vadd.f32 %v3655_v35, %v3479_v44  ;;  %v3724_v59 = vadd.f32 %v3657_v32, %v3480_v24  ;;  %v3899_v61 = vsel %vm1030_vm1, %v3897_v40, %v3898_v45  ;;  %v3900_v58 = vrot.slane %v3775_v16, 2 }
 0x29d   : > { %v4086_v27 = vmul.f32 %v6899_v22, %v8016_v46  ;;  %v4087_v13 = vmul.f32 %v6899_v22, %v8022_v62  ;;  %v4209_v34 = vrot.slane %v4085_v43, 1  ;;  %v4329_v18 = vmul.f32 %v7888_v42, %v8010_v10 }
 0x29e   : > { %v3901_v23 = vsel %vm1030_vm1, %v3898_v45, %v3900_v58  ;;  %v3967_v37 = vadd.f32 %v3899_v61, %v3723_v0  ;;  %v4330_v57 = vmul.f32 %v7888_v42, %v8016_v46  ;;  %v4331_v54 = vmul.f32 %v7888_v42, %v8022_v62 }
 0x29f   : > { %v3968_v47 = vadd.f32 %v3901_v23, %v3724_v59  ;;  %v4210_v17 = vrot.slane %v4086_v27, 1  ;;  %v4212_v14 = vrot.slane %v4087_v13, 1  ;;  %v4453_v25 = vrot.slane %v4329_v18, 2 }
 0x2a0   : > { %v4035_v30 = vadd.f32 %v4003_v21, %v3967_v37  ;;  %v4454_v60 = vrot.slane %v4330_v57, 2  ;;  %v4456_v3 = vrot.slane %v4331_v54, 2  ;;  %v2893_v1 = vmul.f32 %v6857_v2, %v7942_v50 }
 0x2a1   : > { %v4036_v53 = vadd.f32 %v4004_v38, %v3968_v47  ;;  %v4211_v52 = vsel %vm785_vm0, %v4209_v34, %v4210_v17  ;;  %v4213_v20 = vsel %vm785_vm0, %v4210_v17, %v4212_v14  ;;  %v2894_v63 = vmul.f32 %v6857_v2, %v7946_v55 }
 0x2a2   : > { %v4279_v11 = vadd.f32 %v4211_v52, %v4035_v30  ;;  %v4455_v26 = vsel %vm1030_vm1, %v4453_v25, %v4454_v60  ;;  %v4457_v5 = vsel %vm1030_vm1, %v4454_v60, %v4456_v3  ;;  %v2976_v56 = vmul.f32 %v6861_v49, %v7942_v50  ;;  %v2856_v25 = vld [vmem:[#allocation3 + $0x1a8] sm:$0x3] }
 0x2a3   : > { %v4280_v44 = vadd.f32 %v4213_v20, %v4036_v53  ;;  %v2977_v9 = vmul.f32 %v6861_v49, %v7946_v55  ;;  %v2978_v51 = vmul.f32 %v6861_v49, %v7954_v41  ;;  %v3220_v2 = vmul.f32 %v6865_v19, %v7942_v50  ;;  %v8075_v50 = vpop.f32.mrf.mxu1 }
 0x2a4   : > { %v4523_v29 = vadd.f32 %v4455_v26, %v4279_v11  ;;  %v3102_v33 = vrot.slane %v2976_v56, 1  ;;  %v3221_v24 = vmul.f32 %v6865_v19, %v7946_v55  ;;  %v3222_v39 = vmul.f32 %v6865_v19, %v7954_v41 }
 0x2a5   : > { %v4524_v15 = vadd.f32 %v4457_v5, %v4280_v44  ;;  %v3103_v16 = vrot.slane %v2977_v9, 1  ;;  %v3105_v40 = vrot.slane %v2978_v51, 1  ;;  %v3346_v45 = vrot.slane %v3220_v2, 2  ;;  %v5232_v57 = vpop.f32.mrf.mxu1  ;;  %v5298_v5 = vld [vmem:[#allocation2] sm:$0xff] }
 0x2a6   : > { %v4562_v21 = vmul.f32 %v7917_v36, %v4523_v29  ;;  %v3347_v35 = vrot.slane %v3221_v24, 2  ;;  %v3349_v32 = vrot.slane %v3222_v39, 2  ;;  %v3449_v49 = vmul.f32 %v6871_v28, %v8010_v10 }
 0x2a7   : > { %v4563_v38 = vmul.f32 %v7917_v36, %v4524_v15  ;;  %v3104_v55 = vsel %vm785_vm0, %v3102_v33, %v3103_v16  ;;  %v3106_v43 = vsel %vm785_vm0, %v3103_v16, %v3105_v40  ;;  %v3450_v19 = vmul.f32 %v6871_v28, %v8016_v46 }
 0x2a8   : > { %v4601_v41 = vadd.f32 %v7930_v4, %v4562_v21  ;;  %v3169_v0 = vadd.f32 %v3104_v55, %v2893_v1  ;;  %v3170_v59 = vadd.f32 %v3106_v43, %v2894_v63  ;;  %v3348_v61 = vsel %vm1030_vm1, %v3346_v45, %v3347_v35  ;;  %v8102_v63 = vld [vmem:[%s8244_s11] ss:$0 sm:$0xff]  ;;  %v5299_v55 = vld [vmem:[#allocation2 + $0x31] sm:$0xff] }
 0x2a9   : > { %v4602_v58 = vadd.f32 %v7930_v4, %v4563_v38  ;;  %v3350_v27 = vsel %vm1030_vm1, %v3347_v35, %v3349_v32  ;;  %v3532_v13 = vmul.f32 %v6875_v31, %v8010_v10  ;;  %v3533_v34 = vmul.f32 %v6875_v31, %v8016_v46 }
 0x2aa   : > { %v4633_v18 = vmax.f32 %v4601_v41, 0.0  ;;  %v3413_v23 = vadd.f32 %v3348_v61, %v3169_v0  ;;  %v3414_v37 = vadd.f32 %v3350_v27, %v3170_v59  ;;  %v3534_v28 = vmul.f32 %v6875_v31, %v8022_v62 }
 0x2ab   : > { %v4634_v54 = vmax.f32 %v4602_v58, 0.0  ;;  %v3658_v47 = vrot.slane %v3532_v13, 1  ;;  %v3659_v17 = vrot.slane %v3533_v34, 1  ;;  %v3776_v14 = vmul.f32 %v6879_v6, %v8010_v10 }
 0x2ac   : > { %v3481_v30 = vadd.f32 %v3449_v49, %v3413_v23  ;;  %v3482_v60 = vadd.f32 %v3450_v19, %v3414_v37  ;;  %v3661_v3 = vrot.slane %v3534_v28, 1  ;;  %v3777_v1 = vmul.f32 %v6879_v6, %v8016_v46  ;;  %v4767_v46 = vpop.f32.mrf.mxu1 }
 0x2ad   : > { %v4651_v53 = vpack.c.bf16 %v4634_v54, %v4633_v18  ;;  %v3660_v52 = vsel %vm785_vm0, %v3658_v47, %v3659_v17  ;;  %v3778_v31 = vmul.f32 %v6879_v6, %v8022_v62  ;;  %v3902_v20 = vrot.slane %v3776_v14, 2  ;;  %v8111_v62 = vld [vmem:[%s8245_s12] ss:$0 sm:$0xff] }
 0x2ae   : > { %v3662_v10 = vsel %vm785_vm0, %v3659_v17, %v3661_v3  ;;  %v3725_v11 = vadd.f32 %v3660_v52, %v3481_v30  ;;  %v3903_v26 = vrot.slane %v3777_v1, 2  ;;  %v4005_v56 = vmul.f32 %v5298_v5, %v6883_v7  ;;  %v5233_v35 = vpop.f32.mrf.mxu1  ;;  %v5300_v18 = vld [vmem:[#allocation2 + $0x19] sm:$0xff]  ;;  %v5303_v1 = vld [vmem:[#allocation2 + $0x61] sm:$0xff]  ;;  %v5304_v52 = vld [vmem:[#allocation2 + $0x49] sm:$0xff] }
 0x2af   : > { %5254 = vmatprep.mubr.bf16.mxu1 %v4651_v53  ;;  %v3726_v44 = vadd.f32 %v3662_v10, %v3482_v60  ;;  %v3905_v9 = vrot.slane %v3778_v31, 2  ;;  %v4088_v51 = vmul.f32 %v5298_v5, %v6899_v22  ;;  %v4090_v6 = vmul.f32 %v6899_v22, %v2856_v25  ;;  %v5301_v17 = vld [vmem:[#allocation2 + $0x39] sm:$0xff] }
 0x2b0   : > { %v3904_v2 = vsel %vm1030_vm1, %v3902_v20, %v3903_v26  ;;  %v4332_v29 = vmul.f32 %v5298_v5, %v7888_v42  ;;  %v4334_v7 = vmul.f32 %v7888_v42, %v2856_v25  ;;  %v4887_v33 = vmul.f32 %v8028_v8, %v8102_v63  ;;  %v4770_v13 = vpop.f32.mrf.mxu1  ;;  %v5302_v25 = vld [vmem:[#allocation2 + $0x21] sm:$0xff]  ;;  %v5305_v20 = vld [vmem:[#allocation2 + $0x69] sm:$0xff] }
 0x2b1   : > { %v3906_v24 = vsel %vm1030_vm1, %v3903_v26, %v3905_v9  ;;  %v3969_v39 = vadd.f32 %v3904_v2, %v3725_v11  ;;  %v4214_v15 = vrot.slane %v4088_v51, 1  ;;  %v4217_v22 = vrot.slane %v4090_v6, 1 }
 0x2b2   : > { %v3970_v16 = vadd.f32 %v3906_v24, %v3726_v44  ;;  %v4458_v40 = vrot.slane %v4332_v29, 2  ;;  %v4461_v45 = vrot.slane %v4334_v7, 2  ;;  %v4926_v21 = vadd.f32 %v8111_v62, %v4887_v33  ;;  %v5306_v44 = vld [vmem:[#allocation2 + $0x51] sm:$0xff] }
 0x2b3   : > { %v4037_v32 = vadd.f32 %v4005_v56, %v3969_v39  ;;  %v4218_v49 = vsel %vm785_vm0, %v4214_v15, %v4217_v22  ;;  %v4885_v42 = vmul.f32 %v8102_v63, %v8048_v12  ;;  %v4888_v0 = vmul.f32 %v8060_v48, %v8102_v63 }
 0x2b4   : > { %v4038_v8 = vadd.f32 %v4005_v56, %v3970_v16  ;;  %v4462_v38 = vsel %vm1030_vm1, %v4458_v40, %v4461_v45  ;;  %v4958_v43 = vadd.f32 %v5299_v55, %v4926_v21  ;;  %v4886_v59 = vmul.f32 %v8102_v63, %v8075_v50  ;;  %v5308_v16 = vld [vmem:[#allocation2 + $0x79] sm:$0xff] }
 0x2b5   : > { %v4281_v19 = vadd.f32 %v4214_v15, %v4037_v32  ;;  %v4924_v41 = vadd.f32 %v8111_v62, %v4885_v42  ;;  %v4891_v58 = vmul.f32 %v5232_v57, %v8102_v63  ;;  %v4889_v12 = vmul.f32 %v8102_v63, %v4767_v46  ;;  %v5310_v42 = vld [vmem:[#allocation2 + $0x81] sm:$0xff] }
 0x2b6   : > { %v4282_v61 = vadd.f32 %v4218_v49, %v4038_v8  ;;  %4990 = vst [vmem:[%s8126_s15 + $0x10] sm:$0xff] %v4958_v43  ;;  %v4892_v27 = vmul.f32 %v5233_v35, %v8102_v63  ;;  %v4927_v37 = vadd.f32 %v8111_v62, %v4888_v0  ;;  %v4925_v48 = vadd.f32 %v8111_v62, %v4886_v59  ;;  %v5309_v35 = vld [vmem:[#allocation2 + $0x99] sm:$0xff]  ;;  %v5311_v59 = vld [vmem:[#allocation2 + $0xc1] sm:$0xff] }
 0x2b7   : > { %v4525_v34 = vadd.f32 %v4458_v40, %v4281_v19  ;;  %v4956_v23 = vadd.f32 %v5300_v18, %v4924_v41  ;;  %v4930_v50 = vadd.f32 %v8111_v62, %v4891_v58  ;;  %v4928_v54 = vadd.f32 %v8111_v62, %v4889_v12 }
 0x2b8   : > { %v4526_v28 = vadd.f32 %v4462_v38, %v4282_v61  ;;  %v4931_v47 = vadd.f32 %v8111_v62, %v4892_v27  ;;  %v4959_v14 = vadd.f32 %v5301_v17, %v4927_v37  ;;  %v4957_v30 = vadd.f32 %v5302_v25, %v4925_v48  ;;  %v5313_v37 = vld [vmem:[#allocation2 + $0xc9] sm:$0xff] }
 0x2b9   : > { %v4564_v57 = vmul.f32 %v7917_v36, %v4525_v34  ;;  %4988 = vst [vmem:[%s8126_s15] sm:$0xff] %v4956_v23  ;;  %v4890_v60 = vmul.f32 %v8102_v63, %v4770_v13  ;;  %v4962_v53 = vadd.f32 %v5303_v1, %v4930_v50  ;;  %v4960_v31 = vadd.f32 %v5304_v52, %v4928_v54  ;;  %v5312_v13 = vld [vmem:[#allocation2 + $0xa9] sm:$0xff]  ;;  %v5314_v50 = vld [vmem:[#allocation2 + $0xb1] sm:$0xff] }
 0x2ba   : > { %v4565_v3 = vmul.f32 %v7917_v36, %v4526_v28  ;;  %v4963_v10 = vadd.f32 %v5305_v20, %v4931_v47  ;;  %4991 = vst [vmem:[%s8126_s15 + $0x18] sm:$0xff] %v4959_v14  ;;  %4989 = vst [vmem:[%s8126_s15 + $0x8] sm:$0xff] %v4957_v30 }
 0x2bb   : > { %v4603_v11 = vadd.f32 %v7930_v4, %v4564_v57  ;;  %v4929_v26 = vadd.f32 %v8111_v62, %v4890_v60  ;;  %v5236_v5 = vpop.f32.mrf.mxu1  ;;  %4994 = vst [vmem:[%s8126_s15 + $0x30] sm:$0xff] %v4962_v53  ;;  %4992 = vst [vmem:[%s8126_s15 + $0x20] sm:$0xff] %v4960_v31  ;;  %v5315_v60 = vld [vmem:[#allocation2 + $0xf1] sm:$0xff]  ;;  %v5316_v31 = vld [vmem:[#allocation2 + $0xd9] sm:$0xff] }
 0x2bc   : > { %v4604_v56 = vadd.f32 %v7930_v4, %v4565_v3  ;;  %4995 = vst [vmem:[%s8126_s15 + $0x38] sm:$0xff] %v4963_v10  ;;  %v4895_v36 = vmul.f32 %v5236_v5, %v8102_v63  ;;  %v5307_v4 = vld [vmem:[#allocation2 + $0x91] sm:$0xff] }
 0x2bd   : > { %v4635_v46 = vmax.f32 %v4603_v11, 0.0  ;;  %v4961_v9 = vadd.f32 %v5306_v44, %v4929_v26  ;;  %v4783_v51 = vpop.f32.mrf.mxu1  ;;  %v5317_v26 = vld [vmem:[#allocation2 + $0xf9] sm:$0xff] }
 0x2be   : > { %v4636_v6 = vmax.f32 %v4604_v56, 0.0  ;;  %v4934_v2 = vadd.f32 %v8111_v62, %v4895_v36  ;;  %v4893_v29 = vmul.f32 %v8102_v63, %v4783_v51  ;;  %v5318_v36 = vld [vmem:[#allocation2 + $0xe1] sm:$0xff] }
 0x2bf   : > { %4993 = vst [vmem:[%s8126_s15 + $0x28] sm:$0xff] %v4961_v9  ;;  %v5237_v7 = vpop.f32.mrf.mxu1 }
 0x2c0   : > { %v4652_v33 = vpack.c.bf16 %v4636_v6, %v4635_v46  ;;  %v4966_v24 = vadd.f32 %v5307_v4, %v4934_v2  ;;  %v4932_v39 = vadd.f32 %v8111_v62, %v4893_v29  ;;  %v4896_v15 = vmul.f32 %v5237_v7, %v8102_v63  ;;  %v5319_v7 = vld [vmem:[#allocation2 + $0x121] sm:$0xff] }
 0x2c1   : > { %v4786_v22 = vpop.f32.mrf.mxu1 }
 0x2c2   : > { %5255 = vmatmul.mubr.bf16.gmra.mxu1 %v4652_v33  ;;  %4998 = vst [vmem:[%s8126_s15 + $0x50] sm:$0xff] %v4966_v24  ;;  %v4964_v40 = vadd.f32 %v5308_v16, %v4932_v39  ;;  %v4935_v45 = vadd.f32 %v8111_v62, %v4896_v15  ;;  %v4894_v21 = vmul.f32 %v8102_v63, %v4786_v22  ;;  %v5320_v15 = vld [vmem:[#allocation2 + $0x109] sm:$0xff] }
 0x2c4   : > { %4996 = vst [vmem:[%s8126_s15 + $0x40] sm:$0xff] %v4964_v40  ;;  %v4967_v32 = vadd.f32 %v5309_v35, %v4935_v45  ;;  %v4933_v49 = vadd.f32 %v8111_v62, %v4894_v21  ;;  %v5321_v45 = vld [vmem:[#allocation2 + $0x129] sm:$0xff] }
 0x2c6   : > { %4999 = vst [vmem:[%s8126_s15 + $0x58] sm:$0xff] %v4967_v32  ;;  %v4965_v8 = vadd.f32 %v5310_v42, %v4933_v49  ;;  %v5322_v32 = vld [vmem:[#allocation2 + $0x111] sm:$0xff] }
 0x2c8   : > { %4997 = vst [vmem:[%s8126_s15 + $0x48] sm:$0xff] %v4965_v8 }
 0x2e5   : > { %v5240_v38 = vpop.f32.mrf.mxu1 }
 0x2e6   : > { %v4899_v55 = vmul.f32 %v5240_v38, %v8102_v63 }
 0x2e7   : > { %v4799_v43 = vpop.f32.mrf.mxu1 }
 0x2e8   : > { %v4938_v19 = vadd.f32 %v8111_v62, %v4899_v55  ;;  %v4897_v41 = vmul.f32 %v8102_v63, %v4799_v43 }
 0x2e9   : > { %v5241_v0 = vpop.f32.mrf.mxu1 }
 0x2ea   : > { %v4970_v61 = vadd.f32 %v5311_v59, %v4938_v19  ;;  %v4936_v58 = vadd.f32 %v8111_v62, %v4897_v41  ;;  %v4900_v12 = vmul.f32 %v5241_v0, %v8102_v63  ;;  %v5323_v41 = vld [vmem:[#allocation2 + $0x151] sm:$0xff] }
 0x2eb   : > { %v4802_v27 = vpop.f32.mrf.mxu1 }
 0x2ec   : > { %5002 = vst [vmem:[%s8126_s15 + $0x70] sm:$0xff] %v4970_v61  ;;  %v4968_v34 = vadd.f32 %v5312_v13, %v4936_v58  ;;  %v4939_v18 = vadd.f32 %v8111_v62, %v4900_v12  ;;  %v4898_v23 = vmul.f32 %v8102_v63, %v4802_v27  ;;  %v5324_v12 = vld [vmem:[#allocation2 + $0x139] sm:$0xff] }
 0x2ee   : > { %5000 = vst [vmem:[%s8126_s15 + $0x60] sm:$0xff] %v4968_v34  ;;  %v4971_v48 = vadd.f32 %v5313_v37, %v4939_v18  ;;  %v4937_v28 = vadd.f32 %v8111_v62, %v4898_v23  ;;  %v5325_v18 = vld [vmem:[#allocation2 + $0x159] sm:$0xff] }
 0x2f0   : > { %5003 = vst [vmem:[%s8126_s15 + $0x78] sm:$0xff] %v4971_v48  ;;  %v4969_v54 = vadd.f32 %v5314_v50, %v4937_v28  ;;  %v5326_v48 = vld [vmem:[#allocation2 + $0x141] sm:$0xff] }
 0x2f2   : > { %5001 = vst [vmem:[%s8126_s15 + $0x68] sm:$0xff] %v4969_v54 }
 0x311   : > { %v5244_v47 = vpop.f32.mrf.mxu1 }
 0x312   : > { %v4903_v57 = vmul.f32 %v5244_v47, %v8102_v63 }
 0x313   : > { %v4815_v17 = vpop.f32.mrf.mxu1 }
 0x314   : > { %v4942_v14 = vadd.f32 %v8111_v62, %v4903_v57  ;;  %v4901_v25 = vmul.f32 %v8102_v63, %v4815_v17 }
 0x315   : > { %v5245_v30 = vpop.f32.mrf.mxu1 }
 0x316   : > { %v4974_v3 = vadd.f32 %v5315_v60, %v4942_v14  ;;  %v4940_v1 = vadd.f32 %v8111_v62, %v4901_v25  ;;  %v4904_v53 = vmul.f32 %v5245_v30, %v8102_v63  ;;  %v5327_v25 = vld [vmem:[#allocation2 + $0x181] sm:$0xff] }
 0x317   : > { %v4818_v52 = vpop.f32.mrf.mxu1 }
 0x318   : > { %5006 = vst [vmem:[%s8126_s15 + $0x90] sm:$0xff] %v4974_v3  ;;  %v4972_v20 = vadd.f32 %v5316_v31, %v4940_v1  ;;  %v4943_v10 = vadd.f32 %v8111_v62, %v4904_v53  ;;  %v4902_v11 = vmul.f32 %v8102_v63, %v4818_v52  ;;  %v5328_v53 = vld [vmem:[#allocation2 + $0x169] sm:$0xff] }
 0x31a   : > { %5004 = vst [vmem:[%s8126_s15 + $0x80] sm:$0xff] %v4972_v20  ;;  %v4975_v5 = vadd.f32 %v5317_v26, %v4943_v10  ;;  %v4941_v56 = vadd.f32 %v8111_v62, %v4902_v11  ;;  %v5329_v10 = vld [vmem:[#allocation2 + $0x189] sm:$0xff] }
 0x31c   : > { %5007 = vst [vmem:[%s8126_s15 + $0x98] sm:$0xff] %v4975_v5  ;;  %v4973_v46 = vadd.f32 %v5318_v36, %v4941_v56  ;;  %v5330_v5 = vld [vmem:[#allocation2 + $0x171] sm:$0xff] }
 0x31e   : > { %5005 = vst [vmem:[%s8126_s15 + $0x88] sm:$0xff] %v4973_v46 }
 0x335   : > { %v5248_v44 = vpop.f32.mrf.mxu1 }
 0x336   : > { %v4907_v9 = vmul.f32 %v5248_v44, %v8102_v63 }
 0x337   : > { %v4831_v51 = vpop.f32.mrf.mxu1 }
 0x338   : > { %v4946_v6 = vadd.f32 %v8111_v62, %v4907_v9  ;;  %v4905_v2 = vmul.f32 %v8102_v63, %v4831_v51 }
 0x339   : > { %v5249_v29 = vpop.f32.mrf.mxu1 }
 0x33a   : > { %v4978_v33 = vadd.f32 %v5319_v7, %v4946_v6  ;;  %v4944_v4 = vadd.f32 %v8111_v62, %v4905_v2  ;;  %v4908_v24 = vmul.f32 %v5249_v29, %v8102_v63 }
 0x33b   : > { %v4834_v39 = vpop.f32.mrf.mxu1 }
 0x33c   : > { %5010 = vst [vmem:[%s8126_s15 + $0xb0] sm:$0xff] %v4978_v33  ;;  %v4976_v22 = vadd.f32 %v5320_v15, %v4944_v4  ;;  %v4947_v16 = vadd.f32 %v8111_v62, %v4908_v24  ;;  %v4906_v40 = vmul.f32 %v8102_v63, %v4834_v39 }
 0x33e   : > { %5008 = vst [vmem:[%s8126_s15 + $0xa0] sm:$0xff] %v4976_v22  ;;  %v4979_v21 = vadd.f32 %v5321_v45, %v4947_v16  ;;  %v4945_v35 = vadd.f32 %v8111_v62, %v4906_v40 }
 0x340   : > { %5011 = vst [vmem:[%s8126_s15 + $0xb8] sm:$0xff] %v4979_v21  ;;  %v4977_v49 = vadd.f32 %v5322_v32, %v4945_v35 }
 0x342   : > { %5009 = vst [vmem:[%s8126_s15 + $0xa8] sm:$0xff] %v4977_v49 }
 0x35b   : > { %v5252_v42 = vpop.f32.mrf.mxu1 }
 0x35c   : > { %v4911_v8 = vmul.f32 %v5252_v42, %v8102_v63 }
 0x35d   : > { %v4847_v38 = vpop.f32.mrf.mxu1 }
 0x35e   : > { %v4950_v55 = vadd.f32 %v8111_v62, %v4911_v8  ;;  %v4909_v43 = vmul.f32 %v8102_v63, %v4847_v38 }
 0x35f   : > { %v5253_v19 = vpop.f32.mrf.mxu1 }
 0x360   : > { %v4982_v0 = vadd.f32 %v5323_v41, %v4950_v55  ;;  %v4948_v59 = vadd.f32 %v8111_v62, %v4909_v43  ;;  %v4912_v61 = vmul.f32 %v5253_v19, %v8102_v63 }
 0x361   : > { %v4850_v58 = vpop.f32.mrf.mxu1 }
 0x362   : > { %5014 = vst [vmem:[%s8126_s15 + $0xd0] sm:$0xff] %v4982_v0  ;;  %v4980_v27 = vadd.f32 %v5324_v12, %v4948_v59  ;;  %v4951_v13 = vadd.f32 %v8111_v62, %v4912_v61  ;;  %v4910_v34 = vmul.f32 %v8102_v63, %v4850_v58 }
 0x364   : > { %5012 = vst [vmem:[%s8126_s15 + $0xc0] sm:$0xff] %v4980_v27  ;;  %v4983_v23 = vadd.f32 %v5325_v18, %v4951_v13  ;;  %v4949_v37 = vadd.f32 %v8111_v62, %v4910_v34 }
 0x366   : > { %5015 = vst [vmem:[%s8126_s15 + $0xd8] sm:$0xff] %v4983_v23  ;;  %v4981_v28 = vadd.f32 %v5326_v48, %v4949_v37 }
 0x368   : > { %5013 = vst [vmem:[%s8126_s15 + $0xc8] sm:$0xff] %v4981_v28 }
 0x382   : > { %v5256_v50 = vpop.f32.mrf.mxu1 }
 0x383   : > { %v4915_v54 = vmul.f32 %v5256_v50, %v8102_v63 }
 0x384   : > { %v4863_v47 = vpop.f32.mrf.mxu1 }
 0x385   : > { %v4954_v57 = vadd.f32 %v8111_v62, %v4915_v54  ;;  %v4913_v17 = vmul.f32 %v8102_v63, %v4863_v47 }
 0x386   : > { %v5257_v14 = vpop.f32.mrf.mxu1 }
 0x387   : > { %v4986_v30 = vadd.f32 %v5327_v25, %v4954_v57  ;;  %v4952_v60 = vadd.f32 %v8111_v62, %v4913_v17  ;;  %v4916_v3 = vmul.f32 %v5257_v14, %v8102_v63 }
 0x388   : > { %v4866_v1 = vpop.f32.mrf.mxu1 }
 0x389   : > { %5018 = vst [vmem:[%s8126_s15 + $0xf0] sm:$0xff] %v4986_v30  ;;  %v4984_v52 = vadd.f32 %v5328_v53, %v4952_v60  ;;  %v4955_v31 = vadd.f32 %v8111_v62, %v4916_v3  ;;  %v4914_v20 = vmul.f32 %v8102_v63, %v4866_v1 }
 0x38b   : > { %5016 = vst [vmem:[%s8126_s15 + $0xe0] sm:$0xff] %v4984_v52  ;;  %v4987_v11 = vadd.f32 %v5329_v10, %v4955_v31  ;;  %v4953_v26 = vadd.f32 %v8111_v62, %v4914_v20 }
 0x38d   : > { %5019 = vst [vmem:[%s8126_s15 + $0xf8] sm:$0xff] %v4987_v11  ;;  %v4985_v56 = vadd.f32 %v5330_v5, %v4953_v26 }
 0x38f   : > { %5017 = vst [vmem:[%s8126_s15 + $0xe8] sm:$0xff] %v4985_v56 }
 0x390 PF: > { %s23_s25 = sadd.s32 1, %s5337_s25  }
 0x391   : > { %p20_p4 = scmp.ge.s32.totalorder %s23_s25, 4  }
 0x393   :  { %22 = sbr.rel (!%p20_p4) target bundleno = 1 (0x1), region = 104 }

</bundles_post_ra>
